<compile_context>
chip_gen: v6e
topology: v6e:2x2x1
jax: 0.10.0
libtpu: 0.0.40
codegen_flags: <defaults>
</compile_context>

<pallas_src>
import functools

import jax
import jax.numpy as jnp
from jax.experimental import pallas as pl
from jax.experimental.pallas import tpu as pltpu


# ---------------------------------------------------------------------------
# Kernel
# ---------------------------------------------------------------------------
def _layernorm(x, g, b, eps=1e-5):
    mu = jnp.mean(x, axis=-1, keepdims=True)
    var = jnp.mean((x - mu) ** 2, axis=-1, keepdims=True)
    return (x - mu) * jax.lax.rsqrt(var + eps) * g + b


def _rab_kernel(*refs, d_model, n_head, nb, seq_len, has_mask, mlp_block):
    if has_mask:
        (x_ref, mask_ref, ln1g_ref, ln1b_ref, win_t_ref, bin_ref,
         wout_h_ref, bout_ref, ln2g_ref, ln2b_ref,
         wfc_t_ref, bfc_ref, wproj_t_ref, bproj_ref, o_ref) = refs
    else:
        (x_ref, ln1g_ref, ln1b_ref, win_t_ref, bin_ref,
         wout_h_ref, bout_ref, ln2g_ref, ln2b_ref,
         wfc_t_ref, bfc_ref, wproj_t_ref, bproj_ref, o_ref) = refs
        mask_ref = None

    head_dim = d_model // n_head
    M = nb * seq_len
    bf16 = jnp.bfloat16

    x = x_ref[...].astype(jnp.float32).reshape(M, d_model)          # (M, D) fp32

    # ---------------- attention branch ----------------
    h = _layernorm(x, ln1g_ref[...], ln1b_ref[...])                 # LN1 (fp32)
    # q-scale already folded into win_t / bin (prepare_params).
    qkv = jnp.dot(h.astype(bf16), win_t_ref[...],
                  preferred_element_type=jnp.float32) + bin_ref[...]  # (M, 3D) f32

    def gather_heads(base):
        # (M, D) column block -> (n_head*nb, L, hd): heads stacked on the MAJOR
        # batch axis (cheap concat); only relayout is the per-head lane slice.
        parts = [qkv[:, base + hh * head_dim: base + (hh + 1) * head_dim]
                 .reshape(nb, seq_len, head_dim).astype(bf16)
                 for hh in range(n_head)]
        return jnp.concatenate(parts, axis=0)                       # (H*nb, L, hd)

    qh = gather_heads(0)
    kh = gather_heads(d_model)
    vh = gather_heads(2 * d_model)

    # ONE batched dot for scores, ONE for p@v (batch = n_head*nb).
    s = jnp.einsum("bqd,bkd->bqk", qh, kh,
                   preferred_element_type=jnp.float32)              # (H*nb, L, L)
    if has_mask:
        s = s + mask_ref[...].astype(jnp.float32)                   # single broadcast add
    s = s - jnp.max(s, axis=-1, keepdims=True)
    p = jnp.exp(s)
    p = p * pl.reciprocal(jnp.sum(p, axis=-1, keepdims=True), approx=True)
    o = jnp.einsum("bqk,bkd->bqd", p.astype(bf16), vh,
                   preferred_element_type=jnp.float32)               # (H*nb, L, hd)
    o = o.reshape(n_head, M, head_dim)

    # Out-projection accumulated per head: avoids the lane-axis concat of head
    # outputs; only the (M, D) accumulator stays live across the static loop.
    attn = jnp.zeros((M, d_model), jnp.float32)
    for hh in range(n_head):
        attn = attn + jnp.dot(o[hh].astype(bf16), wout_h_ref[hh],
                              preferred_element_type=jnp.float32)
    x = x + attn + bout_ref[...]                                     # residual (fp32)

    # ---------------- MLP branch ----------------
    h2 = _layernorm(x, ln2g_ref[...], ln2b_ref[...]).astype(bf16)    # LN2 (fp32) -> bf16
    ff = 4 * d_model
    if mlp_block is None or mlp_block >= ff:
        m = jnp.dot(h2, wfc_t_ref[...],
                    preferred_element_type=jnp.float32) + bfc_ref[...]     # (M, 4D)
        m = m * jax.nn.sigmoid(1.702 * m)                            # QuickGELU (fp32)
        mlp = jnp.dot(m.astype(bf16), wproj_t_ref[...],
                      preferred_element_type=jnp.float32)
    else:
        # Tile the hidden (4D) axis so the (M, 4D) f32 hidden never materializes
        # whole (v7x VMEM). QuickGELU applied per tile.
        mlp = jnp.zeros((M, d_model), jnp.float32)
        for lo in range(0, ff, mlp_block):
            hi = lo + mlp_block
            mt = jnp.dot(h2, wfc_t_ref[:, lo:hi],
                         preferred_element_type=jnp.float32) + bfc_ref[:, lo:hi]
            mt = mt * jax.nn.sigmoid(1.702 * mt)
            mlp = mlp + jnp.dot(mt.astype(bf16), wproj_t_ref[lo:hi, :],
                                preferred_element_type=jnp.float32)
    x = x + mlp + bproj_ref[...]                                     # residual (fp32)

    o_ref[...] = x.reshape(nb, seq_len, d_model).astype(o_ref.dtype)


# ---------------------------------------------------------------------------
# Parameter preparation (done once, outside the per-call path)
# ---------------------------------------------------------------------------
def prepare_params(params, *, n_head):
    """Pre-transpose weights, cast to bf16, fold q-scale into in_proj."""
    D = params["ln1_weight"].shape[0]
    hd = D // n_head
    scale = 1.0 / (hd ** 0.5)

    win = params["in_proj_weight"]                        # (3D, D) torch layout
    binb = params["in_proj_bias"]                         # (3D,)
    win = win.at[:D, :].multiply(scale)                   # fold q-scale
    binb = binb.at[:D].multiply(scale)

    row = lambda p: p.reshape(1, -1).astype(jnp.float32)
    bf = jnp.bfloat16
    return {
        "ln1_g": row(params["ln1_weight"]), "ln1_b": row(params["ln1_bias"]),
        "win_t": win.T.astype(bf),                                   # (D, 3D) bf16
        "bin": row(binb),
        # out_proj weight pre-split per head: kernel indexes the leading dim.
        "wout_h": params["out_proj_weight"].T.astype(bf).reshape(n_head, hd, D),
        "bout": row(params["out_proj_bias"]),
        "ln2_g": row(params["ln2_weight"]), "ln2_b": row(params["ln2_bias"]),
        "wfc_t": params["c_fc_weight"].T.astype(bf),                 # (D, 4D) bf16
        "bfc": row(params["c_fc_bias"]),
        "wproj_t": params["c_proj_weight"].T.astype(bf),             # (4D, D) bf16
        "bproj": row(params["c_proj_bias"]),
    }


# ---------------------------------------------------------------------------
# Wrapper helpers
# ---------------------------------------------------------------------------
def _pick_nb(N, L, target_m=256):
    """Largest divisor of N with nb*L <= ~target_m that keeps grid length >= 2
    (v7x megacore), falling back to nb=1."""
    want = max(1, -(-target_m // L))          # cdiv(target_m, L)
    best = 1
    for d in range(1, N + 1):
        if N % d:
            continue
        if d <= want and (N // d >= 2 or N == 1):
            best = d
    return best


def _vmem_limit_bytes():
    try:
        cap = pltpu.get_tpu_info().vmem_capacity_bytes
    except Exception:
        cap = 128 * 1024 * 1024
    # Leave headroom for activation double buffers / compiler scratch.
    return int(min(cap - 8 * 1024 * 1024, 100 * 1024 * 1024))


def _cost_estimate(N, Lp, D, H):
    T = N * Lp
    flops = 24 * T * D * D + 4 * T * Lp * D           # projections + attention
    transcendentals = N * H * Lp * Lp + 4 * T * D     # softmax exp + QuickGELU sigmoid
    bytes_accessed = 2 * T * D * 4 + 24 * D * D + Lp * Lp * 4
    return pl.CostEstimate(flops=int(flops), transcendentals=int(transcendentals),
                           bytes_accessed=int(bytes_accessed))


def _pad_seq(x, mask, Lp):
    """Pad sequence to Lp; padded keys masked with a large finite negative."""
    N, L, D = x.shape
    if Lp == L:
        return x, (mask.astype(jnp.float32) if mask is not None else None)
    xp = jnp.zeros((N, Lp, D), x.dtype).at[:, :L, :].set(x)
    mp = jnp.zeros((Lp, Lp), jnp.float32)
    if mask is not None:
        mp = mp.at[:L, :L].set(mask.astype(jnp.float32))
    mp = mp.at[:, L:].set(-30000.0)     # finite: avoids all -inf rows -> NaN
    return xp, mp


# ---------------------------------------------------------------------------
# Wrapper (batch-major, no activation transposes)
# ---------------------------------------------------------------------------
def residual_attention_block(x_nld, prep, attn_mask, *, n_head, nb=None,
                             seq_pad_multiple=8, mlp_block=None):
    """x_nld: (N, L, D) batch-major. Returns same shape/dtype.
    For real CLIP lengths (L=77) pass seq_pad_multiple=128 for lane-dense scores."""
    N, L, D = x_nld.shape
    seq_pad_multiple = max(int(seq_pad_multiple), 8)
    Lp = -(-L // seq_pad_multiple) * seq_pad_multiple

    x_p, mask_p = _pad_seq(x_nld, attn_mask, Lp)
    has_mask = mask_p is not None

    if nb is None:
        nb = _pick_nb(N, Lp)
    assert N % nb == 0, "batch must be divisible by nb"

    ff = 4 * D
    if mlp_block is None and ff > 2048 and ff % 1024 == 0:
        mlp_block = 1024          # keep (M, 4D) f32 hidden small (v7x VMEM)
    if mlp_block is not None:
        assert ff % mlp_block == 0, "4*d_model must be divisible by mlp_block"
    # TODO(synk): for d_model >= 1024 on v7x, also stream wfc_t/wproj_t from HBM
    # (memory_space=pl.ANY + manual DMA) instead of keeping them VMEM-resident.

    weight_args = (prep["ln1_g"], prep["ln1_b"], prep["win_t"], prep["bin"],
                   prep["wout_h"], prep["bout"], prep["ln2_g"], prep["ln2_b"],
                   prep["wfc_t"], prep["bfc"], prep["wproj_t"], prep["bproj"])
    args = ((x_p, mask_p) if has_mask else (x_p,)) + weight_args

    def make_call(single_buffer_weights):
        def invariant(a):
            nd = a.ndim
            if single_buffer_weights:
                return pl.BlockSpec(a.shape, lambda g: (0,) * nd,
                                    pipeline_mode=pl.Buffered(1))
            return pl.BlockSpec(a.shape, lambda g: (0,) * nd)

        in_specs = [pl.BlockSpec((nb, Lp, D), lambda g: (g, 0, 0))] \
                 + [invariant(a) for a in args[1:]]

        return pl.pallas_call(
            functools.partial(_rab_kernel, d_model=D, n_head=n_head, nb=nb,
                              seq_len=Lp, has_mask=has_mask, mlp_block=mlp_block),
            out_shape=jax.ShapeDtypeStruct((N, Lp, D), x_nld.dtype),
            grid=(N // nb,),
            in_specs=in_specs,
            out_specs=pl.BlockSpec((nb, Lp, D), lambda g: (g, 0, 0)),
            compiler_params=pltpu.CompilerParams(
                dimension_semantics=("parallel",),
                vmem_limit_bytes=_vmem_limit_bytes()),
            cost_estimate=_cost_estimate(N, Lp, D, n_head),
        )

    try:
        out = make_call(True)(*args)      # grid-invariant operands single-buffered
    except Exception:
        out = make_call(False)(*args)     # conservative fallback: default buffering

    if Lp != L:
        out = out[:, :L, :]
    return out


def residual_attention_block_lnd(x_lnd, prep, attn_mask, *, n_head, **kw):
    """Convenience for the PyTorch nn.MultiheadAttention (L, N, D) layout."""
    out = residual_attention_block(jnp.transpose(x_lnd, (1, 0, 2)), prep,
                                   attn_mask, n_head=n_head, **kw)
    return jnp.transpose(out, (1, 0, 2))


# ---------------------------------------------------------------------------
# Deterministic parameter init (synthetic; shapes match nn.Module __init__)
# ---------------------------------------------------------------------------
def init_params(key, d_model):
    ks = jax.random.split(key, 8)
    s = 0.02
    f32 = jnp.float32
    return {
        "ln1_weight": jnp.ones((d_model,), f32),
        "ln1_bias": jnp.zeros((d_model,), f32),
        "in_proj_weight": s * jax.random.normal(ks[0], (3 * d_model, d_model), f32),
        "in_proj_bias": s * jax.random.normal(ks[1], (3 * d_model,), f32),
        "out_proj_weight": s * jax.random.normal(ks[2], (d_model, d_model), f32),
        "out_proj_bias": s * jax.random.normal(ks[3], (d_model,), f32),
        "ln2_weight": jnp.ones((d_model,), f32),
        "ln2_bias": jnp.zeros((d_model,), f32),
        "c_fc_weight": s * jax.random.normal(ks[4], (4 * d_model, d_model), f32),
        "c_fc_bias": s * jax.random.normal(ks[5], (4 * d_model,), f32),
        "c_proj_weight": s * jax.random.normal(ks[6], (d_model, 4 * d_model), f32),
        "c_proj_bias": s * jax.random.normal(ks[7], (d_model,), f32),
    }


# ---------------------------------------------------------------------------
# Pure-JAX reference (mirrors torch semantics, fp32) for verification
# ---------------------------------------------------------------------------
def reference(x_nld, params, mask, *, n_head):
    N, L, D = x_nld.shape
    hd = D // n_head
    x = x_nld.astype(jnp.float32)

    def ln(v, g, b, eps=1e-5):
        mu = jnp.mean(v, -1, keepdims=True)
        var = jnp.mean((v - mu) ** 2, -1, keepdims=True)
        return (v - mu) * jax.lax.rsqrt(var + eps) * g + b

    h = ln(x, params["ln1_weight"], params["ln1_bias"])
    qkv = h @ params["in_proj_weight"].T + params["in_proj_bias"]
    q, k, v = jnp.split(qkv, 3, axis=-1)
    sh = lambda t: t.reshape(N, L, n_head, hd).transpose(0, 2, 1, 3)
    qh, kh, vh = sh(q), sh(k), sh(v)
    s = jnp.einsum("nhld,nhmd->nhlm", qh * (hd ** -0.5), kh)
    if mask is not None:
        s = s + mask
    p = jax.nn.softmax(s, axis=-1)
    o = jnp.einsum("nhlm,nhmd->nhld", p, vh)
    o = o.transpose(0, 2, 1, 3).reshape(N, L, D)
    o = o @ params["out_proj_weight"].T + params["out_proj_bias"]
    x = x + o
    h2 = ln(x, params["ln2_weight"], params["ln2_bias"])
    m = h2 @ params["c_fc_weight"].T + params["c_fc_bias"]
    m = m * jax.nn.sigmoid(1.702 * m)
    m = m @ params["c_proj_weight"].T + params["c_proj_bias"]
    return (x + m).astype(x_nld.dtype)


# ---------------------------------------------------------------------------
if __name__ == "__main__":
    N, L, D, H = 4, 16, 64, 4           # batch=4, seq=16, d_model=64, heads=4

    key = jax.random.PRNGKey(0)
    kx, kp, kx2 = jax.random.split(key, 3)
    params = init_params(kp, D)
    prep = prepare_params(params, n_head=H)
    x = jax.random.normal(kx, (N, L, D), jnp.float32)      # batch-major (N, L, D)

    # 1) causal additive -inf mask, as used by the CLIP text encoder.
    attn_mask = jnp.triu(jnp.full((L, L), -jnp.inf, jnp.float32), k=1)
    out = jax.block_until_ready(
        residual_attention_block(x, prep, attn_mask, n_head=H))
    ref = reference(x, params, attn_mask, n_head=H)
    assert out.shape == (N, L, D) and out.dtype == x.dtype
    assert bool(jnp.allclose(out, ref, atol=3e-3, rtol=3e-3)), "mismatch (masked)"

    # 2) no mask + ragged seq length (exercises wrapper padding) + tiled MLP hidden.
    L2 = 12
    x2 = jax.random.normal(kx2, (N, L2, D), jnp.float32)
    out2 = jax.block_until_ready(
        residual_attention_block(x2, prep, None, n_head=H, mlp_block=128))
    ref2 = reference(x2, params, None, n_head=H)
    assert out2.shape == (N, L2, D)
    assert bool(jnp.allclose(out2, ref2, atol=3e-3, rtol=3e-3)), "mismatch (padded)"

    print("KERNEL_OK")
</pallas_src>

<mosaic_0001>
module attributes {stable_mosaic.version = 11 : i64} {
  func.func @_rab_kernel(%arg0: i32, %arg1: memref<2x16x64xf32, #tpu.memory_space<vmem>>, %arg2: memref<16x16xf32, #tpu.memory_space<vmem>>, %arg3: memref<1x64xf32, #tpu.memory_space<vmem>>, %arg4: memref<1x64xf32, #tpu.memory_space<vmem>>, %arg5: memref<64x192xbf16, #tpu.memory_space<vmem>>, %arg6: memref<1x192xf32, #tpu.memory_space<vmem>>, %arg7: memref<4x16x64xbf16, #tpu.memory_space<vmem>>, %arg8: memref<1x64xf32, #tpu.memory_space<vmem>>, %arg9: memref<1x64xf32, #tpu.memory_space<vmem>>, %arg10: memref<1x64xf32, #tpu.memory_space<vmem>>, %arg11: memref<64x256xbf16, #tpu.memory_space<vmem>>, %arg12: memref<1x256xf32, #tpu.memory_space<vmem>>, %arg13: memref<256x64xbf16, #tpu.memory_space<vmem>>, %arg14: memref<1x64xf32, #tpu.memory_space<vmem>>, %arg15: memref<2x16x64xf32, #tpu.memory_space<vmem>>) attributes {dimension_semantics = [#tpu.dimension_semantics<parallel>], iteration_bounds = array<i64: 2>, scalar_prefetch = 0 : i64, scratch_operands = 0 : i64, tpu.core_type = #tpu.core_type<tc>, window_params = [{transform_indices = @transform_0, window_bounds = array<i64: 2, 16, 64>}, {pipeline_mode = #tpu.pipeline_mode<synchronous>, transform_indices = @transform_1, window_bounds = array<i64: 16, 16>}, {pipeline_mode = #tpu.pipeline_mode<synchronous>, transform_indices = @transform_2, window_bounds = array<i64: 1, 64>}, {pipeline_mode = #tpu.pipeline_mode<synchronous>, transform_indices = @transform_3, window_bounds = array<i64: 1, 64>}, {pipeline_mode = #tpu.pipeline_mode<synchronous>, transform_indices = @transform_4, window_bounds = array<i64: 64, 192>}, {pipeline_mode = #tpu.pipeline_mode<synchronous>, transform_indices = @transform_5, window_bounds = array<i64: 1, 192>}, {pipeline_mode = #tpu.pipeline_mode<synchronous>, transform_indices = @transform_6, window_bounds = array<i64: 4, 16, 64>}, {pipeline_mode = #tpu.pipeline_mode<synchronous>, transform_indices = @transform_7, window_bounds = array<i64: 1, 64>}, {pipeline_mode = #tpu.pipeline_mode<synchronous>, transform_indices = @transform_8, window_bounds = array<i64: 1, 64>}, {pipeline_mode = #tpu.pipeline_mode<synchronous>, transform_indices = @transform_9, window_bounds = array<i64: 1, 64>}, {pipeline_mode = #tpu.pipeline_mode<synchronous>, transform_indices = @transform_10, window_bounds = array<i64: 64, 256>}, {pipeline_mode = #tpu.pipeline_mode<synchronous>, transform_indices = @transform_11, window_bounds = array<i64: 1, 256>}, {pipeline_mode = #tpu.pipeline_mode<synchronous>, transform_indices = @transform_12, window_bounds = array<i64: 256, 64>}, {pipeline_mode = #tpu.pipeline_mode<synchronous>, transform_indices = @transform_13, window_bounds = array<i64: 1, 64>}, {transform_indices = @transform_14, window_bounds = array<i64: 2, 16, 64>}]} {
    %c0 = arith.constant 0 : index
    %c0_0 = arith.constant 0 : index
    %c0_1 = arith.constant 0 : index
    %0 = vector.load %arg1[%c0, %c0_0, %c0_1] : memref<2x16x64xf32, #tpu.memory_space<vmem>>, vector<2x16x64xf32>
    %1 = vector.shape_cast %0 : vector<2x16x64xf32> to vector<32x64xf32>
    %c0_2 = arith.constant 0 : index
    %c0_3 = arith.constant 0 : index
    %2 = vector.load %arg3[%c0_2, %c0_3] : memref<1x64xf32, #tpu.memory_space<vmem>>, vector<1x64xf32>
    %c0_4 = arith.constant 0 : index
    %c0_5 = arith.constant 0 : index
    %3 = vector.load %arg4[%c0_4, %c0_5] : memref<1x64xf32, #tpu.memory_space<vmem>>, vector<1x64xf32>
    %cst = arith.constant dense<0.000000e+00> : vector<32xf32>
    %4 = vector.multi_reduction <add>, %1, %cst [1] : vector<32x64xf32> to vector<32xf32>
    %5 = vector.shape_cast %4 : vector<32xf32> to vector<32x1xf32>
    %cst_6 = arith.constant 6.400000e+01 : f32
    %6 = vector.broadcast %cst_6 : f32 to vector<32x1xf32>
    %7 = arith.divf %5, %6 : vector<32x1xf32>
    %8 = vector.broadcast %7 : vector<32x1xf32> to vector<32x64xf32>
    %9 = arith.subf %1, %8 : vector<32x64xf32>
    %10 = arith.mulf %9, %9 : vector<32x64xf32>
    %cst_7 = arith.constant dense<0.000000e+00> : vector<32xf32>
    %11 = vector.multi_reduction <add>, %10, %cst_7 [1] : vector<32x64xf32> to vector<32xf32>
    %12 = vector.shape_cast %11 : vector<32xf32> to vector<32x1xf32>
    %cst_8 = arith.constant 6.400000e+01 : f32
    %13 = vector.broadcast %cst_8 : f32 to vector<32x1xf32>
    %14 = arith.divf %12, %13 : vector<32x1xf32>
    %15 = vector.broadcast %7 : vector<32x1xf32> to vector<32x64xf32>
    %16 = arith.subf %1, %15 : vector<32x64xf32>
    %cst_9 = arith.constant 9.99999974E-6 : f32
    %17 = vector.broadcast %cst_9 : f32 to vector<32x1xf32>
    %18 = arith.addf %14, %17 : vector<32x1xf32>
    %19 = math.rsqrt %18 : vector<32x1xf32>
    %20 = vector.broadcast %19 : vector<32x1xf32> to vector<32x64xf32>
    %21 = arith.mulf %16, %20 : vector<32x64xf32>
    %22 = vector.broadcast %2 : vector<1x64xf32> to vector<32x64xf32>
    %23 = arith.mulf %21, %22 : vector<32x64xf32>
    %24 = vector.broadcast %3 : vector<1x64xf32> to vector<32x64xf32>
    %25 = arith.addf %23, %24 : vector<32x64xf32>
    %26 = arith.truncf %25 : vector<32x64xf32> to vector<32x64xbf16>
    %c0_10 = arith.constant 0 : index
    %c0_11 = arith.constant 0 : index
    %27 = vector.load %arg5[%c0_10, %c0_11] : memref<64x192xbf16, #tpu.memory_space<vmem>>, vector<64x192xbf16>
    %cst_12 = arith.constant dense<0.000000e+00> : vector<32x192xf32>
    %28 = tpu.matmul %26, %27, %cst_12 {dimension_numbers = #tpu.dot_dimension_numbers<[1], [0], [0], [1], [0, 0, 1, 1], [], []>} : vector<32x64xbf16>, vector<64x192xbf16>, vector<32x192xf32> -> vector<32x192xf32>
    %c0_13 = arith.constant 0 : index
    %c0_14 = arith.constant 0 : index
    %29 = vector.load %arg6[%c0_13, %c0_14] : memref<1x192xf32, #tpu.memory_space<vmem>>, vector<1x192xf32>
    %30 = vector.broadcast %29 : vector<1x192xf32> to vector<32x192xf32>
    %31 = arith.addf %28, %30 : vector<32x192xf32>
    %32 = vector.extract_strided_slice %31 {offsets = [0, 0], sizes = [32, 16], strides = [1, 1]} : vector<32x192xf32> to vector<32x16xf32>
    %33 = vector.shape_cast %32 : vector<32x16xf32> to vector<2x16x16xf32>
    %34 = arith.truncf %33 : vector<2x16x16xf32> to vector<2x16x16xbf16>
    %35 = vector.extract_strided_slice %31 {offsets = [0, 16], sizes = [32, 16], strides = [1, 1]} : vector<32x192xf32> to vector<32x16xf32>
    %36 = vector.shape_cast %35 : vector<32x16xf32> to vector<2x16x16xf32>
    %37 = arith.truncf %36 : vector<2x16x16xf32> to vector<2x16x16xbf16>
    %38 = vector.extract_strided_slice %31 {offsets = [0, 32], sizes = [32, 16], strides = [1, 1]} : vector<32x192xf32> to vector<32x16xf32>
    %39 = vector.shape_cast %38 : vector<32x16xf32> to vector<2x16x16xf32>
    %40 = arith.truncf %39 : vector<2x16x16xf32> to vector<2x16x16xbf16>
    %41 = vector.extract_strided_slice %31 {offsets = [0, 48], sizes = [32, 16], strides = [1, 1]} : vector<32x192xf32> to vector<32x16xf32>
    %42 = vector.shape_cast %41 : vector<32x16xf32> to vector<2x16x16xf32>
    %43 = arith.truncf %42 : vector<2x16x16xf32> to vector<2x16x16xbf16>
    %44 = tpu.concatenate %34, %37, %40, %43 in 0 : vector<2x16x16xbf16>, vector<2x16x16xbf16>, vector<2x16x16xbf16>, vector<2x16x16xbf16> -> vector<8x16x16xbf16>
    %45 = vector.extract_strided_slice %31 {offsets = [0, 64], sizes = [32, 16], strides = [1, 1]} : vector<32x192xf32> to vector<32x16xf32>
    %46 = vector.shape_cast %45 : vector<32x16xf32> to vector<2x16x16xf32>
    %47 = arith.truncf %46 : vector<2x16x16xf32> to vector<2x16x16xbf16>
    %48 = vector.extract_strided_slice %31 {offsets = [0, 80], sizes = [32, 16], strides = [1, 1]} : vector<32x192xf32> to vector<32x16xf32>
    %49 = vector.shape_cast %48 : vector<32x16xf32> to vector<2x16x16xf32>
    %50 = arith.truncf %49 : vector<2x16x16xf32> to vector<2x16x16xbf16>
    %51 = vector.extract_strided_slice %31 {offsets = [0, 96], sizes = [32, 16], strides = [1, 1]} : vector<32x192xf32> to vector<32x16xf32>
    %52 = vector.shape_cast %51 : vector<32x16xf32> to vector<2x16x16xf32>
    %53 = arith.truncf %52 : vector<2x16x16xf32> to vector<2x16x16xbf16>
    %54 = vector.extract_strided_slice %31 {offsets = [0, 112], sizes = [32, 16], strides = [1, 1]} : vector<32x192xf32> to vector<32x16xf32>
    %55 = vector.shape_cast %54 : vector<32x16xf32> to vector<2x16x16xf32>
    %56 = arith.truncf %55 : vector<2x16x16xf32> to vector<2x16x16xbf16>
    %57 = tpu.concatenate %47, %50, %53, %56 in 0 : vector<2x16x16xbf16>, vector<2x16x16xbf16>, vector<2x16x16xbf16>, vector<2x16x16xbf16> -> vector<8x16x16xbf16>
    %58 = vector.extract_strided_slice %31 {offsets = [0, 128], sizes = [32, 16], strides = [1, 1]} : vector<32x192xf32> to vector<32x16xf32>
    %59 = vector.shape_cast %58 : vector<32x16xf32> to vector<2x16x16xf32>
    %60 = arith.truncf %59 : vector<2x16x16xf32> to vector<2x16x16xbf16>
    %61 = vector.extract_strided_slice %31 {offsets = [0, 144], sizes = [32, 16], strides = [1, 1]} : vector<32x192xf32> to vector<32x16xf32>
    %62 = vector.shape_cast %61 : vector<32x16xf32> to vector<2x16x16xf32>
    %63 = arith.truncf %62 : vector<2x16x16xf32> to vector<2x16x16xbf16>
    %64 = vector.extract_strided_slice %31 {offsets = [0, 160], sizes = [32, 16], strides = [1, 1]} : vector<32x192xf32> to vector<32x16xf32>
    %65 = vector.shape_cast %64 : vector<32x16xf32> to vector<2x16x16xf32>
    %66 = arith.truncf %65 : vector<2x16x16xf32> to vector<2x16x16xbf16>
    %67 = vector.extract_strided_slice %31 {offsets = [0, 176], sizes = [32, 16], strides = [1, 1]} : vector<32x192xf32> to vector<32x16xf32>
    %68 = vector.shape_cast %67 : vector<32x16xf32> to vector<2x16x16xf32>
    %69 = arith.truncf %68 : vector<2x16x16xf32> to vector<2x16x16xbf16>
    %70 = tpu.concatenate %60, %63, %66, %69 in 0 : vector<2x16x16xbf16>, vector<2x16x16xbf16>, vector<2x16x16xbf16>, vector<2x16x16xbf16> -> vector<8x16x16xbf16>
    "tpu.trace_start"() <{level = 10 : i32, message = "bqd,bkd->bqk"}> : () -> ()
    %cst_15 = arith.constant dense<0.000000e+00> : vector<8x16x16xf32>
    %71 = tpu.matmul %44, %57, %cst_15 {dimension_numbers = #tpu.dot_dimension_numbers<[2], [2], [1], [1], [0, 0, 0, 1, 1, 1], [0], [0]>} : vector<8x16x16xbf16>, vector<8x16x16xbf16>, vector<8x16x16xf32> -> vector<8x16x16xf32>
    "tpu.trace_stop"() : () -> ()
    %c0_16 = arith.constant 0 : index
    %c0_17 = arith.constant 0 : index
    %72 = vector.load %arg2[%c0_16, %c0_17] : memref<16x16xf32, #tpu.memory_space<vmem>>, vector<16x16xf32>
    %73 = vector.shape_cast %72 : vector<16x16xf32> to vector<1x16x16xf32>
    %74 = vector.broadcast %73 : vector<1x16x16xf32> to vector<8x16x16xf32>
    %75 = arith.addf %71, %74 : vector<8x16x16xf32>
    %cst_18 = arith.constant dense<0xFF800000> : vector<8x16xf32>
    %76 = vector.multi_reduction <maximumf>, %75, %cst_18 [2] : vector<8x16x16xf32> to vector<8x16xf32>
    %77 = vector.shape_cast %76 : vector<8x16xf32> to vector<8x16x1xf32>
    %78 = vector.broadcast %77 : vector<8x16x1xf32> to vector<8x16x16xf32>
    %79 = arith.subf %75, %78 : vector<8x16x16xf32>
    %80 = math.exp %79 : vector<8x16x16xf32>
    %cst_19 = arith.constant dense<0.000000e+00> : vector<8x16xf32>
    %81 = vector.multi_reduction <add>, %80, %cst_19 [2] : vector<8x16x16xf32> to vector<8x16xf32>
    %82 = vector.shape_cast %81 : vector<8x16xf32> to vector<8x16x1xf32>
    %83 = tpu.reciprocal %82 {approx = true} : vector<8x16x1xf32> -> vector<8x16x1xf32>
    %84 = vector.broadcast %83 : vector<8x16x1xf32> to vector<8x16x16xf32>
    %85 = arith.mulf %80, %84 : vector<8x16x16xf32>
    %86 = arith.truncf %85 : vector<8x16x16xf32> to vector<8x16x16xbf16>
    "tpu.trace_start"() <{level = 10 : i32, message = "bqk,bkd->bqd"}> : () -> ()
    %cst_20 = arith.constant dense<0.000000e+00> : vector<8x16x16xf32>
    %87 = tpu.matmul %86, %70, %cst_20 {dimension_numbers = #tpu.dot_dimension_numbers<[2], [1], [1], [2], [0, 0, 0, 1, 1, 2], [0], [0]>} : vector<8x16x16xbf16>, vector<8x16x16xbf16>, vector<8x16x16xf32> -> vector<8x16x16xf32>
    "tpu.trace_stop"() : () -> ()
    %88 = vector.shape_cast %87 : vector<8x16x16xf32> to vector<4x32x16xf32>
    %cst_21 = arith.constant 0.000000e+00 : f32
    %89 = vector.broadcast %cst_21 : f32 to vector<32x64xf32>
    %90 = vector.extract_strided_slice %88 {offsets = [0, 0, 0], sizes = [1, 32, 16], strides = [1, 1, 1]} : vector<4x32x16xf32> to vector<1x32x16xf32>
    %91 = vector.shape_cast %90 : vector<1x32x16xf32> to vector<32x16xf32>
    %92 = arith.truncf %91 : vector<32x16xf32> to vector<32x16xbf16>
    %c0_22 = arith.constant 0 : index
    %c0_23 = arith.constant 0 : index
    %c0_24 = arith.constant 0 : index
    %93 = vector.load %arg7[%c0_22, %c0_23, %c0_24] : memref<4x16x64xbf16, #tpu.memory_space<vmem>>, vector<1x16x64xbf16>
    %94 = vector.shape_cast %93 : vector<1x16x64xbf16> to vector<16x64xbf16>
    %cst_25 = arith.constant dense<0.000000e+00> : vector<32x64xf32>
    %95 = tpu.matmul %92, %94, %cst_25 {dimension_numbers = #tpu.dot_dimension_numbers<[1], [0], [0], [1], [0, 0, 1, 1], [], []>} : vector<32x16xbf16>, vector<16x64xbf16>, vector<32x64xf32> -> vector<32x64xf32>
    %96 = arith.addf %89, %95 : vector<32x64xf32>
    %97 = vector.extract_strided_slice %88 {offsets = [1, 0, 0], sizes = [1, 32, 16], strides = [1, 1, 1]} : vector<4x32x16xf32> to vector<1x32x16xf32>
    %98 = vector.shape_cast %97 : vector<1x32x16xf32> to vector<32x16xf32>
    %99 = arith.truncf %98 : vector<32x16xf32> to vector<32x16xbf16>
    %c1 = arith.constant 1 : index
    %c0_26 = arith.constant 0 : index
    %c0_27 = arith.constant 0 : index
    %100 = vector.load %arg7[%c1, %c0_26, %c0_27] : memref<4x16x64xbf16, #tpu.memory_space<vmem>>, vector<1x16x64xbf16>
    %101 = vector.shape_cast %100 : vector<1x16x64xbf16> to vector<16x64xbf16>
    %cst_28 = arith.constant dense<0.000000e+00> : vector<32x64xf32>
    %102 = tpu.matmul %99, %101, %cst_28 {dimension_numbers = #tpu.dot_dimension_numbers<[1], [0], [0], [1], [0, 0, 1, 1], [], []>} : vector<32x16xbf16>, vector<16x64xbf16>, vector<32x64xf32> -> vector<32x64xf32>
    %103 = arith.addf %96, %102 : vector<32x64xf32>
    %104 = vector.extract_strided_slice %88 {offsets = [2, 0, 0], sizes = [1, 32, 16], strides = [1, 1, 1]} : vector<4x32x16xf32> to vector<1x32x16xf32>
    %105 = vector.shape_cast %104 : vector<1x32x16xf32> to vector<32x16xf32>
    %106 = arith.truncf %105 : vector<32x16xf32> to vector<32x16xbf16>
    %c2 = arith.constant 2 : index
    %c0_29 = arith.constant 0 : index
    %c0_30 = arith.constant 0 : index
    %107 = vector.load %arg7[%c2, %c0_29, %c0_30] : memref<4x16x64xbf16, #tpu.memory_space<vmem>>, vector<1x16x64xbf16>
    %108 = vector.shape_cast %107 : vector<1x16x64xbf16> to vector<16x64xbf16>
    %cst_31 = arith.constant dense<0.000000e+00> : vector<32x64xf32>
    %109 = tpu.matmul %106, %108, %cst_31 {dimension_numbers = #tpu.dot_dimension_numbers<[1], [0], [0], [1], [0, 0, 1, 1], [], []>} : vector<32x16xbf16>, vector<16x64xbf16>, vector<32x64xf32> -> vector<32x64xf32>
    %110 = arith.addf %103, %109 : vector<32x64xf32>
    %111 = vector.extract_strided_slice %88 {offsets = [3, 0, 0], sizes = [1, 32, 16], strides = [1, 1, 1]} : vector<4x32x16xf32> to vector<1x32x16xf32>
    %112 = vector.shape_cast %111 : vector<1x32x16xf32> to vector<32x16xf32>
    %113 = arith.truncf %112 : vector<32x16xf32> to vector<32x16xbf16>
    %c3 = arith.constant 3 : index
    %c0_32 = arith.constant 0 : index
    %c0_33 = arith.constant 0 : index
    %114 = vector.load %arg7[%c3, %c0_32, %c0_33] : memref<4x16x64xbf16, #tpu.memory_space<vmem>>, vector<1x16x64xbf16>
    %115 = vector.shape_cast %114 : vector<1x16x64xbf16> to vector<16x64xbf16>
    %cst_34 = arith.constant dense<0.000000e+00> : vector<32x64xf32>
    %116 = tpu.matmul %113, %115, %cst_34 {dimension_numbers = #tpu.dot_dimension_numbers<[1], [0], [0], [1], [0, 0, 1, 1], [], []>} : vector<32x16xbf16>, vector<16x64xbf16>, vector<32x64xf32> -> vector<32x64xf32>
    %117 = arith.addf %110, %116 : vector<32x64xf32>
    %118 = arith.addf %1, %117 : vector<32x64xf32>
    %c0_35 = arith.constant 0 : index
    %c0_36 = arith.constant 0 : index
    %119 = vector.load %arg8[%c0_35, %c0_36] : memref<1x64xf32, #tpu.memory_space<vmem>>, vector<1x64xf32>
    %120 = vector.broadcast %119 : vector<1x64xf32> to vector<32x64xf32>
    %121 = arith.addf %118, %120 : vector<32x64xf32>
    %c0_37 = arith.constant 0 : index
    %c0_38 = arith.constant 0 : index
    %122 = vector.load %arg9[%c0_37, %c0_38] : memref<1x64xf32, #tpu.memory_space<vmem>>, vector<1x64xf32>
    %c0_39 = arith.constant 0 : index
    %c0_40 = arith.constant 0 : index
    %123 = vector.load %arg10[%c0_39, %c0_40] : memref<1x64xf32, #tpu.memory_space<vmem>>, vector<1x64xf32>
    %cst_41 = arith.constant dense<0.000000e+00> : vector<32xf32>
    %124 = vector.multi_reduction <add>, %121, %cst_41 [1] : vector<32x64xf32> to vector<32xf32>
    %125 = vector.shape_cast %124 : vector<32xf32> to vector<32x1xf32>
    %cst_42 = arith.constant 6.400000e+01 : f32
    %126 = vector.broadcast %cst_42 : f32 to vector<32x1xf32>
    %127 = arith.divf %125, %126 : vector<32x1xf32>
    %128 = vector.broadcast %127 : vector<32x1xf32> to vector<32x64xf32>
    %129 = arith.subf %121, %128 : vector<32x64xf32>
    %130 = arith.mulf %129, %129 : vector<32x64xf32>
    %cst_43 = arith.constant dense<0.000000e+00> : vector<32xf32>
    %131 = vector.multi_reduction <add>, %130, %cst_43 [1] : vector<32x64xf32> to vector<32xf32>
    %132 = vector.shape_cast %131 : vector<32xf32> to vector<32x1xf32>
    %cst_44 = arith.constant 6.400000e+01 : f32
    %133 = vector.broadcast %cst_44 : f32 to vector<32x1xf32>
    %134 = arith.divf %132, %133 : vector<32x1xf32>
    %135 = vector.broadcast %127 : vector<32x1xf32> to vector<32x64xf32>
    %136 = arith.subf %121, %135 : vector<32x64xf32>
    %cst_45 = arith.constant 9.99999974E-6 : f32
    %137 = vector.broadcast %cst_45 : f32 to vector<32x1xf32>
    %138 = arith.addf %134, %137 : vector<32x1xf32>
    %139 = math.rsqrt %138 : vector<32x1xf32>
    %140 = vector.broadcast %139 : vector<32x1xf32> to vector<32x64xf32>
    %141 = arith.mulf %136, %140 : vector<32x64xf32>
    %142 = vector.broadcast %122 : vector<1x64xf32> to vector<32x64xf32>
    %143 = arith.mulf %141, %142 : vector<32x64xf32>
    %144 = vector.broadcast %123 : vector<1x64xf32> to vector<32x64xf32>
    %145 = arith.addf %143, %144 : vector<32x64xf32>
    %146 = arith.truncf %145 : vector<32x64xf32> to vector<32x64xbf16>
    %c0_46 = arith.constant 0 : index
    %c0_47 = arith.constant 0 : index
    %147 = vector.load %arg11[%c0_46, %c0_47] : memref<64x256xbf16, #tpu.memory_space<vmem>>, vector<64x256xbf16>
    %cst_48 = arith.constant dense<0.000000e+00> : vector<32x256xf32>
    %148 = tpu.matmul %146, %147, %cst_48 {dimension_numbers = #tpu.dot_dimension_numbers<[1], [0], [0], [1], [0, 0, 1, 1], [], []>} : vector<32x64xbf16>, vector<64x256xbf16>, vector<32x256xf32> -> vector<32x256xf32>
    %c0_49 = arith.constant 0 : index
    %c0_50 = arith.constant 0 : index
    %149 = vector.load %arg12[%c0_49, %c0_50] : memref<1x256xf32, #tpu.memory_space<vmem>>, vector<1x256xf32>
    %150 = vector.broadcast %149 : vector<1x256xf32> to vector<32x256xf32>
    %151 = arith.addf %148, %150 : vector<32x256xf32>
    %cst_51 = arith.constant 1.702000e+00 : f32
    %152 = vector.broadcast %cst_51 : f32 to vector<32x256xf32>
    %153 = arith.mulf %152, %151 : vector<32x256xf32>
    %154 = arith.negf %153 : vector<32x256xf32>
    %155 = math.exp %154 : vector<32x256xf32>
    %cst_52 = arith.constant 1.000000e+00 : f32
    %156 = vector.broadcast %cst_52 : f32 to vector<32x256xf32>
    %157 = arith.addf %156, %155 : vector<32x256xf32>
    %158 = arith.divf %156, %157 : vector<32x256xf32>
    %159 = arith.mulf %151, %158 : vector<32x256xf32>
    %160 = arith.truncf %159 : vector<32x256xf32> to vector<32x256xbf16>
    %c0_53 = arith.constant 0 : index
    %c0_54 = arith.constant 0 : index
    %161 = vector.load %arg13[%c0_53, %c0_54] : memref<256x64xbf16, #tpu.memory_space<vmem>>, vector<256x64xbf16>
    %cst_55 = arith.constant dense<0.000000e+00> : vector<32x64xf32>
    %162 = tpu.matmul %160, %161, %cst_55 {dimension_numbers = #tpu.dot_dimension_numbers<[1], [0], [0], [1], [0, 0, 1, 1], [], []>} : vector<32x256xbf16>, vector<256x64xbf16>, vector<32x64xf32> -> vector<32x64xf32>
    %163 = arith.addf %121, %162 : vector<32x64xf32>
    %c0_56 = arith.constant 0 : index
    %c0_57 = arith.constant 0 : index
    %164 = vector.load %arg14[%c0_56, %c0_57] : memref<1x64xf32, #tpu.memory_space<vmem>>, vector<1x64xf32>
    %165 = vector.broadcast %164 : vector<1x64xf32> to vector<32x64xf32>
    %166 = arith.addf %163, %165 : vector<32x64xf32>
    %167 = vector.shape_cast %166 : vector<32x64xf32> to vector<2x16x64xf32>
    %c0_58 = arith.constant 0 : index
    %c0_59 = arith.constant 0 : index
    %c0_60 = arith.constant 0 : index
    %168 = vector.load %arg15[%c0_58, %c0_59, %c0_60] : memref<2x16x64xf32, #tpu.memory_space<vmem>>, vector<2x16x64xf32>
    tpu.vector_store %arg15[%c0_58, %c0_59, %c0_60], %167 {strides = array<i32>} : memref<2x16x64xf32, #tpu.memory_space<vmem>>, vector<2x16x64xf32>,
    return
  }
  func.func @transform_0(%arg0: i32) -> (i32, i32, i32) {
    %c0_i32 = arith.constant 0 : i32
    %c0_i32_0 = arith.constant 0 : i32
    %c0_i32_1 = arith.constant 0 : i32
    return %arg0, %c0_i32, %c0_i32_0 : i32, i32, i32
  }
  func.func @transform_1(%arg0: i32) -> (i32, i32) {
    %c0_i32 = arith.constant 0 : i32
    %c0_i32_0 = arith.constant 0 : i32
    %c0_i32_1 = arith.constant 0 : i32
    return %c0_i32, %c0_i32_0 : i32, i32
  }
  func.func @transform_2(%arg0: i32) -> (i32, i32) {
    %c0_i32 = arith.constant 0 : i32
    %c0_i32_0 = arith.constant 0 : i32
    %c0_i32_1 = arith.constant 0 : i32
    return %c0_i32, %c0_i32_0 : i32, i32
  }
  func.func @transform_3(%arg0: i32) -> (i32, i32) {
    %c0_i32 = arith.constant 0 : i32
    %c0_i32_0 = arith.constant 0 : i32
    %c0_i32_1 = arith.constant 0 : i32
    return %c0_i32, %c0_i32_0 : i32, i32
  }
  func.func @transform_4(%arg0: i32) -> (i32, i32) {
    %c0_i32 = arith.constant 0 : i32
    %c0_i32_0 = arith.constant 0 : i32
    %c0_i32_1 = arith.constant 0 : i32
    return %c0_i32, %c0_i32_0 : i32, i32
  }
  func.func @transform_5(%arg0: i32) -> (i32, i32) {
    %c0_i32 = arith.constant 0 : i32
    %c0_i32_0 = arith.constant 0 : i32
    %c0_i32_1 = arith.constant 0 : i32
    return %c0_i32, %c0_i32_0 : i32, i32
  }
  func.func @transform_6(%arg0: i32) -> (i32, i32, i32) {
    %c0_i32 = arith.constant 0 : i32
    %c0_i32_0 = arith.constant 0 : i32
    %c0_i32_1 = arith.constant 0 : i32
    %c0_i32_2 = arith.constant 0 : i32
    return %c0_i32, %c0_i32_0, %c0_i32_1 : i32, i32, i32
  }
  func.func @transform_7(%arg0: i32) -> (i32, i32) {
    %c0_i32 = arith.constant 0 : i32
    %c0_i32_0 = arith.constant 0 : i32
    %c0_i32_1 = arith.constant 0 : i32
    return %c0_i32, %c0_i32_0 : i32, i32
  }
  func.func @transform_8(%arg0: i32) -> (i32, i32) {
    %c0_i32 = arith.constant 0 : i32
    %c0_i32_0 = arith.constant 0 : i32
    %c0_i32_1 = arith.constant 0 : i32
    return %c0_i32, %c0_i32_0 : i32, i32
  }
  func.func @transform_9(%arg0: i32) -> (i32, i32) {
    %c0_i32 = arith.constant 0 : i32
    %c0_i32_0 = arith.constant 0 : i32
    %c0_i32_1 = arith.constant 0 : i32
    return %c0_i32, %c0_i32_0 : i32, i32
  }
  func.func @transform_10(%arg0: i32) -> (i32, i32) {
    %c0_i32 = arith.constant 0 : i32
    %c0_i32_0 = arith.constant 0 : i32
    %c0_i32_1 = arith.constant 0 : i32
    return %c0_i32, %c0_i32_0 : i32, i32
  }
  func.func @transform_11(%arg0: i32) -> (i32, i32) {
    %c0_i32 = arith.constant 0 : i32
    %c0_i32_0 = arith.constant 0 : i32
    %c0_i32_1 = arith.constant 0 : i32
    return %c0_i32, %c0_i32_0 : i32, i32
  }
  func.func @transform_12(%arg0: i32) -> (i32, i32) {
    %c0_i32 = arith.constant 0 : i32
    %c0_i32_0 = arith.constant 0 : i32
    %c0_i32_1 = arith.constant 0 : i32
    return %c0_i32, %c0_i32_0 : i32, i32
  }
  func.func @transform_13(%arg0: i32) -> (i32, i32) {
    %c0_i32 = arith.constant 0 : i32
    %c0_i32_0 = arith.constant 0 : i32
    %c0_i32_1 = arith.constant 0 : i32
    return %c0_i32, %c0_i32_0 : i32, i32
  }
  func.func @transform_14(%arg0: i32) -> (i32, i32, i32) {
    %c0_i32 = arith.constant 0 : i32
    %c0_i32_0 = arith.constant 0 : i32
    %c0_i32_1 = arith.constant 0 : i32
    return %arg0, %c0_i32, %c0_i32_0 : i32, i32, i32
  }
}

module attributes {stable_mosaic.version = 11 : i64} {
  func.func @_rab_kernel(%arg0: i32, %arg1: memref<2x16x64xf32, #tpu.memory_space<vmem>>, %arg2: memref<16x16xf32, #tpu.memory_space<vmem>>, %arg3: memref<1x64xf32, #tpu.memory_space<vmem>>, %arg4: memref<1x64xf32, #tpu.memory_space<vmem>>, %arg5: memref<64x192xbf16, #tpu.memory_space<vmem>>, %arg6: memref<1x192xf32, #tpu.memory_space<vmem>>, %arg7: memref<4x16x64xbf16, #tpu.memory_space<vmem>>, %arg8: memref<1x64xf32, #tpu.memory_space<vmem>>, %arg9: memref<1x64xf32, #tpu.memory_space<vmem>>, %arg10: memref<1x64xf32, #tpu.memory_space<vmem>>, %arg11: memref<64x256xbf16, #tpu.memory_space<vmem>>, %arg12: memref<1x256xf32, #tpu.memory_space<vmem>>, %arg13: memref<256x64xbf16, #tpu.memory_space<vmem>>, %arg14: memref<1x64xf32, #tpu.memory_space<vmem>>, %arg15: memref<2x16x64xf32, #tpu.memory_space<vmem>>) attributes {dimension_semantics = [#tpu.dimension_semantics<parallel>], iteration_bounds = array<i64: 2>, scalar_prefetch = 0 : i64, scratch_operands = 0 : i64, tpu.core_type = #tpu.core_type<tc>, window_params = [{transform_indices = @transform_0, window_bounds = array<i64: 2, 16, 64>}, {pipeline_mode = #tpu.pipeline_mode<synchronous>, transform_indices = @transform_1, window_bounds = array<i64: 16, 16>}, {pipeline_mode = #tpu.pipeline_mode<synchronous>, transform_indices = @transform_2, window_bounds = array<i64: 1, 64>}, {pipeline_mode = #tpu.pipeline_mode<synchronous>, transform_indices = @transform_3, window_bounds = array<i64: 1, 64>}, {pipeline_mode = #tpu.pipeline_mode<synchronous>, transform_indices = @transform_4, window_bounds = array<i64: 64, 192>}, {pipeline_mode = #tpu.pipeline_mode<synchronous>, transform_indices = @transform_5, window_bounds = array<i64: 1, 192>}, {pipeline_mode = #tpu.pipeline_mode<synchronous>, transform_indices = @transform_6, window_bounds = array<i64: 4, 16, 64>}, {pipeline_mode = #tpu.pipeline_mode<synchronous>, transform_indices = @transform_7, window_bounds = array<i64: 1, 64>}, {pipeline_mode = #tpu.pipeline_mode<synchronous>, transform_indices = @transform_8, window_bounds = array<i64: 1, 64>}, {pipeline_mode = #tpu.pipeline_mode<synchronous>, transform_indices = @transform_9, window_bounds = array<i64: 1, 64>}, {pipeline_mode = #tpu.pipeline_mode<synchronous>, transform_indices = @transform_10, window_bounds = array<i64: 64, 256>}, {pipeline_mode = #tpu.pipeline_mode<synchronous>, transform_indices = @transform_11, window_bounds = array<i64: 1, 256>}, {pipeline_mode = #tpu.pipeline_mode<synchronous>, transform_indices = @transform_12, window_bounds = array<i64: 256, 64>}, {pipeline_mode = #tpu.pipeline_mode<synchronous>, transform_indices = @transform_13, window_bounds = array<i64: 1, 64>}, {transform_indices = @transform_14, window_bounds = array<i64: 2, 16, 64>}]} {
    %c0 = arith.constant 0 : index
    %c0_0 = arith.constant 0 : index
    %c0_1 = arith.constant 0 : index
    %0 = vector.load %arg1[%c0, %c0_0, %c0_1] : memref<2x16x64xf32, #tpu.memory_space<vmem>>, vector<2x16x64xf32>
    %1 = vector.shape_cast %0 : vector<2x16x64xf32> to vector<32x64xf32>
    %c0_2 = arith.constant 0 : index
    %c0_3 = arith.constant 0 : index
    %2 = vector.load %arg3[%c0_2, %c0_3] : memref<1x64xf32, #tpu.memory_space<vmem>>, vector<1x64xf32>
    %c0_4 = arith.constant 0 : index
    %c0_5 = arith.constant 0 : index
    %3 = vector.load %arg4[%c0_4, %c0_5] : memref<1x64xf32, #tpu.memory_space<vmem>>, vector<1x64xf32>
    %cst = arith.constant dense<0.000000e+00> : vector<32xf32>
    %4 = vector.multi_reduction <add>, %1, %cst [1] : vector<32x64xf32> to vector<32xf32>
    %5 = vector.shape_cast %4 : vector<32xf32> to vector<32x1xf32>
    %cst_6 = arith.constant 6.400000e+01 : f32
    %6 = vector.broadcast %cst_6 : f32 to vector<32x1xf32>
    %7 = arith.divf %5, %6 : vector<32x1xf32>
    %8 = vector.broadcast %7 : vector<32x1xf32> to vector<32x64xf32>
    %9 = arith.subf %1, %8 : vector<32x64xf32>
    %10 = arith.mulf %9, %9 : vector<32x64xf32>
    %cst_7 = arith.constant dense<0.000000e+00> : vector<32xf32>
    %11 = vector.multi_reduction <add>, %10, %cst_7 [1] : vector<32x64xf32> to vector<32xf32>
    %12 = vector.shape_cast %11 : vector<32xf32> to vector<32x1xf32>
    %cst_8 = arith.constant 6.400000e+01 : f32
    %13 = vector.broadcast %cst_8 : f32 to vector<32x1xf32>
    %14 = arith.divf %12, %13 : vector<32x1xf32>
    %15 = vector.broadcast %7 : vector<32x1xf32> to vector<32x64xf32>
    %16 = arith.subf %1, %15 : vector<32x64xf32>
    %cst_9 = arith.constant 9.99999974E-6 : f32
    %17 = vector.broadcast %cst_9 : f32 to vector<32x1xf32>
    %18 = arith.addf %14, %17 : vector<32x1xf32>
    %19 = math.rsqrt %18 : vector<32x1xf32>
    %20 = vector.broadcast %19 : vector<32x1xf32> to vector<32x64xf32>
    %21 = arith.mulf %16, %20 : vector<32x64xf32>
    %22 = vector.broadcast %2 : vector<1x64xf32> to vector<32x64xf32>
    %23 = arith.mulf %21, %22 : vector<32x64xf32>
    %24 = vector.broadcast %3 : vector<1x64xf32> to vector<32x64xf32>
    %25 = arith.addf %23, %24 : vector<32x64xf32>
    %26 = arith.truncf %25 : vector<32x64xf32> to vector<32x64xbf16>
    %c0_10 = arith.constant 0 : index
    %c0_11 = arith.constant 0 : index
    %27 = vector.load %arg5[%c0_10, %c0_11] : memref<64x192xbf16, #tpu.memory_space<vmem>>, vector<64x192xbf16>
    %cst_12 = arith.constant dense<0.000000e+00> : vector<32x192xf32>
    %28 = tpu.matmul %26, %27, %cst_12 {dimension_numbers = #tpu.dot_dimension_numbers<[1], [0], [0], [1], [0, 0, 1, 1], [], []>} : vector<32x64xbf16>, vector<64x192xbf16>, vector<32x192xf32> -> vector<32x192xf32>
    %c0_13 = arith.constant 0 : index
    %c0_14 = arith.constant 0 : index
    %29 = vector.load %arg6[%c0_13, %c0_14] : memref<1x192xf32, #tpu.memory_space<vmem>>, vector<1x192xf32>
    %30 = vector.broadcast %29 : vector<1x192xf32> to vector<32x192xf32>
    %31 = arith.addf %28, %30 : vector<32x192xf32>
    %32 = vector.extract_strided_slice %31 {offsets = [0, 0], sizes = [32, 16], strides = [1, 1]} : vector<32x192xf32> to vector<32x16xf32>
    %33 = vector.shape_cast %32 : vector<32x16xf32> to vector<2x16x16xf32>
    %34 = arith.truncf %33 : vector<2x16x16xf32> to vector<2x16x16xbf16>
    %35 = vector.extract_strided_slice %31 {offsets = [0, 16], sizes = [32, 16], strides = [1, 1]} : vector<32x192xf32> to vector<32x16xf32>
    %36 = vector.shape_cast %35 : vector<32x16xf32> to vector<2x16x16xf32>
    %37 = arith.truncf %36 : vector<2x16x16xf32> to vector<2x16x16xbf16>
    %38 = vector.extract_strided_slice %31 {offsets = [0, 32], sizes = [32, 16], strides = [1, 1]} : vector<32x192xf32> to vector<32x16xf32>
    %39 = vector.shape_cast %38 : vector<32x16xf32> to vector<2x16x16xf32>
    %40 = arith.truncf %39 : vector<2x16x16xf32> to vector<2x16x16xbf16>
    %41 = vector.extract_strided_slice %31 {offsets = [0, 48], sizes = [32, 16], strides = [1, 1]} : vector<32x192xf32> to vector<32x16xf32>
    %42 = vector.shape_cast %41 : vector<32x16xf32> to vector<2x16x16xf32>
    %43 = arith.truncf %42 : vector<2x16x16xf32> to vector<2x16x16xbf16>
    %44 = tpu.concatenate %34, %37, %40, %43 in 0 : vector<2x16x16xbf16>, vector<2x16x16xbf16>, vector<2x16x16xbf16>, vector<2x16x16xbf16> -> vector<8x16x16xbf16>
    %45 = vector.extract_strided_slice %31 {offsets = [0, 64], sizes = [32, 16], strides = [1, 1]} : vector<32x192xf32> to vector<32x16xf32>
    %46 = vector.shape_cast %45 : vector<32x16xf32> to vector<2x16x16xf32>
    %47 = arith.truncf %46 : vector<2x16x16xf32> to vector<2x16x16xbf16>
    %48 = vector.extract_strided_slice %31 {offsets = [0, 80], sizes = [32, 16], strides = [1, 1]} : vector<32x192xf32> to vector<32x16xf32>
    %49 = vector.shape_cast %48 : vector<32x16xf32> to vector<2x16x16xf32>
    %50 = arith.truncf %49 : vector<2x16x16xf32> to vector<2x16x16xbf16>
    %51 = vector.extract_strided_slice %31 {offsets = [0, 96], sizes = [32, 16], strides = [1, 1]} : vector<32x192xf32> to vector<32x16xf32>
    %52 = vector.shape_cast %51 : vector<32x16xf32> to vector<2x16x16xf32>
    %53 = arith.truncf %52 : vector<2x16x16xf32> to vector<2x16x16xbf16>
    %54 = vector.extract_strided_slice %31 {offsets = [0, 112], sizes = [32, 16], strides = [1, 1]} : vector<32x192xf32> to vector<32x16xf32>
    %55 = vector.shape_cast %54 : vector<32x16xf32> to vector<2x16x16xf32>
    %56 = arith.truncf %55 : vector<2x16x16xf32> to vector<2x16x16xbf16>
    %57 = tpu.concatenate %47, %50, %53, %56 in 0 : vector<2x16x16xbf16>, vector<2x16x16xbf16>, vector<2x16x16xbf16>, vector<2x16x16xbf16> -> vector<8x16x16xbf16>
    %58 = vector.extract_strided_slice %31 {offsets = [0, 128], sizes = [32, 16], strides = [1, 1]} : vector<32x192xf32> to vector<32x16xf32>
    %59 = vector.shape_cast %58 : vector<32x16xf32> to vector<2x16x16xf32>
    %60 = arith.truncf %59 : vector<2x16x16xf32> to vector<2x16x16xbf16>
    %61 = vector.extract_strided_slice %31 {offsets = [0, 144], sizes = [32, 16], strides = [1, 1]} : vector<32x192xf32> to vector<32x16xf32>
    %62 = vector.shape_cast %61 : vector<32x16xf32> to vector<2x16x16xf32>
    %63 = arith.truncf %62 : vector<2x16x16xf32> to vector<2x16x16xbf16>
    %64 = vector.extract_strided_slice %31 {offsets = [0, 160], sizes = [32, 16], strides = [1, 1]} : vector<32x192xf32> to vector<32x16xf32>
    %65 = vector.shape_cast %64 : vector<32x16xf32> to vector<2x16x16xf32>
    %66 = arith.truncf %65 : vector<2x16x16xf32> to vector<2x16x16xbf16>
    %67 = vector.extract_strided_slice %31 {offsets = [0, 176], sizes = [32, 16], strides = [1, 1]} : vector<32x192xf32> to vector<32x16xf32>
    %68 = vector.shape_cast %67 : vector<32x16xf32> to vector<2x16x16xf32>
    %69 = arith.truncf %68 : vector<2x16x16xf32> to vector<2x16x16xbf16>
    %70 = tpu.concatenate %60, %63, %66, %69 in 0 : vector<2x16x16xbf16>, vector<2x16x16xbf16>, vector<2x16x16xbf16>, vector<2x16x16xbf16> -> vector<8x16x16xbf16>
    "tpu.trace_start"() <{level = 10 : i32, message = "bqd,bkd->bqk"}> : () -> ()
    %cst_15 = arith.constant dense<0.000000e+00> : vector<8x16x16xf32>
    %71 = tpu.matmul %44, %57, %cst_15 {dimension_numbers = #tpu.dot_dimension_numbers<[2], [2], [1], [1], [0, 0, 0, 1, 1, 1], [0], [0]>} : vector<8x16x16xbf16>, vector<8x16x16xbf16>, vector<8x16x16xf32> -> vector<8x16x16xf32>
    "tpu.trace_stop"() : () -> ()
    %c0_16 = arith.constant 0 : index
    %c0_17 = arith.constant 0 : index
    %72 = vector.load %arg2[%c0_16, %c0_17] : memref<16x16xf32, #tpu.memory_space<vmem>>, vector<16x16xf32>
    %73 = vector.shape_cast %72 : vector<16x16xf32> to vector<1x16x16xf32>
    %74 = vector.broadcast %73 : vector<1x16x16xf32> to vector<8x16x16xf32>
    %75 = arith.addf %71, %74 : vector<8x16x16xf32>
    %cst_18 = arith.constant dense<0xFF800000> : vector<8x16xf32>
    %76 = vector.multi_reduction <maximumf>, %75, %cst_18 [2] : vector<8x16x16xf32> to vector<8x16xf32>
    %77 = vector.shape_cast %76 : vector<8x16xf32> to vector<8x16x1xf32>
    %78 = vector.broadcast %77 : vector<8x16x1xf32> to vector<8x16x16xf32>
    %79 = arith.subf %75, %78 : vector<8x16x16xf32>
    %80 = math.exp %79 : vector<8x16x16xf32>
    %cst_19 = arith.constant dense<0.000000e+00> : vector<8x16xf32>
    %81 = vector.multi_reduction <add>, %80, %cst_19 [2] : vector<8x16x16xf32> to vector<8x16xf32>
    %82 = vector.shape_cast %81 : vector<8x16xf32> to vector<8x16x1xf32>
    %83 = tpu.reciprocal %82 {approx = true} : vector<8x16x1xf32> -> vector<8x16x1xf32>
    %84 = vector.broadcast %83 : vector<8x16x1xf32> to vector<8x16x16xf32>
    %85 = arith.mulf %80, %84 : vector<8x16x16xf32>
    %86 = arith.truncf %85 : vector<8x16x16xf32> to vector<8x16x16xbf16>
    "tpu.trace_start"() <{level = 10 : i32, message = "bqk,bkd->bqd"}> : () -> ()
    %cst_20 = arith.constant dense<0.000000e+00> : vector<8x16x16xf32>
    %87 = tpu.matmul %86, %70, %cst_20 {dimension_numbers = #tpu.dot_dimension_numbers<[2], [1], [1], [2], [0, 0, 0, 1, 1, 2], [0], [0]>} : vector<8x16x16xbf16>, vector<8x16x16xbf16>, vector<8x16x16xf32> -> vector<8x16x16xf32>
    "tpu.trace_stop"() : () -> ()
    %88 = vector.shape_cast %87 : vector<8x16x16xf32> to vector<4x32x16xf32>
    %cst_21 = arith.constant 0.000000e+00 : f32
    %89 = vector.broadcast %cst_21 : f32 to vector<32x64xf32>
    %90 = vector.extract_strided_slice %88 {offsets = [0, 0, 0], sizes = [1, 32, 16], strides = [1, 1, 1]} : vector<4x32x16xf32> to vector<1x32x16xf32>
    %91 = vector.shape_cast %90 : vector<1x32x16xf32> to vector<32x16xf32>
    %92 = arith.truncf %91 : vector<32x16xf32> to vector<32x16xbf16>
    %c0_22 = arith.constant 0 : index
    %c0_23 = arith.constant 0 : index
    %c0_24 = arith.constant 0 : index
    %93 = vector.load %arg7[%c0_22, %c0_23, %c0_24] : memref<4x16x64xbf16, #tpu.memory_space<vmem>>, vector<1x16x64xbf16>
    %94 = vector.shape_cast %93 : vector<1x16x64xbf16> to vector<16x64xbf16>
    %cst_25 = arith.constant dense<0.000000e+00> : vector<32x64xf32>
    %95 = tpu.matmul %92, %94, %cst_25 {dimension_numbers = #tpu.dot_dimension_numbers<[1], [0], [0], [1], [0, 0, 1, 1], [], []>} : vector<32x16xbf16>, vector<16x64xbf16>, vector<32x64xf32> -> vector<32x64xf32>
    %96 = arith.addf %89, %95 : vector<32x64xf32>
    %97 = vector.extract_strided_slice %88 {offsets = [1, 0, 0], sizes = [1, 32, 16], strides = [1, 1, 1]} : vector<4x32x16xf32> to vector<1x32x16xf32>
    %98 = vector.shape_cast %97 : vector<1x32x16xf32> to vector<32x16xf32>
    %99 = arith.truncf %98 : vector<32x16xf32> to vector<32x16xbf16>
    %c1 = arith.constant 1 : index
    %c0_26 = arith.constant 0 : index
    %c0_27 = arith.constant 0 : index
    %100 = vector.load %arg7[%c1, %c0_26, %c0_27] : memref<4x16x64xbf16, #tpu.memory_space<vmem>>, vector<1x16x64xbf16>
    %101 = vector.shape_cast %100 : vector<1x16x64xbf16> to vector<16x64xbf16>
    %cst_28 = arith.constant dense<0.000000e+00> : vector<32x64xf32>
    %102 = tpu.matmul %99, %101, %cst_28 {dimension_numbers = #tpu.dot_dimension_numbers<[1], [0], [0], [1], [0, 0, 1, 1], [], []>} : vector<32x16xbf16>, vector<16x64xbf16>, vector<32x64xf32> -> vector<32x64xf32>
    %103 = arith.addf %96, %102 : vector<32x64xf32>
    %104 = vector.extract_strided_slice %88 {offsets = [2, 0, 0], sizes = [1, 32, 16], strides = [1, 1, 1]} : vector<4x32x16xf32> to vector<1x32x16xf32>
    %105 = vector.shape_cast %104 : vector<1x32x16xf32> to vector<32x16xf32>
    %106 = arith.truncf %105 : vector<32x16xf32> to vector<32x16xbf16>
    %c2 = arith.constant 2 : index
    %c0_29 = arith.constant 0 : index
    %c0_30 = arith.constant 0 : index
    %107 = vector.load %arg7[%c2, %c0_29, %c0_30] : memref<4x16x64xbf16, #tpu.memory_space<vmem>>, vector<1x16x64xbf16>
    %108 = vector.shape_cast %107 : vector<1x16x64xbf16> to vector<16x64xbf16>
    %cst_31 = arith.constant dense<0.000000e+00> : vector<32x64xf32>
    %109 = tpu.matmul %106, %108, %cst_31 {dimension_numbers = #tpu.dot_dimension_numbers<[1], [0], [0], [1], [0, 0, 1, 1], [], []>} : vector<32x16xbf16>, vector<16x64xbf16>, vector<32x64xf32> -> vector<32x64xf32>
    %110 = arith.addf %103, %109 : vector<32x64xf32>
    %111 = vector.extract_strided_slice %88 {offsets = [3, 0, 0], sizes = [1, 32, 16], strides = [1, 1, 1]} : vector<4x32x16xf32> to vector<1x32x16xf32>
    %112 = vector.shape_cast %111 : vector<1x32x16xf32> to vector<32x16xf32>
    %113 = arith.truncf %112 : vector<32x16xf32> to vector<32x16xbf16>
    %c3 = arith.constant 3 : index
    %c0_32 = arith.constant 0 : index
    %c0_33 = arith.constant 0 : index
    %114 = vector.load %arg7[%c3, %c0_32, %c0_33] : memref<4x16x64xbf16, #tpu.memory_space<vmem>>, vector<1x16x64xbf16>
    %115 = vector.shape_cast %114 : vector<1x16x64xbf16> to vector<16x64xbf16>
    %cst_34 = arith.constant dense<0.000000e+00> : vector<32x64xf32>
    %116 = tpu.matmul %113, %115, %cst_34 {dimension_numbers = #tpu.dot_dimension_numbers<[1], [0], [0], [1], [0, 0, 1, 1], [], []>} : vector<32x16xbf16>, vector<16x64xbf16>, vector<32x64xf32> -> vector<32x64xf32>
    %117 = arith.addf %110, %116 : vector<32x64xf32>
    %118 = arith.addf %1, %117 : vector<32x64xf32>
    %c0_35 = arith.constant 0 : index
    %c0_36 = arith.constant 0 : index
    %119 = vector.load %arg8[%c0_35, %c0_36] : memref<1x64xf32, #tpu.memory_space<vmem>>, vector<1x64xf32>
    %120 = vector.broadcast %119 : vector<1x64xf32> to vector<32x64xf32>
    %121 = arith.addf %118, %120 : vector<32x64xf32>
    %c0_37 = arith.constant 0 : index
    %c0_38 = arith.constant 0 : index
    %122 = vector.load %arg9[%c0_37, %c0_38] : memref<1x64xf32, #tpu.memory_space<vmem>>, vector<1x64xf32>
    %c0_39 = arith.constant 0 : index
    %c0_40 = arith.constant 0 : index
    %123 = vector.load %arg10[%c0_39, %c0_40] : memref<1x64xf32, #tpu.memory_space<vmem>>, vector<1x64xf32>
    %cst_41 = arith.constant dense<0.000000e+00> : vector<32xf32>
    %124 = vector.multi_reduction <add>, %121, %cst_41 [1] : vector<32x64xf32> to vector<32xf32>
    %125 = vector.shape_cast %124 : vector<32xf32> to vector<32x1xf32>
    %cst_42 = arith.constant 6.400000e+01 : f32
    %126 = vector.broadcast %cst_42 : f32 to vector<32x1xf32>
    %127 = arith.divf %125, %126 : vector<32x1xf32>
    %128 = vector.broadcast %127 : vector<32x1xf32> to vector<32x64xf32>
    %129 = arith.subf %121, %128 : vector<32x64xf32>
    %130 = arith.mulf %129, %129 : vector<32x64xf32>
    %cst_43 = arith.constant dense<0.000000e+00> : vector<32xf32>
    %131 = vector.multi_reduction <add>, %130, %cst_43 [1] : vector<32x64xf32> to vector<32xf32>
    %132 = vector.shape_cast %131 : vector<32xf32> to vector<32x1xf32>
    %cst_44 = arith.constant 6.400000e+01 : f32
    %133 = vector.broadcast %cst_44 : f32 to vector<32x1xf32>
    %134 = arith.divf %132, %133 : vector<32x1xf32>
    %135 = vector.broadcast %127 : vector<32x1xf32> to vector<32x64xf32>
    %136 = arith.subf %121, %135 : vector<32x64xf32>
    %cst_45 = arith.constant 9.99999974E-6 : f32
    %137 = vector.broadcast %cst_45 : f32 to vector<32x1xf32>
    %138 = arith.addf %134, %137 : vector<32x1xf32>
    %139 = math.rsqrt %138 : vector<32x1xf32>
    %140 = vector.broadcast %139 : vector<32x1xf32> to vector<32x64xf32>
    %141 = arith.mulf %136, %140 : vector<32x64xf32>
    %142 = vector.broadcast %122 : vector<1x64xf32> to vector<32x64xf32>
    %143 = arith.mulf %141, %142 : vector<32x64xf32>
    %144 = vector.broadcast %123 : vector<1x64xf32> to vector<32x64xf32>
    %145 = arith.addf %143, %144 : vector<32x64xf32>
    %146 = arith.truncf %145 : vector<32x64xf32> to vector<32x64xbf16>
    %c0_46 = arith.constant 0 : index
    %c0_47 = arith.constant 0 : index
    %147 = vector.load %arg11[%c0_46, %c0_47] : memref<64x256xbf16, #tpu.memory_space<vmem>>, vector<64x256xbf16>
    %cst_48 = arith.constant dense<0.000000e+00> : vector<32x256xf32>
    %148 = tpu.matmul %146, %147, %cst_48 {dimension_numbers = #tpu.dot_dimension_numbers<[1], [0], [0], [1], [0, 0, 1, 1], [], []>} : vector<32x64xbf16>, vector<64x256xbf16>, vector<32x256xf32> -> vector<32x256xf32>
    %c0_49 = arith.constant 0 : index
    %c0_50 = arith.constant 0 : index
    %149 = vector.load %arg12[%c0_49, %c0_50] : memref<1x256xf32, #tpu.memory_space<vmem>>, vector<1x256xf32>
    %150 = vector.broadcast %149 : vector<1x256xf32> to vector<32x256xf32>
    %151 = arith.addf %148, %150 : vector<32x256xf32>
    %cst_51 = arith.constant 1.702000e+00 : f32
    %152 = vector.broadcast %cst_51 : f32 to vector<32x256xf32>
    %153 = arith.mulf %152, %151 : vector<32x256xf32>
    %154 = arith.negf %153 : vector<32x256xf32>
    %155 = math.exp %154 : vector<32x256xf32>
    %cst_52 = arith.constant 1.000000e+00 : f32
    %156 = vector.broadcast %cst_52 : f32 to vector<32x256xf32>
    %157 = arith.addf %156, %155 : vector<32x256xf32>
    %158 = arith.divf %156, %157 : vector<32x256xf32>
    %159 = arith.mulf %151, %158 : vector<32x256xf32>
    %160 = arith.truncf %159 : vector<32x256xf32> to vector<32x256xbf16>
    %c0_53 = arith.constant 0 : index
    %c0_54 = arith.constant 0 : index
    %161 = vector.load %arg13[%c0_53, %c0_54] : memref<256x64xbf16, #tpu.memory_space<vmem>>, vector<256x64xbf16>
    %cst_55 = arith.constant dense<0.000000e+00> : vector<32x64xf32>
    %162 = tpu.matmul %160, %161, %cst_55 {dimension_numbers = #tpu.dot_dimension_numbers<[1], [0], [0], [1], [0, 0, 1, 1], [], []>} : vector<32x256xbf16>, vector<256x64xbf16>, vector<32x64xf32> -> vector<32x64xf32>
    %163 = arith.addf %121, %162 : vector<32x64xf32>
    %c0_56 = arith.constant 0 : index
    %c0_57 = arith.constant 0 : index
    %164 = vector.load %arg14[%c0_56, %c0_57] : memref<1x64xf32, #tpu.memory_space<vmem>>, vector<1x64xf32>
    %165 = vector.broadcast %164 : vector<1x64xf32> to vector<32x64xf32>
    %166 = arith.addf %163, %165 : vector<32x64xf32>
    %167 = vector.shape_cast %166 : vector<32x64xf32> to vector<2x16x64xf32>
    %c0_58 = arith.constant 0 : index
    %c0_59 = arith.constant 0 : index
    %c0_60 = arith.constant 0 : index
    %168 = vector.load %arg15[%c0_58, %c0_59, %c0_60] : memref<2x16x64xf32, #tpu.memory_space<vmem>>, vector<2x16x64xf32>
    tpu.vector_store %arg15[%c0_58, %c0_59, %c0_60], %167 {strides = array<i32>} : memref<2x16x64xf32, #tpu.memory_space<vmem>>, vector<2x16x64xf32>,
    return
  }
  func.func @transform_0(%arg0: i32) -> (i32, i32, i32) {
    %c0_i32 = arith.constant 0 : i32
    %c0_i32_0 = arith.constant 0 : i32
    %c0_i32_1 = arith.constant 0 : i32
    return %arg0, %c0_i32, %c0_i32_0 : i32, i32, i32
  }
  func.func @transform_1(%arg0: i32) -> (i32, i32) {
    %c0_i32 = arith.constant 0 : i32
    %c0_i32_0 = arith.constant 0 : i32
    %c0_i32_1 = arith.constant 0 : i32
    return %c0_i32, %c0_i32_0 : i32, i32
  }
  func.func @transform_2(%arg0: i32) -> (i32, i32) {
    %c0_i32 = arith.constant 0 : i32
    %c0_i32_0 = arith.constant 0 : i32
    %c0_i32_1 = arith.constant 0 : i32
    return %c0_i32, %c0_i32_0 : i32, i32
  }
  func.func @transform_3(%arg0: i32) -> (i32, i32) {
    %c0_i32 = arith.constant 0 : i32
    %c0_i32_0 = arith.constant 0 : i32
    %c0_i32_1 = arith.constant 0 : i32
    return %c0_i32, %c0_i32_0 : i32, i32
  }
  func.func @transform_4(%arg0: i32) -> (i32, i32) {
    %c0_i32 = arith.constant 0 : i32
    %c0_i32_0 = arith.constant 0 : i32
    %c0_i32_1 = arith.constant 0 : i32
    return %c0_i32, %c0_i32_0 : i32, i32
  }
  func.func @transform_5(%arg0: i32) -> (i32, i32) {
    %c0_i32 = arith.constant 0 : i32
    %c0_i32_0 = arith.constant 0 : i32
    %c0_i32_1 = arith.constant 0 : i32
    return %c0_i32, %c0_i32_0 : i32, i32
  }
  func.func @transform_6(%arg0: i32) -> (i32, i32, i32) {
    %c0_i32 = arith.constant 0 : i32
    %c0_i32_0 = arith.constant 0 : i32
    %c0_i32_1 = arith.constant 0 : i32
    %c0_i32_2 = arith.constant 0 : i32
    return %c0_i32, %c0_i32_0, %c0_i32_1 : i32, i32, i32
  }
  func.func @transform_7(%arg0: i32) -> (i32, i32) {
    %c0_i32 = arith.constant 0 : i32
    %c0_i32_0 = arith.constant 0 : i32
    %c0_i32_1 = arith.constant 0 : i32
    return %c0_i32, %c0_i32_0 : i32, i32
  }
  func.func @transform_8(%arg0: i32) -> (i32, i32) {
    %c0_i32 = arith.constant 0 : i32
    %c0_i32_0 = arith.constant 0 : i32
    %c0_i32_1 = arith.constant 0 : i32
    return %c0_i32, %c0_i32_0 : i32, i32
  }
  func.func @transform_9(%arg0: i32) -> (i32, i32) {
    %c0_i32 = arith.constant 0 : i32
    %c0_i32_0 = arith.constant 0 : i32
    %c0_i32_1 = arith.constant 0 : i32
    return %c0_i32, %c0_i32_0 : i32, i32
  }
  func.func @transform_10(%arg0: i32) -> (i32, i32) {
    %c0_i32 = arith.constant 0 : i32
    %c0_i32_0 = arith.constant 0 : i32
    %c0_i32_1 = arith.constant 0 : i32
    return %c0_i32, %c0_i32_0 : i32, i32
  }
  func.func @transform_11(%arg0: i32) -> (i32, i32) {
    %c0_i32 = arith.constant 0 : i32
    %c0_i32_0 = arith.constant 0 : i32
    %c0_i32_1 = arith.constant 0 : i32
    return %c0_i32, %c0_i32_0 : i32, i32
  }
  func.func @transform_12(%arg0: i32) -> (i32, i32) {
    %c0_i32 = arith.constant 0 : i32
    %c0_i32_0 = arith.constant 0 : i32
    %c0_i32_1 = arith.constant 0 : i32
    return %c0_i32, %c0_i32_0 : i32, i32
  }
  func.func @transform_13(%arg0: i32) -> (i32, i32) {
    %c0_i32 = arith.constant 0 : i32
    %c0_i32_0 = arith.constant 0 : i32
    %c0_i32_1 = arith.constant 0 : i32
    return %c0_i32, %c0_i32_0 : i32, i32
  }
  func.func @transform_14(%arg0: i32) -> (i32, i32, i32) {
    %c0_i32 = arith.constant 0 : i32
    %c0_i32_0 = arith.constant 0 : i32
    %c0_i32_1 = arith.constant 0 : i32
    return %arg0, %c0_i32, %c0_i32_0 : i32, i32, i32
  }
}

</mosaic_0001>

<bundles_post_ra>
// kernel: tpu_custom_call.1
= control target key start
LH: loop header
LB: loop body
LE: loop exit
PB: predicated region body
PF: predicated region fallthrough
CT: control target
= control target key end

     0   :  { %s3997_s0 = inlined_call_operand.vmem [shape: f32[4,16,64], index: 0, kind: input, shape index: {}]   ;;  %s3998_s1 = inlined_call_operand.hbm [shape: f32[16,16], index: 1, kind: input, shape index: {}]   ;;  %s3999_s2 = inlined_call_operand.vmem [shape: f32[1,64], index: 2, kind: input, shape index: {}]   ;;  %s4000_s3 = inlined_call_operand.hbm [shape: f32[1,64], index: 3, kind: input, shape index: {}]   ;;  %s4001_s4 = inlined_call_operand.vmem [shape: bf16[64,192], index: 4, kind: input, shape index: {}]   ;;  %s4002_s5 = inlined_call_operand.vmem [shape: f32[1,192], index: 5, kind: input, shape index: {}]   ;;  %s4003_s6 = inlined_call_operand.hbm [shape: bf16[4,16,64], index: 6, kind: input, shape index: {}]   ;;  %s4004_s7 = inlined_call_operand.vmem [shape: f32[1,64], index: 7, kind: input, shape index: {}]   ;;  %s4005_s8 = inlined_call_operand.vmem [shape: f32[1,64], index: 8, kind: input, shape index: {}]   ;;  %s4006_s9 = inlined_call_operand.vmem [shape: f32[1,64], index: 9, kind: input, shape index: {}]   ;;  %s4007_s10 = inlined_call_operand.vmem [shape: bf16[64,256], index: 10, kind: input, shape index: {}]   ;;  %s4008_s11 = inlined_call_operand.vmem [shape: f32[1,256], index: 11, kind: input, shape index: {}]   ;;  %s4009_s12 = inlined_call_operand.vmem [shape: bf16[256,64], index: 12, kind: input, shape index: {}]   ;;  %s4010_s13 = inlined_call_operand.vmem [shape: f32[1,64], index: 13, kind: input, shape index: {}]   ;;  %s4011_s14 = inlined_call_operand.hbm [shape: f32[4,16,64], index: 14, kind: output, shape index: {}]  }
   0x1   :  { %4017 = sst [smem:[#allocation17_spill]] %s4000_s3 }
   0x2   :  { %19 = vsyncpa [#allocation3], 0 }
   0x3   :  { %20 = vsyncpa [#allocation6], 0 }
   0x4   :  { %21 = vsyncpa [#allocation4], 0 }
   0x5   :  { %23 = vsyncpa [#allocation4 + $0x1], 0  ;;  %s3322_s29 = smov 0   ;;  %s3324_s30 = smov 0  }
   0x6   :  { %s3326_s15 = smov 0   ;;  %s3328_s16 = smov 0  }
   0x7 LB: > { %4018 = sst [smem:[#allocation12_spill]] %s3216_s29  ;;  %s3343_s17 = sadd.s32 4294967295, %s3228_s16   ;;  %s3228_s16 = sphi %s3328_s16, %s4030_s16   ;;  %s3224_s15 = sphi %s3326_s15, %s4032_s15   ;;  %s3220_s30 = sphi %s3324_s30, %s4034_s30   ;;  %s3216_s29 = sphi %s3322_s29, %s4033_s29  }
   0x8   : > { %4019 = sst [smem:[#allocation13_spill]] %s3224_s15  ;;  %s2538_s18 = sadd.s32 4294967294, %s3228_s16  }
   0x9   : > { %s3347_s19 = sadd.s32 1, %s3228_s16   ;;  %s335_s20 = sadd.s32 1, %s3224_s15 }
   0xa   : > { %4020 = sst [smem:[#allocation14_spill]] %s3347_s19  ;;  %s332_s21 = ssub.s32 %s3228_s16, %s3347_s19 }
   0xb   : > { %p345_p0 = scmp.ne.s32.totalorder %s3224_s15, %s3220_s30  ;;  %p333_p1 = scmp.eq.s32.totalorder %s332_s21, 0 }
   0xc   : > { %p346_p2 = scmp.eq.s32.totalorder %s3343_s17, 1  ;;  %p351_p3 = scmp.ne.s32.totalorder %s3220_s30, %s3216_s29 }
   0xd   : > { %p352_p4 = scmp.eq.s32.totalorder %s2538_s18, 1  ;;  %p2539_p7 = scmp.ge.s32.totalorder %s3228_s16, 1 }
   0xe   : > { %s3358_s22 = scalar_select %p333_p1, %s3224_s15, %s335_s20  }
   0xf   : > { %p3360_p5 = por %p346_p2, %p345_p0  ;;  %p3364_p6 = por %p352_p4, %p351_p3 }
  0x10   : > { %4021 = sst [smem:[#allocation15_spill]] %s3358_s22  ;;  %p359_p8 = scmp.lt.s32.totalorder %s3228_s16, 3 }
  0x11   : > { %s4023_s24 = scalar_select %p3364_p6, 1, 0 }
  0x12   : > { %p2867_p9 = scmp.eq.s32.totalorder %s3343_s17, 0  ;;  %p3371_p10 = pnand %p2539_p7, %p359_p8 }
  0x13   : > { %4024 = sst [smem:[#allocation16_spill]] %s4023_s24  ;;  %s3230_s26 = smov [#allocation5]  }
  0x14   : > { %s388_s27 = sshll.u32 %s3230_s26, 4  ;;  %p2853_p11 = pneg %p3371_p10  ;;  %s389_s27 = int_to_ptr.vmem [resolvable:$true] %s388_s27 }
  0x15   : > { %s3231_s28 = smov [#allocation2]   ;;  %s3232_s21 = smov [#allocation7]  }
  0x16   : > { %s371_s18 = sshll.u32 %s3231_s28, 4  ;;  %p3379_p12 = pnand %p2867_p9, %p2853_p11  ;;  %s3383_s18 = int_to_ptr.vmem [resolvable:$true] %s371_s18 }
  0x17   : > { %s404_s22 = sshll.u32 %s3232_s21, 4  ;;  %s3093_s15 = scalar_lea.vmem %s389_s27, 16  ;;  %s405_s22 = int_to_ptr.vmem [resolvable:$true] %s404_s22 }
  0x18   : > { %p3084_p13 = pneg %p3379_p12  ;;  %p3094_p0 = scmp.ne.s32.totalorder %s389_s27, %s3093_s15 }
  0x19   : > { %s3100_s26 = scalar_lea.vmem %s389_s27, 32  ;;  %p3101_p3 = scmp.lt.s32.totalorder %s389_s27, %s389_s27 }
  0x1a   : > { %p3096_p1 = pnand %p3094_p0, %p3084_p13  ;;  %p3102_p4 = scmp.lt.s32.totalorder %s3100_s26, %s3093_s15 }
  0x1c   : > { %p3097_p2 = pneg %p3096_p1  ;;  %p3103_p7 = por %p3102_p4, %p3101_p3 }
  0x1e   : > { %p3104_p8 = pnand %p3103_p7, %p3097_p2 }
  0x20   : > { %3107 = shalt.err (!%p3104_p8)
}
  0x21   : > { %s4027_s3 = sld [smem:[#allocation17_spill]]  ;;  %s3119_s21 = scalar_lea.vmem %s3383_s18, 256 }
  0x22   : > { %p3120_p11 = scmp.ne.s32.totalorder %s3383_s18, %s3119_s21  ;;  %p3127_p3 = scmp.lt.s32.totalorder %s3383_s18, %s3383_s18 }
  0x23   : > { %p3128_p2 = scmp.lt.s32.totalorder %s3119_s21, %s3119_s21 }
  0x24   : > { %p3122_p0 = pnand %p3120_p11, %p3084_p13 }
  0x25   : > { %p3129_p4 = por %p3128_p2, %p3127_p3 }
  0x26   : > { %p3123_p1 = pneg %p3122_p0 }
  0x27   : > { %2859 = dma.hbm_to_vmem [thread:$0]  (!%p3379_p12), %s4027_s3, 16, %s389_s27, [#allocation6]  }
  0x28   : > { %p3130_p7 = pnand %p3129_p4, %p3123_p1 }
  0x2a   : > { %3133 = shalt.err (!%p3130_p7)
}
  0x2b   : > { %s3233_s15 = smov 128   ;;  %s3234_s19 = smov 8  }
  0x2c   : > { %2856 = dma.hbm_to_vmem [thread:$0]  (!%p3379_p12), %s3998_s1, 256, %s3383_s18, [#allocation3], %s3233_s15, %s3233_s15, %s3234_s19  }
  0x2d   : > { %s3145_s28 = scalar_lea.vmem %s405_s22, 512  ;;  %p3153_p3 = scmp.lt.s32.totalorder %s405_s22, %s405_s22 }
  0x2e   : > { %p3146_p8 = scmp.ne.s32.totalorder %s405_s22, %s3145_s28  ;;  %p3154_p1 = scmp.lt.s32.totalorder %s3145_s28, %s3145_s28 }
  0x30   : > { %p3148_p11 = pnand %p3146_p8, %p3084_p13  ;;  %p3155_p2 = por %p3154_p1, %p3153_p3 }
  0x32   : > { %p3149_p0 = pneg %p3148_p11 }
  0x34   : > { %p3156_p4 = pnand %p3155_p2, %p3149_p0 }
  0x36   : > { %3159 = shalt.err (!%p3156_p4)
}
  0x37   : > { %s3235_s21 = smov 64   ;;  %s3236_s3 = smov 4  }
  0x38   : > { %2862 = dma.hbm_to_vmem [thread:$0]  (!%p3379_p12), %s4003_s6, 512, %s405_s22, [#allocation6], %s3235_s21, %s3235_s21, %s3236_s3  }
  0x39   : > { %451 = sbr.rel (%p3371_p10) target bundleno = 2592 (0xa20), region = 76 }
  0x3e   : > { %3203 = dma.done.wait (%p2867_p9), [#allocation3], 256  }
  0x3f   : > { %3205 = vsyncadd (%p2867_p9), [#allocation3], 4294967040 }
  0x40   : > { %3207 = dma.done.wait (%p2867_p9), [#allocation6], 528  }
  0x41   : > { %3209 = vsyncadd (%p2867_p9), [#allocation6], 4294966768  ;;  %s2549_s18 = sshll.u32 %s3343_s17, 1  ;;  %vm521_vm0 = vcmask 523264   ;;  %v2922_v28 = vld [vmem:[%s4001_s4 + $0x34] ss:$8 sps:$4 sm:$0xff]  }
  0x42   : > { %p507_p13 = scmp.lt.s32.totalorder %s2549_s18, 3  ;;  %v2924_v29 = vld [vmem:[%s4001_s4 + $0x30] ss:$8 sps:$4 sm:$0xff]   ;;  %v2925_v30 = vld [vmem:[%s4001_s4 + $0x24] ss:$8 sps:$4 sm:$0xff]   ;;  %671 = vmatprep.subr.bf16.mxu0 %v2922_v28  ;;  %2831 = vmatprep.subr.bf16.mxu1 %v2922_v28  ;;  %v3237_v33 = vmov 0  }
  0x43   : > { %672 = vmatpush1.bf16.msra.mxu0 %v2924_v29  ;;  %2835 = vmatpush1.bf16.msra.mxu1 %v2924_v29  ;;  %v2927_v31 = vld [vmem:[%s4001_s4 + $0x20] ss:$8 sps:$4 sm:$0xff]   ;;  %v2928_v32 = vld [vmem:[%s4001_s4 + $0x14] ss:$8 sps:$4 sm:$0xff]   ;;  %v2930_v34 = vld [vmem:[%s4001_s4 + $0x10] ss:$8 sps:$4 sm:$0xff]  }
  0x44   : > { %s4036_s18 = smov (!%p507_p13, %s2549_s18), 3  ;;  %673 = vmatprep.subr.bf16.mxu0 %v2925_v30  ;;  %2832 = vmatprep.subr.bf16.mxu1 %v2925_v30  ;;  %v2931_v35 = vld [vmem:[%s4001_s4 + $0x4] ss:$8 sps:$4 sm:$0xff]   ;;  %v2933_v36 = vld [vmem:[%s4001_s4] ss:$8 sps:$4 sm:$0xff]   ;;  %vm3240_vm1 = vmmov 0  }
  0x45   : > { %s2636_s3 = sshll.u32 %s4036_s18, 4  ;;  %695 = vmatprep.mubr.bf16.mxu0 %v3237_v33  ;;  %705 = vmatprep.mubr.bf16.mxu1 %v3237_v33  ;;  %v2552_v51 = vld [vmem:[%s3999_s2] ss:$0 sm:$0xff]  ;;  %v2553_v56 = vld [vmem:[#allocation5] ss:$0 sm:$0xff]  ;;  %s3239_s18 = smov 112  }
  0x46   : > { %s3430_s24 = scalar_lea.vmem %s3997_s0, %s2636_s3  ;;  %s3241_s3 = smov 80   ;;  %vm758_vm2 = vcmask 130048  }
  0x47   : > { %v515_v0 = vld [vmem:[%s3430_s24] sm:$0xff]  ;;  %v517_v1 = vld [vmem:[%s3430_s24 + $0x10] sm:$0xff]  ;;  %v516_v2 = vld [vmem:[%s3430_s24 + $0x8] sm:$0xff]  ;;  %674 = vmatpush1.bf16.msra.mxu0 %v2927_v31  ;;  %2836 = vmatpush1.bf16.msra.mxu1 %v2927_v31  ;;  %s3242_s29 = smov 64   ;;  %s3243_s22 = smov 96  }
  0x48   : > { %v522_v3 = vsel %vm521_vm0, %v515_v0, 0.0  ;;  %v528_v4 = vsel %vm521_vm0, %v517_v1, 0.0  ;;  %v518_v5 = vld [vmem:[%s3430_s24 + $0x18] sm:$0xff]  ;;  %v525_v6 = vsel %vm521_vm0, %v516_v2, 0.0  ;;  %675 = vmatprep.subr.bf16.mxu0 %v2928_v32  ;;  %2833 = vmatprep.subr.bf16.mxu1 %v2928_v32  ;;  %s503_s19 = sand.u32 1, %s3220_s30  }
  0x49   : > { %523 = vadd.xlane.f32.xlu0 %v522_v3  ;;  %529 = vadd.xlane.f32.xlu1 %v528_v4  ;;  %v531_v7 = vsel %vm521_vm0, %v518_v5, 0.0  ;;  %s2548_s26 = sshll.u32 %s503_s19, 5 }
  0x4a   : > { %s505_s21 = scalar_lea.vmem [#allocation8], %s2548_s26 }
  0x4b   : > { %676 = vmatpush1.bf16.msra.mxu0 %v2930_v34  ;;  %2837 = vmatpush1.bf16.msra.mxu1 %v2930_v34 }
  0x4c   : > { %677 = vmatprep.subr.bf16.mxu0 %v2931_v35  ;;  %2834 = vmatprep.subr.bf16.mxu1 %v2931_v35 }
  0x4d   : > { %526 = vadd.xlane.f32.xlu0 %v525_v6  ;;  %532 = vadd.xlane.f32.xlu1 %v531_v7 }
  0x4f   : > { %678 = vmatpush1.bf16.msra.mxu0 %v2933_v36  ;;  %2838 = vmatpush1.bf16.msra.mxu1 %v2933_v36 }
  0xd2   : > { %v524_v8 = vpop.xlane.xlu0 %523  ;;  %v530_v9 = vpop.xlane.xlu1 %529 }
  0xd3   : > { %v535_v10 = vmul.f32 0.015625, %v524_v8  ;;  %v537_v11 = vmul.f32 0.015625, %v530_v9  ;;  %v3496_v8 = vld [vmem:[%s4002_s5] sm:$0x3] }
  0xd5   : > { %v3440_v12 = vsub.f32 %v515_v0, %v535_v10  ;;  %v3442_v13 = vsub.f32 %v517_v1, %v537_v11 }
  0xd6   : > { %v527_v14 = vpop.xlane.xlu0 %526  ;;  %v533_v15 = vpop.xlane.xlu1 %532 }
  0xd7   : > { %v536_v16 = vmul.f32 0.015625, %v527_v14  ;;  %v538_v17 = vmul.f32 0.015625, %v533_v15  ;;  %v543_v18 = vmul.f32 %v3440_v12, %v3440_v12  ;;  %v545_v19 = vmul.f32 %v3442_v13, %v3442_v13 }
  0xd9   : > { %v540_v20 = vsub.f32 %v516_v2, %v536_v16  ;;  %v3448_v21 = vsub.f32 %v518_v5, %v538_v17  ;;  %v547_v22 = vsel %vm521_vm0, %v543_v18, 0.0  ;;  %v553_v23 = vsel %vm521_vm0, %v545_v19, 0.0 }
  0xda   : > { %548 = vadd.xlane.f32.xlu0 %v547_v22  ;;  %v607_v5 = vlaneseq  ;;  %v3238_v16 = vmov 0.0  }
  0xdb   : > { %v544_v24 = vmul.f32 %v540_v20, %v540_v20  ;;  %v546_v25 = vmul.f32 %v3448_v21, %v3448_v21  ;;  %2711 = vmatprep.subr.bf16.mxu1 %v3238_v16  ;;  %2729 = vmatprep.subr.bf16.mxu0 %v3238_v16 }
  0xdc   : > { %v3490_v6 = vshrl.u32 %v607_v5, 7 }
  0xdd   : > { %v550_v26 = vsel %vm521_vm0, %v544_v24, 0.0  ;;  %v556_v27 = vsel %vm521_vm0, %v546_v25, 0.0 }
  0xde   : > { %554 = vadd.xlane.f32.xlu0 %v553_v23  ;;  %551 = vadd.xlane.f32.xlu1 %v550_v26  ;;  %v609_v7 = vsub.s32 0, %v3490_v6 }
  0xe0   : > { %v610_v10 = vrot.slane %v3496_v8, %v609_v7 }
  0xe2   : > { %557 = vadd.xlane.f32.xlu1 %v556_v27 }
 0x163   : > { %v549_v37 = vpop.xlane.xlu0 %548 }
 0x164   : > { %v559_v38 = vmul.f32 0.015625, %v549_v37 }
 0x166   : > { %v563_v39 = vadd.f32 1e-05, %v559_v38 }
 0x167   : > { %v552_v40 = vpop.xlane.xlu1 %551  ;;  %v555_v41 = vpop.xlane.xlu0 %554 }
 0x168   : > { %2966 = vrsqrt.f32 %v563_v39  ;;  %v560_v42 = vmul.f32 0.015625, %v552_v40  ;;  %v561_v43 = vmul.f32 0.015625, %v555_v41 }
 0x16a   : > { %v564_v44 = vadd.f32 1e-05, %v560_v42  ;;  %v565_v45 = vadd.f32 1e-05, %v561_v43  ;;  %v613_v42 = vsub.s32 1, %v3490_v6 }
 0x16b   : > { %v558_v46 = vpop.xlane.xlu1 %557 }
 0x16c   : > { %2968 = vrsqrt.f32 %v564_v44  ;;  %v562_v47 = vmul.f32 0.015625, %v558_v46  ;;  %v614_v46 = vrot.slane %v3496_v8, %v613_v42 }
 0x16d   : > { %2970 = vrsqrt.f32 %v565_v45 }
 0x16e   : > { %v566_v48 = vadd.f32 1e-05, %v562_v47 }
 0x170   : > { %2972 = vrsqrt.f32 %v566_v48 }
 0x175   : > { %v2967_v49 = vpop.eup %2966 }
 0x176   : > { %v571_v50 = vmul.f32 %v2967_v49, %v3440_v12 }
 0x178   : > { %v581_v55 = vmul.f32 %v2552_v51, %v571_v50 }
 0x179   : > { %v2969_v52 = vpop.eup %2968 }
 0x17a   : > { %v2971_v53 = vpop.eup %2970  ;;  %v572_v54 = vmul.f32 %v2969_v52, %v540_v20  ;;  %v591_v60 = vadd.f32 %v2553_v56, %v581_v55 }
 0x17b   : > { %v573_v57 = vmul.f32 %v2971_v53, %v3442_v13 }
 0x17c   : > { %v582_v58 = vmul.f32 %v2552_v51, %v572_v54 }
 0x17d   : > { %v2973_v59 = vpop.eup %2972  ;;  %v583_v63 = vmul.f32 %v2552_v51, %v573_v57 }
 0x17e   : > { %v592_v61 = vadd.f32 %v2553_v56, %v582_v58  ;;  %v574_v62 = vmul.f32 %v2973_v59, %v3448_v21 }
 0x17f   : > { %v593_v2 = vadd.f32 %v2553_v56, %v583_v63 }
 0x180   : > { %v595_v0 = vpack.c.bf16 %v592_v61, %v591_v60  ;;  %v584_v1 = vmul.f32 %v2552_v51, %v574_v62  ;;  %v3576_v60 = vld [vmem:[#allocation2 + $0x8] sm:$0xff] }
 0x182   : > { %2562 = vmatmul.mubr.msk.bf16.vlgmr.msra.gmra.mxu0 %vm521_vm0, %v595_v0  ;;  %v594_v3 = vadd.f32 %v2553_v56, %v584_v1  ;;  %v3571_v56 = vld [vmem:[#allocation2] sm:$0xff] }
 0x183   : > { %2731 = vmatprep.mubr.msk.bf16.mxu0 %vm3240_vm1, %v3238_v16 }
 0x184   : > { %v596_v4 = vpack.c.bf16 %v594_v3, %v593_v2 }
 0x186   : > { %2563 = vmatmul.mubr.msk.bf16.vlgmr.msra.gmra.mxu1 %vm521_vm0, %v596_v4 }
 0x187   : > { %2713 = vmatprep.mubr.msk.bf16.mxu1 %vm3240_vm1, %v3238_v16 }
 0x242   : > { %v697_v9 = vpop.f32.mrf.mxu0 }
 0x243   : > { %v698_v14 = vadd.f32 %v697_v9, %v610_v10 }
 0x244   : > { %v3501_v11 = vpop.f32.mrf.mxu0 }
 0x245   : > { %v700_v51 = vadd.f32 %v3501_v11, %v614_v46 }
 0x246   : > { %v701_v12 = vpop.f32.mrf.mxu0  ;;  %v707_v13 = vpop.f32.mrf.mxu1 }
 0x247   : > { %v702_v15 = vadd.f32 %v701_v12, %v610_v10  ;;  %v708_v20 = vadd.f32 %v707_v13, %v610_v10 }
 0x248   : > { %v3505_v17 = vpop.f32.mrf.mxu1  ;;  %v703_v44 = vpop.f32.mrf.mxu0 }
 0x249   : > { %v716_v18 = vpack.c.bf16 %v702_v15, %v698_v14  ;;  %v704_v48 = vadd.f32 %v703_v44, %v614_v46  ;;  %v710_v54 = vadd.f32 %v3505_v17, %v614_v46 }
 0x24a   : > { %v711_v19 = vpop.f32.mrf.mxu1 }
 0x24b   : > { %v712_v21 = vadd.f32 %v711_v19, %v610_v10  ;;  %720 = vrot.lane.b32.xlu0 %v716_v18, %s3239_s18  ;;  %v3556_v52 = vpack.c.bf16 %v704_v48, %v700_v51 }
 0x24c   : > { %v713_v49 = vpop.f32.mrf.mxu1 }
 0x24d   : > { %v717_v22 = vpack.c.bf16 %v712_v21, %v708_v20  ;;  %v714_v53 = vadd.f32 %v713_v49, %v614_v46 }
 0x24f   : > { %728 = vrot.lane.b32.xlu0 %v716_v18, %s3241_s3  ;;  %722 = vrot.lane.b32.xlu1 %v717_v22, %s3239_s18  ;;  %v3564_v55 = vpack.c.bf16 %v714_v53, %v710_v54 }
 0x253   : > { %756 = vrot.lane.b32.xlu0 %v716_v18, %s3242_s29  ;;  %724 = vrot.lane.b32.xlu1 %v716_v18, %s3243_s22 }
 0x257   : > { %726 = vrot.lane.b32.xlu1 %v717_v22, %s3243_s22 }
 0x25b   : > { %730 = vrot.lane.b32.xlu1 %v717_v22, %s3241_s3 }
 0x25f   : > { %806 = vrot.lane.b32.xlu1 %v717_v22, %s3242_s29 }
 0x2bd   : > { %v721_v23 = vpop.permute.xlu0 %720 }
 0x2be   : > { %855 = vrot.lane.b32.xlu0 %v721_v23, %s3242_s29 }
 0x2c1   : > { %v723_v24 = vpop.permute.xlu1 %722  ;;  %v729_v25 = vpop.permute.xlu0 %728 }
 0x2c2   : > { %904 = vrot.lane.b32.xlu1 %v723_v24, %s3242_s29 }
 0x2c5   : > { %v725_v26 = vpop.permute.xlu1 %724  ;;  %v757_v27 = vpop.permute.xlu0 %756 }
 0x2c6   : > { %v763_v28 = vsel %vm758_vm2, %v757_v27, 0  ;;  %953 = vrot.lane.b32.xlu0 %v725_v26, %s3242_s29 }
 0x2c7   : > { %2712 = vmatpush3.bf16.xpose.msra.mxu1 %v763_v28 }
 0x2c8   : > { %2717 = vmatprep.subr.bf16.mxu1 %v3238_v16 }
 0x2c9   : > { %v727_v29 = vpop.permute.xlu1 %726 }
 0x2ca   : > { %1002 = vrot.lane.b32.xlu1 %v727_v29, %s3242_s29  ;;  %1051 = vrot.lane.b32.xlu0 %v729_v25, %s3242_s29 }
 0x2cd   : > { %v731_v30 = vpop.permute.xlu1 %730 }
 0x2ce   : > { %1100 = vrot.lane.b32.xlu1 %v731_v30, %s3242_s29  ;;  %2714 = vmatmul.mubr.msk.bf16.vlgmr.msra.gmra.mxu1 %vm758_vm2, %v716_v18 }
 0x2cf   : > { %2719 = vmatprep.mubr.msk.bf16.mxu1 %vm3240_vm1, %v3238_v16 }
 0x2d1   : > { %v807_v31 = vpop.permute.xlu1 %806 }
 0x2d2   : > { %v812_v32 = vsel %vm758_vm2, %v807_v31, 0 }
 0x2d3   : > { %2718 = vmatpush3.bf16.xpose.msra.mxu1 %v812_v32 }
 0x2d4   : > { %2723 = vmatprep.subr.bf16.mxu1 %v3238_v16 }
 0x2da   : > { %2720 = vmatmul.mubr.msk.bf16.vlgmr.msra.gmra.mxu1 %vm758_vm2, %v717_v22 }
 0x2db   : > { %2725 = vmatprep.mubr.msk.bf16.mxu1 %vm3240_vm1, %v3238_v16 }
 0x330   : > { %v856_v34 = vpop.permute.xlu0 %855 }
 0x331   : > { %v861_v35 = vsel %vm758_vm2, %v856_v34, 0 }
 0x332   : > { %2724 = vmatpush3.bf16.xpose.msra.mxu1 %v861_v35 }
 0x333   : > { %2735 = vmatprep.subr.bf16.mxu1 %v3238_v16 }
 0x334   : > { %v905_v36 = vpop.permute.xlu1 %904 }
 0x335   : > { %v910_v37 = vsel %vm758_vm2, %v905_v36, 0 }
 0x336   : > { %2730 = vmatpush3.bf16.xpose.msra.mxu0 %v910_v37 }
 0x337   : > { %2741 = vmatprep.subr.bf16.mxu0 %v3238_v16 }
 0x338   : > { %v954_v38 = vpop.permute.xlu0 %953 }
 0x339   : > { %v959_v39 = vsel %vm758_vm2, %v954_v38, 0  ;;  %2726 = vmatmul.mubr.msk.bf16.vlgmr.msra.gmra.mxu1 %vm758_vm2, %v721_v23 }
 0x33a   : > { %2736 = vmatpush3.bf16.xpose.msra.mxu1 %v959_v39  ;;  %2737 = vmatprep.mubr.msk.bf16.mxu1 %vm3240_vm1, %v3238_v16 }
 0x33b   : > { %2747 = vmatprep.subr.bf16.mxu1 %v3238_v16 }
 0x33c   : > { %v1003_v40 = vpop.permute.xlu1 %1002  ;;  %v1052_v43 = vpop.permute.xlu0 %1051 }
 0x33d   : > { %v1008_v41 = vsel %vm758_vm2, %v1003_v40, 0  ;;  %2732 = vmatmul.mubr.msk.bf16.vlgmr.msra.gmra.mxu0 %vm758_vm2, %v723_v24  ;;  %v1057_v45 = vsel %vm758_vm2, %v1052_v43, 0 }
 0x33e   : > { %2742 = vmatpush3.bf16.xpose.msra.mxu0 %v1008_v41  ;;  %2743 = vmatprep.mubr.msk.bf16.mxu0 %vm3240_vm1, %v3238_v16 }
 0x33f   : > { %2753 = vmatprep.subr.bf16.mxu0 %v3238_v16 }
 0x340   : > { %v1101_v47 = vpop.permute.xlu1 %1100 }
 0x341   : > { %2738 = vmatmul.mubr.msk.bf16.vlgmr.msra.gmra.mxu1 %vm758_vm2, %v725_v26  ;;  %v1106_v50 = vsel %vm758_vm2, %v1101_v47, 0 }
 0x342   : > { %2748 = vmatpush3.bf16.xpose.msra.mxu1 %v1057_v45  ;;  %2749 = vmatprep.mubr.msk.bf16.mxu1 %vm3240_vm1, %v3238_v16 }
 0x343   : > { %2759 = vmatprep.subr.bf16.mxu1 %v3238_v16 }
 0x345   : > { %2744 = vmatmul.mubr.msk.bf16.vlgmr.msra.gmra.mxu0 %vm758_vm2, %v727_v29 }
 0x346   : > { %2754 = vmatpush3.bf16.xpose.msra.mxu0 %v1106_v50  ;;  %2755 = vmatprep.mubr.msk.bf16.mxu0 %vm3240_vm1, %v3238_v16 }
 0x347   : > { %2765 = vmatprep.subr.bf16.mxu0 %v3238_v16 }
 0x349   : > { %2750 = vmatmul.mubr.msk.bf16.vlgmr.msra.gmra.mxu1 %vm758_vm2, %v729_v25 }
 0x34a   : > { %2760 = vmatpush3.bf16.msra.mxu1 %v3556_v52  ;;  %2761 = vmatprep.mubr.msk.bf16.mxu1 %vm3240_vm1, %v3238_v16 }
 0x34b   : > { %2771 = vmatprep.subr.bf16.mxu1 %v3238_v16 }
 0x34d   : > { %2756 = vmatmul.mubr.msk.bf16.vlgmr.msra.gmra.mxu0 %vm758_vm2, %v731_v30 }
 0x34e   : > { %2766 = vmatpush3.bf16.msra.mxu0 %v3564_v55  ;;  %2767 = vmatprep.mubr.msk.bf16.mxu0 %vm3240_vm1, %v3238_v16 }
 0x34f   : > { %2777 = vmatprep.subr.bf16.mxu0 %v3238_v16 }
 0x38e   : > { %v799_v57 = vpop.f32.mrf.mxu1 }
 0x38f   : > { %v3574_v58 = vadd.f32 %v799_v57, %v3571_v56 }
 0x390   : > { %v2715_v59 = vpop.f32.mrf.mxu1 }
 0x391   : > { %v1149_v61 = vsel %vm758_vm2, %v3574_v58, -inf }
 0x392   : > { %1150 = vmax.xlane.f32.xlu0 %v1149_v61  ;;  %v802_v62 = vpop.f32.mrf.mxu1 }
 0x393   : > { %v3581_v63 = vadd.f32 %v802_v62, %v3576_v60 }
 0x394   : > { %v2716_v0 = vpop.f32.mrf.mxu1 }
 0x395   : > { %v1152_v1 = vsel %vm758_vm2, %v3581_v63, -inf }
 0x396   : > { %1153 = vmax.xlane.f32.xlu1 %v1152_v1 }
 0x39a   : > { %v848_v2 = vpop.f32.mrf.mxu1 }
 0x39b   : > { %v3586_v3 = vadd.f32 %v848_v2, %v3571_v56 }
 0x39c   : > { %v2721_v4 = vpop.f32.mrf.mxu1 }
 0x39d   : > { %v1155_v5 = vsel %vm758_vm2, %v3586_v3, -inf }
 0x39e   : > { %1156 = vmax.xlane.f32.xlu0 %v1155_v5  ;;  %v851_v8 = vpop.f32.mrf.mxu1 }
 0x39f   : > { %v3591_v9 = vadd.f32 %v851_v8, %v3576_v60 }
 0x3a0   : > { %v2722_v10 = vpop.f32.mrf.mxu1 }
 0x3a1   : > { %v1158_v11 = vsel %vm758_vm2, %v3591_v9, -inf }
 0x3a2   : > { %1159 = vmax.xlane.f32.xlu0 %v1158_v11 }
 0x3f9   : > { %v897_v12 = vpop.f32.mrf.mxu1 }
 0x3fa   : > { %v3596_v13 = vadd.f32 %v897_v12, %v3571_v56 }
 0x3fb   : > { %v2727_v14 = vpop.f32.mrf.mxu1 }
 0x3fc   : > { %v1161_v15 = vsel %vm758_vm2, %v3596_v13, -inf }
 0x3fd   : > { %v946_v17 = vpop.f32.mrf.mxu0  ;;  %1162 = vmax.xlane.f32.xlu0 %v1161_v15  ;;  %v900_v18 = vpop.f32.mrf.mxu1 }
 0x3fe   : > { %v3601_v19 = vadd.f32 %v946_v17, %v3571_v56  ;;  %v3604_v20 = vadd.f32 %v900_v18, %v3576_v60 }
 0x3ff   : > { %v2728_v21 = vpop.f32.mrf.mxu1  ;;  %v2733_v22 = vpop.f32.mrf.mxu0 }
 0x400   : > { %v1167_v23 = vsel %vm758_vm2, %v3601_v19, -inf  ;;  %v1164_v24 = vsel %vm758_vm2, %v3604_v20, -inf }
 0x401   : > { %v949_v25 = vpop.f32.mrf.mxu0  ;;  %1168 = vmax.xlane.f32.xlu0 %v1167_v23  ;;  %1165 = vmax.xlane.f32.xlu1 %v1164_v24  ;;  %v995_v26 = vpop.f32.mrf.mxu1 }
 0x402   : > { %v3611_v27 = vadd.f32 %v949_v25, %v3576_v60  ;;  %v3614_v28 = vadd.f32 %v995_v26, %v3571_v56 }
 0x403   : > { %v2734_v29 = vpop.f32.mrf.mxu0  ;;  %v2739_v30 = vpop.f32.mrf.mxu1 }
 0x404   : > { %v1170_v31 = vsel %vm758_vm2, %v3611_v27, -inf  ;;  %v1173_v32 = vsel %vm758_vm2, %v3614_v28, -inf }
 0x405   : > { %v1044_v34 = vpop.f32.mrf.mxu0  ;;  %1171 = vmax.xlane.f32.xlu1 %v1170_v31  ;;  %1174 = vmax.xlane.f32.xlu0 %v1173_v32  ;;  %v998_v35 = vpop.f32.mrf.mxu1 }
 0x406   : > { %v3621_v36 = vadd.f32 %v1044_v34, %v3571_v56  ;;  %v3624_v37 = vadd.f32 %v998_v35, %v3576_v60 }
 0x407   : > { %v2740_v38 = vpop.f32.mrf.mxu1  ;;  %v2745_v39 = vpop.f32.mrf.mxu0 }
 0x408   : > { %v1179_v40 = vsel %vm758_vm2, %v3621_v36, -inf  ;;  %v1176_v41 = vsel %vm758_vm2, %v3624_v37, -inf }
 0x409   : > { %v1047_v43 = vpop.f32.mrf.mxu0  ;;  %1180 = vmax.xlane.f32.xlu0 %v1179_v40  ;;  %1177 = vmax.xlane.f32.xlu1 %v1176_v41  ;;  %v1093_v44 = vpop.f32.mrf.mxu1 }
 0x40a   : > { %v3631_v45 = vadd.f32 %v1047_v43, %v3576_v60  ;;  %v3634_v46 = vadd.f32 %v1093_v44, %v3571_v56 }
 0x40b   : > { %v2746_v47 = vpop.f32.mrf.mxu0  ;;  %v2751_v48 = vpop.f32.mrf.mxu1 }
 0x40c   : > { %v1182_v49 = vsel %vm758_vm2, %v3631_v45, -inf  ;;  %v1185_v50 = vsel %vm758_vm2, %v3634_v46, -inf }
 0x40d   : > { %v1142_v51 = vpop.f32.mrf.mxu0  ;;  %1183 = vmax.xlane.f32.xlu1 %v1182_v49  ;;  %1186 = vmax.xlane.f32.xlu0 %v1185_v50  ;;  %v1096_v53 = vpop.f32.mrf.mxu1 }
 0x40e   : > { %v3641_v54 = vadd.f32 %v1142_v51, %v3571_v56  ;;  %v3654_v10 = vadd.f32 %v1096_v53, %v3576_v60 }
 0x40f   : > { %v2752_v57 = vpop.f32.mrf.mxu1  ;;  %v2757_v59 = vpop.f32.mrf.mxu0 }
 0x410   : > { %v1191_v61 = vsel %vm758_vm2, %v3641_v54, -inf  ;;  %v1188_v14 = vsel %vm758_vm2, %v3654_v10, -inf }
 0x411   : > { %v1145_v62 = vpop.f32.mrf.mxu0  ;;  %1192 = vmax.xlane.f32.xlu0 %v1191_v61 }
 0x412   : > { %v3659_v12 = vadd.f32 %v1145_v62, %v3576_v60 }
 0x413   : > { %v2758_v0 = vpop.f32.mrf.mxu0 }
 0x41b   : > { %v1151_v1 = vpop.xlane.xlu0 %1150 }
 0x41c   : > { %v1197_v56 = vsub.f32 %v3574_v58, %v1151_v1 }
 0x41e   : > { %738 = vrot.lane.b32.xlu1 %v3564_v55, %s3239_s18  ;;  %v1213_v4 = vmul.f32 1.442695, %v1197_v56 }
 0x41f   : > { %v1154_v60 = vpop.xlane.xlu1 %1153 }
 0x420   : > { %2974 = vpow2.f32 %v1213_v4  ;;  %v1198_v18 = vsub.f32 %v3581_v63, %v1154_v60 }
 0x422   : > { %742 = vrot.lane.b32.xlu1 %v3556_v52, %s3243_s22  ;;  %v1215_v22 = vmul.f32 1.442695, %v1198_v18 }
 0x427   : > { %736 = vrot.lane.b32.xlu0 %v3556_v52, %s3239_s18  ;;  %v1157_v2 = vpop.xlane.xlu0 %1156  ;;  %s2638_s18 = sshll.u32 %s3343_s17, 9  ;;  %s3957_s17 = scalar_lea.sflag [#allocation4], %s503_s19 }
 0x428   : > { %v1199_v5 = vsub.f32 %v3586_v3, %v1157_v2  ;;  %v1194_v3 = vsel %vm758_vm2, %v3659_v12, -inf  ;;  %s3950_s25 = scalar_lea.hbm %s4011_s14, %s2638_s18 }
 0x42a   : > { %v1217_v8 = vmul.f32 1.442695, %v1199_v5 }
 0x42b   : > { %v1160_v21 = vpop.xlane.xlu0 %1159 }
 0x42c   : > { %2976 = vpow2.f32 %v1217_v8  ;;  %v1200_v23 = vsub.f32 %v3591_v9, %v1160_v21 }
 0x42d   : > { %v3656_v11 = vpop.eup %2974  ;;  %2978 = vpow2.f32 %v1215_v22 }
 0x42e   : > { %v1245_v58 = vsel %vm758_vm2, %v3656_v11, 0.0  ;;  %v1219_v24 = vmul.f32 1.442695, %v1200_v23 }
 0x430   : > { %2980 = vpow2.f32 %v1219_v24 }
 0x439   : > { %v3665_v15 = vpop.eup %2976 }
 0x43a   : > { %v1251_v17 = vsel %vm758_vm2, %v3665_v15, 0.0  ;;  %v3675_v25 = vpop.eup %2978 }
 0x43b   : > { %v1248_v26 = vsel %vm758_vm2, %v3675_v25, 0.0 }
 0x43d   : > { %v3679_v29 = vpop.eup %2980 }
 0x43e   : > { %v1254_v30 = vsel %vm758_vm2, %v3679_v29, 0.0 }
 0x446   : > { %1189 = vmax.xlane.f32.xlu1 %v1188_v14  ;;  %1246 = vadd.xlane.f32.xlu0 %v1245_v58 }
 0x44a   : > { %1195 = vmax.xlane.f32.xlu1 %v1194_v3  ;;  %1252 = vadd.xlane.f32.xlu0 %v1251_v17 }
 0x45b   : > { %744 = vrot.lane.b32.xlu1 %v3564_v55, %s3243_s22 }
 0x47f   : > { %1249 = vadd.xlane.f32.xlu1 %v1248_v26 }
 0x483   : > { %1255 = vadd.xlane.f32.xlu1 %v1254_v30 }
 0x486   : > { %v1163_v63 = vpop.xlane.xlu0 %1162 }
 0x487   : > { %v1201_v31 = vsub.f32 %v3596_v13, %v1163_v63 }
 0x489   : > { %v1221_v32 = vmul.f32 1.442695, %v1201_v31 }
 0x48a   : > { %v1166_v9 = vpop.xlane.xlu1 %1165  ;;  %v1169_v34 = vpop.xlane.xlu0 %1168 }
 0x48b   : > { %2982 = vpow2.f32 %v1221_v32  ;;  %v1202_v35 = vsub.f32 %v3604_v20, %v1166_v9  ;;  %v1203_v38 = vsub.f32 %v3601_v19, %v1169_v34 }
 0x48d   : > { %v1223_v39 = vmul.f32 1.442695, %v1202_v35  ;;  %v1225_v40 = vmul.f32 1.442695, %v1203_v38 }
 0x48e   : > { %v1172_v41 = vpop.xlane.xlu1 %1171  ;;  %v1175_v43 = vpop.xlane.xlu0 %1174 }
 0x48f   : > { %2984 = vpow2.f32 %v1223_v39  ;;  %v1204_v44 = vsub.f32 %v3611_v27, %v1172_v41  ;;  %v1205_v47 = vsub.f32 %v3614_v28, %v1175_v43 }
 0x490   : > { %2986 = vpow2.f32 %v1225_v40 }
 0x491   : > { %v1227_v48 = vmul.f32 1.442695, %v1204_v44  ;;  %v1229_v13 = vmul.f32 1.442695, %v1205_v47 }
 0x492   : > { %v1178_v49 = vpop.xlane.xlu1 %1177  ;;  %v1181_v50 = vpop.xlane.xlu0 %1180 }
 0x493   : > { %2988 = vpow2.f32 %v1227_v48  ;;  %v1206_v51 = vsub.f32 %v3624_v37, %v1178_v49  ;;  %v1207_v20 = vsub.f32 %v3621_v36, %v1181_v50 }
 0x494   : > { %2990 = vpow2.f32 %v1229_v13 }
 0x495   : > { %v1231_v19 = vmul.f32 1.442695, %v1206_v51  ;;  %v1233_v53 = vmul.f32 1.442695, %v1207_v20 }
 0x496   : > { %v1184_v57 = vpop.xlane.xlu1 %1183  ;;  %v1187_v59 = vpop.xlane.xlu0 %1186 }
 0x497   : > { %2992 = vpow2.f32 %v1231_v19  ;;  %v1208_v27 = vsub.f32 %v3631_v45, %v1184_v57  ;;  %v1209_v28 = vsub.f32 %v3634_v46, %v1187_v59 }
 0x498   : > { %v3692_v61 = vpop.eup %2982  ;;  %2994 = vpow2.f32 %v1233_v53 }
 0x499   : > { %v1235_v62 = vmul.f32 1.442695, %v1208_v27  ;;  %v1237_v0 = vmul.f32 1.442695, %v1209_v28  ;;  %v1257_v37 = vsel %vm758_vm2, %v3692_v61, 0.0 }
 0x49a   : > { %1258 = vadd.xlane.f32.xlu0 %v1257_v37  ;;  %v1193_v36 = vpop.xlane.xlu0 %1192  ;;  %v739_v30 = vpop.permute.xlu1 %738 }
 0x49b   : > { %2996 = vpow2.f32 %v1235_v62  ;;  %v1211_v1 = vsub.f32 %v3641_v54, %v1193_v36 }
 0x49c   : > { %v3697_v56 = vpop.eup %2984  ;;  %2998 = vpow2.f32 %v1237_v0 }
 0x49d   : > { %v3699_v2 = vpop.eup %2986  ;;  %v1241_v45 = vmul.f32 1.442695, %v1211_v1  ;;  %v1260_v46 = vsel %vm758_vm2, %v3697_v56, 0.0 }
 0x49e   : > { %1261 = vadd.xlane.f32.xlu1 %v1260_v46  ;;  %v1263_v4 = vsel %vm758_vm2, %v3699_v2, 0.0  ;;  %v3735_v63 = vpop.permute.xlu1 %742 }
 0x49f   : > { %3000 = vpow2.f32 %v1241_v45  ;;  %1264 = vadd.xlane.f32.xlu0 %v1263_v4 }
 0x4a0   : > { %v3705_v5 = vpop.eup %2988 }
 0x4a1   : > { %v3707_v8 = vpop.eup %2990  ;;  %v1266_v54 = vsel %vm758_vm2, %v3705_v5, 0.0 }
 0x4a2   : > { %1267 = vadd.xlane.f32.xlu1 %v1266_v54  ;;  %v1269_v14 = vsel %vm758_vm2, %v3707_v8, 0.0 }
 0x4a3   : > { %1270 = vadd.xlane.f32.xlu0 %v1269_v14 }
 0x4a4   : > { %v3713_v58 = vpop.eup %2992 }
 0x4a5   : > { %v3715_v3 = vpop.eup %2994  ;;  %v1272_v17 = vsel %vm758_vm2, %v3713_v58, 0.0 }
 0x4a6   : > { %1273 = vadd.xlane.f32.xlu1 %v1272_v17  ;;  %v1275_v60 = vsel %vm758_vm2, %v3715_v3, 0.0 }
 0x4a7   : > { %1276 = vadd.xlane.f32.xlu0 %v1275_v60 }
 0x4a8   : > { %v3721_v18 = vpop.eup %2996 }
 0x4a9   : > { %v3723_v21 = vpop.eup %2998  ;;  %v1278_v22 = vsel %vm758_vm2, %v3721_v18, 0.0 }
 0x4aa   : > { %1279 = vadd.xlane.f32.xlu1 %v1278_v22  ;;  %v1281_v23 = vsel %vm758_vm2, %v3723_v21, 0.0 }
 0x4ab   : > { %1282 = vadd.xlane.f32.xlu0 %v1281_v23 }
 0x4ac   : > { %v3729_v24 = vpop.eup %3000 }
 0x4ad   : > { %v1287_v26 = vsel %vm758_vm2, %v3729_v24, 0.0 }
 0x4af   : > { %1288 = vadd.xlane.f32.xlu0 %v1287_v26 }
 0x4c5   : > { %748 = vrot.lane.b32.xlu0 %v3556_v52, %s3241_s3 }
 0x4cf   : > { %v1190_v31 = vpop.xlane.xlu1 %1189 }
 0x4d0   : > { %v1210_v32 = vsub.f32 %v3654_v10, %v1190_v31  ;;  %v737_v10 = vpop.permute.xlu0 %736 }
 0x4d2   : > { %v1239_v9 = vmul.f32 1.442695, %v1210_v32 }
 0x4d3   : > { %v1196_v34 = vpop.xlane.xlu1 %1195 }
 0x4d4   : > { %3002 = vpow2.f32 %v1239_v9  ;;  %v1212_v35 = vsub.f32 %v3659_v12, %v1196_v34  ;;  %v1247_v43 = vpop.xlane.xlu0 %1246 }
 0x4d6   : > { %v1243_v38 = vmul.f32 1.442695, %v1212_v35  ;;  %v2934_v35 = vld [vmem:[#allocation7] sm:$0xff]  }
 0x4d7   : > { %v3749_v12 = vpop.permute.xlu1 %744 }
 0x4d8   : > { %3004 = vpow2.f32 %v1243_v38  ;;  %v1253_v44 = vpop.xlane.xlu0 %1252 }
 0x4d9   : > { %3006 = vrcp.f32 %v1247_v43 }
 0x4e1   : > { %v3739_v39 = vpop.eup %3002 }
 0x4e2   : > { %v1284_v40 = vsel %vm758_vm2, %v3739_v39, 0.0 }
 0x4e3   : > { %1285 = vadd.xlane.f32.xlu1 %v1284_v40 }
 0x4e5   : > { %v3743_v41 = vpop.eup %3004 }
 0x4e6   : > { %v1290_v52 = vsel %vm758_vm2, %v3743_v41, 0.0  ;;  %v3007_v13 = vpop.eup %3006 }
 0x4e7   : > { %1291 = vadd.xlane.f32.xlu1 %v1290_v52  ;;  %v1309_v50 = vmul.f32 %v3007_v13, %v3656_v11  ;;  %v2936_v13 = vld [vmem:[#allocation7 + $0x10] sm:$0xff]  }
 0x4f8   : > { %750 = vrot.lane.b32.xlu1 %v3564_v55, %s3241_s3  ;;  %s2445_s3 = sshll.u32 %s505_s21, 4  ;;  %s3952_s3 = int_to_ptr.vmem [resolvable:$true] %s2445_s3 }
 0x4f9   : > { %s3160_s20 = scalar_lea.vmem %s3952_s3, 512 }
 0x4fa   : > { %p3161_p9 = scmp.ne.s32.totalorder %s3952_s3, %s3160_s20 }
 0x4fc   : > { %p3162_p10 = pnand %p3161_p9, %p3360_p5 }
 0x4fe   : > { %p3163_p12 = pneg %p3162_p10 }
 0x508   : > { %v1250_v47 = vpop.xlane.xlu1 %1249 }
 0x509   : > { %3008 = vrcp.f32 %v1250_v47  ;;  %v2935_v47 = vld [vmem:[#allocation7 + $0x8] sm:$0xff]  }
 0x50a   : > { %3010 = vrcp.f32 %v1253_v44 }
 0x50c   : > { %v1256_v48 = vpop.xlane.xlu1 %1255 }
 0x50d   : > { %3012 = vrcp.f32 %v1256_v48 }
 0x516   : > { %v3009_v49 = vpop.eup %3008 }
 0x517   : > { %v1310_v51 = vmul.f32 %v3009_v49, %v3675_v25  ;;  %v3011_v20 = vpop.eup %3010 }
 0x518   : > { %v1311_v53 = vmul.f32 %v3011_v20, %v3665_v15 }
 0x519   : > { %v1325_v19 = vpack.c.bf16 %v1310_v51, %v1309_v50 }
 0x51a   : > { %v3013_v55 = vpop.eup %3012 }
 0x51b   : > { %2762 = vmatmul.mubr.msk.bf16.vlgmr.msra.gmra.mxu1 %vm758_vm2, %v1325_v19  ;;  %v1312_v57 = vmul.f32 %v3013_v55, %v3679_v29 }
 0x51c   : > { %2772 = vmatpush3.bf16.msra.mxu1 %v737_v10  ;;  %2773 = vmatprep.mubr.msk.bf16.mxu1 %vm3240_vm1, %v3238_v16 }
 0x51d   : > { %v1326_v59 = vpack.c.bf16 %v1312_v57, %v1311_v53  ;;  %2783 = vmatprep.subr.bf16.mxu1 %v3238_v16 }
 0x51f   : > { %2768 = vmatmul.mubr.msk.bf16.vlgmr.msra.gmra.mxu0 %vm758_vm2, %v1326_v59 }
 0x520   : > { %2778 = vmatpush3.bf16.msra.mxu0 %v739_v30  ;;  %2779 = vmatprep.mubr.msk.bf16.mxu0 %vm3240_vm1, %v3238_v16 }
 0x521   : > { %2789 = vmatprep.subr.bf16.mxu0 %v3238_v16 }
 0x523   : > { %v1259_v11 = vpop.xlane.xlu0 %1258 }
 0x524   : > { %3014 = vrcp.f32 %v1259_v11 }
 0x527   : > { %v1262_v15 = vpop.xlane.xlu1 %1261 }
 0x528   : > { %3016 = vrcp.f32 %v1262_v15  ;;  %v1265_v25 = vpop.xlane.xlu0 %1264 }
 0x529   : > { %3018 = vrcp.f32 %v1265_v25 }
 0x52b   : > { %v1268_v29 = vpop.xlane.xlu1 %1267 }
 0x52c   : > { %3020 = vrcp.f32 %v1268_v29  ;;  %v1271_v27 = vpop.xlane.xlu0 %1270 }
 0x52d   : > { %3022 = vrcp.f32 %v1271_v27 }
 0x52f   : > { %v1274_v28 = vpop.xlane.xlu1 %1273 }
 0x530   : > { %3024 = vrcp.f32 %v1274_v28  ;;  %v1277_v62 = vpop.xlane.xlu0 %1276 }
 0x531   : > { %3026 = vrcp.f32 %v1277_v62  ;;  %v3015_v0 = vpop.eup %3014 }
 0x532   : > { %v1313_v45 = vmul.f32 %v3015_v0, %v3692_v61 }
 0x533   : > { %v1280_v37 = vpop.xlane.xlu1 %1279 }
 0x534   : > { %3028 = vrcp.f32 %v1280_v37  ;;  %v1283_v1 = vpop.xlane.xlu0 %1282 }
 0x535   : > { %v3017_v36 = vpop.eup %3016  ;;  %3030 = vrcp.f32 %v1283_v1 }
 0x536   : > { %v1314_v46 = vmul.f32 %v3017_v36, %v3697_v56  ;;  %v3019_v4 = vpop.eup %3018 }
 0x537   : > { %v1315_v17 = vmul.f32 %v3019_v4, %v3699_v2 }
 0x538   : > { %v1327_v54 = vpack.c.bf16 %v1314_v46, %v1313_v45  ;;  %v1289_v23 = vpop.xlane.xlu0 %1288 }
 0x539   : > { %v3021_v14 = vpop.eup %3020 }
 0x53a   : > { %2774 = vmatmul.mubr.msk.bf16.vlgmr.msra.gmra.mxu1 %vm758_vm2, %v1327_v54  ;;  %v1316_v60 = vmul.f32 %v3021_v14, %v3705_v5  ;;  %v3023_v22 = vpop.eup %3022 }
 0x53b   : > { %2784 = vmatpush3.bf16.msra.mxu1 %v3735_v63  ;;  %2785 = vmatprep.mubr.msk.bf16.mxu1 %vm3240_vm1, %v3238_v16  ;;  %v1317_v56 = vmul.f32 %v3023_v22, %v3707_v8 }
 0x53c   : > { %v1328_v26 = vpack.c.bf16 %v1316_v60, %v1315_v17  ;;  %2795 = vmatprep.subr.bf16.mxu1 %v3238_v16  ;;  %v749_v31 = vpop.permute.xlu0 %748 }
 0x53d   : > { %v3025_v61 = vpop.eup %3024 }
 0x53e   : > { %2780 = vmatmul.mubr.msk.bf16.vlgmr.msra.gmra.mxu0 %vm758_vm2, %v1328_v26  ;;  %v1318_v30 = vmul.f32 %v3025_v61, %v3713_v58  ;;  %v3027_v2 = vpop.eup %3026 }
 0x53f   : > { %2790 = vmatpush3.bf16.msra.mxu0 %v3749_v12  ;;  %2791 = vmatprep.mubr.msk.bf16.mxu0 %vm3240_vm1, %v3238_v16  ;;  %v1319_v32 = vmul.f32 %v3027_v2, %v3715_v3 }
 0x540   : > { %v1329_v5 = vpack.c.bf16 %v1318_v30, %v1317_v56  ;;  %2801 = vmatprep.subr.bf16.mxu0 %v3238_v16 }
 0x541   : > { %v3029_v63 = vpop.eup %3028 }
 0x542   : > { %2786 = vmatmul.mubr.msk.bf16.vlgmr.msra.gmra.mxu1 %vm758_vm2, %v1329_v5  ;;  %v1320_v9 = vmul.f32 %v3029_v63, %v3721_v18  ;;  %v3031_v18 = vpop.eup %3030 }
 0x543   : > { %2796 = vmatpush3.bf16.msra.mxu1 %v749_v31  ;;  %2797 = vmatprep.mubr.msk.bf16.mxu1 %vm3240_vm1, %v3238_v16  ;;  %v1321_v40 = vmul.f32 %v3031_v18, %v3723_v21  ;;  %v2937_v21 = vld [vmem:[#allocation7 + $0x18] sm:$0xff]  }
 0x544   : > { %v1330_v8 = vpack.c.bf16 %v1320_v9, %v1319_v32  ;;  %2807 = vmatprep.subr.bf16.mxu1 %v2935_v47 }
 0x546   : > { %2792 = vmatmul.mubr.msk.bf16.vlgmr.msra.gmra.mxu0 %vm758_vm2, %v1330_v8 }
 0x547   : > { %2803 = vmatprep.mubr.msk.bf16.mxu0 %vm3240_vm1, %v3238_v16 }
 0x56c   : > { %v1286_v58 = vpop.xlane.xlu1 %1285 }
 0x56d   : > { %3032 = vrcp.f32 %v1286_v58 }
 0x56e   : > { %3034 = vrcp.f32 %v1289_v23 }
 0x570   : > { %v1292_v34 = vpop.xlane.xlu1 %1291 }
 0x571   : > { %3036 = vrcp.f32 %v1292_v34 }
 0x574   : > { %v751_v3 = vpop.permute.xlu1 %750 }
 0x575   : > { %2802 = vmatpush3.bf16.msra.mxu0 %v751_v3 }
 0x576   : > { %2813 = vmatprep.subr.bf16.mxu0 %v2934_v35 }
 0x57a   : > { %v3033_v38 = vpop.eup %3032 }
 0x57b   : > { %v1322_v52 = vmul.f32 %v3033_v38, %v3739_v39  ;;  %v3035_v10 = vpop.eup %3034 }
 0x57c   : > { %v1323_v16 = vmul.f32 %v3035_v10, %v3729_v24 }
 0x57d   : > { %v1331_v43 = vpack.c.bf16 %v1322_v52, %v1321_v40 }
 0x57e   : > { %v3037_v12 = vpop.eup %3036 }
 0x57f   : > { %2798 = vmatmul.mubr.msk.bf16.vlgmr.msra.gmra.mxu1 %vm758_vm2, %v1331_v43  ;;  %v1324_v44 = vmul.f32 %v3037_v12, %v3743_v41 }
 0x580   : > { %2808 = vmatpush3.bf16.msra.mxu1 %v2935_v47 }
 0x581   : > { %v1332_v48 = vpack.c.bf16 %v1324_v44, %v1323_v16  ;;  %2819 = vmatprep.subr.bf16.mxu1 %v2936_v13 }
 0x583   : > { %2804 = vmatmul.mubr.msk.bf16.vlgmr.msra.gmra.mxu0 %vm758_vm2, %v1332_v48 }
 0x584   : > { %2814 = vmatpush3.bf16.msra.mxu0 %v2934_v35 }
 0x585   : > { %2825 = vmatprep.subr.bf16.mxu0 %v2937_v21 }
 0x5db   : > { %v1370_v39 = vpop.f32.mrf.mxu1 }
 0x5dd   : > { %v2763_v49 = vpop.f32.mrf.mxu1 }
 0x5df   : > { %v1373_v50 = vpop.f32.mrf.mxu1  ;;  %v1414_v51 = vpop.f32.mrf.mxu0 }
 0x5e0   : > { %v1685_v20 = vpack.c.bf16 %v1373_v50, %v1370_v39 }
 0x5e1   : > { %v2764_v19 = vpop.f32.mrf.mxu1  ;;  %v2769_v24 = vpop.f32.mrf.mxu0 }
 0x5e2   : > { %2815 = vmatprep.mubr.msk.bf16.mxu0 %vm758_vm2, %v1685_v20  ;;  %v3078_v19 = vld [vmem:[%s3430_s24 + $0x10] sm:$0xff] }
 0x5e3   : > { %v1417_v41 = vpop.f32.mrf.mxu0 }
 0x5e4   : > { %v1686_v55 = vpack.c.bf16 %v1417_v41, %v1414_v51  ;;  %v3079_v41 = vld [vmem:[%s3430_s24] sm:$0xff] }
 0x5e5   : > { %v2770_v53 = vpop.f32.mrf.mxu0 }
 0x5e6   : > { %2816 = vmatmul.mubr.msk.bf16.vlgmr.msra.gmra.mxu0 %vm758_vm2, %v1686_v55 }
 0x5e7   : > { %2826 = vmatpush3.bf16.msra.mxu0 %v2937_v21 }
 0x5fa   : > { %v1458_v57 = vpop.f32.mrf.mxu1 }
 0x5fc   : > { %v2775_v59 = vpop.f32.mrf.mxu1 }
 0x5fe   : > { %v1461_v11 = vpop.f32.mrf.mxu1  ;;  %v1502_v15 = vpop.f32.mrf.mxu0 }
 0x5ff   : > { %v1689_v25 = vpack.c.bf16 %v1461_v11, %v1458_v57  ;;  %v2592_v57 = vld [vmem:[%s4004_s7] ss:$0 sm:$0xff] }
 0x600   : > { %v2776_v29 = vpop.f32.mrf.mxu1  ;;  %v2781_v27 = vpop.f32.mrf.mxu0 }
 0x601   : > { %2809 = vmatprep.mubr.msk.bf16.mxu1 %vm758_vm2, %v1689_v25  ;;  %v3080_v29 = vld [vmem:[%s3430_s24 + $0x18] sm:$0xff] }
 0x602   : > { %v1505_v28 = vpop.f32.mrf.mxu0  ;;  %v1546_v62 = vpop.f32.mrf.mxu1 }
 0x603   : > { %v1690_v0 = vpack.c.bf16 %v1505_v28, %v1502_v15  ;;  %v3081_v28 = vld [vmem:[%s3430_s24 + $0x8] sm:$0xff]  ;;  %s3244_s24 = smov [#allocation8]  }
 0x604   : > { %v2782_v37 = vpop.f32.mrf.mxu0  ;;  %v2787_v36 = vpop.f32.mrf.mxu1  ;;  %s3164_s15 = sshll.u32 %s3244_s24, 4  ;;  %s3165_s15 = int_to_ptr.vmem [resolvable:$false] %s3164_s15 }
 0x605   : > { %2810 = vmatmul.mubr.msk.bf16.vlgmr.msra.gmra.mxu1 %vm758_vm2, %v1690_v0  ;;  %s3166_s26 = scalar_lea.vmem %s3165_s15, 1024  ;;  %p3167_p7 = scmp.lt.s32.totalorder %s3952_s3, %s3165_s15 }
 0x606   : > { %v1549_v1 = vpop.f32.mrf.mxu1  ;;  %v1590_v45 = vpop.f32.mrf.mxu0  ;;  %2820 = vmatpush3.bf16.msra.mxu1 %v2936_v13  ;;  %p3168_p8 = scmp.lt.s32.totalorder %s3166_s26, %s3160_s20 }
 0x607   : > { %v1816_v46 = vpack.c.bf16 %v1549_v1, %v1546_v62 }
 0x608   : > { %v2788_v4 = vpop.f32.mrf.mxu1  ;;  %v2793_v54 = vpop.f32.mrf.mxu0  ;;  %p3169_p11 = por %p3168_p8, %p3167_p7 }
 0x609   : > { %2821 = vmatprep.mubr.msk.bf16.mxu1 %vm758_vm2, %v1816_v46 }
 0x60a   : > { %v1593_v14 = vpop.f32.mrf.mxu0  ;;  %p3170_p0 = pnand %p3169_p11, %p3163_p12 }
 0x60b   : > { %v1817_v17 = vpack.c.bf16 %v1593_v14, %v1590_v45 }
 0x60c   : > { %v2794_v60 = vpop.f32.mrf.mxu0 }
 0x60d   : > { %2822 = vmatmul.mubr.msk.bf16.vlgmr.msra.gmra.mxu1 %vm758_vm2, %v1817_v17 }
 0x60e   : > { %2145 = vmatprep.mubr.bf16.mxu1 %v3237_v33 }
 0x63f   : > { %v1634_v22 = vpop.f32.mrf.mxu1 }
 0x641   : > { %v2799_v23 = vpop.f32.mrf.mxu1 }
 0x643   : > { %v1637_v26 = vpop.f32.mrf.mxu1  ;;  %v1678_v61 = vpop.f32.mrf.mxu0 }
 0x644   : > { %v1886_v56 = vpack.c.bf16 %v1637_v26, %v1634_v22 }
 0x645   : > { %v2800_v30 = vpop.f32.mrf.mxu1  ;;  %v2805_v2 = vpop.f32.mrf.mxu0 }
 0x646   : > { %2827 = vmatprep.mubr.msk.bf16.mxu0 %vm758_vm2, %v1886_v56 }
 0x647   : > { %v1681_v5 = vpop.f32.mrf.mxu0 }
 0x648   : > { %v1887_v63 = vpack.c.bf16 %v1681_v5, %v1678_v61 }
 0x649   : > { %v2806_v31 = vpop.f32.mrf.mxu0 }
 0x64a   : > { %2828 = vmatmul.mubr.msk.bf16.vlgmr.msra.gmra.mxu0 %vm758_vm2, %v1887_v63 }
 0x6a6   : > { %v2817_v58 = vpop.f32.mrf.mxu0 }
 0x6a8   : > { %v1801_v35 = vpop.f32.mrf.mxu0 }
 0x6aa   : > { %v2818_v18 = vpop.f32.mrf.mxu0 }
 0x6ac   : > { %v1804_v52 = vpop.f32.mrf.mxu0 }
 0x6c5   : > { %v2811_v32 = vpop.f32.mrf.mxu1 }
 0x6c6   : > { %v1810_v40 = vadd.f32 %v2817_v58, %v2811_v32 }
 0x6c7   : > { %v1740_v9 = vpop.f32.mrf.mxu1 }
 0x6c8   : > { %v1802_v43 = vadd.f32 %v1801_v35, %v1740_v9  ;;  %v2940_v35 = vld [vmem:[%s4007_s10 + $0x34] ss:$8 sps:$4 sm:$0xff]  }
 0x6c9   : > { %v2812_v8 = vpop.f32.mrf.mxu1  ;;  %2121 = vmatprep.subr.bf16.mxu1 %v2940_v35 }
 0x6ca   : > { %v1813_v44 = vadd.f32 %v2818_v18, %v2812_v8  ;;  %v2943_v18 = vld [vmem:[%s4007_s10 + $0x24] ss:$8 sps:$4 sm:$0xff]  }
 0x6cb   : > { %v1743_v34 = vpop.f32.mrf.mxu1 }
 0x6cc   : > { %v1805_v39 = vadd.f32 %v1804_v52, %v1743_v34  ;;  %v2944_v52 = vld [vmem:[%s4007_s10 + $0x10] ss:$8 sps:$4 sm:$0xff]  }
 0x6cd   : > { %v2823_v3 = vpop.f32.mrf.mxu1 }
 0x6ce   : > { %v1884_v12 = vadd.f32 %v2823_v3, %v1810_v40  ;;  %v2938_v3 = vld [vmem:[%s4007_s10 + $0x30] ss:$8 sps:$4 sm:$0xff]   ;;  %v2946_v40 = vld [vmem:[%s4007_s10 + $0x14] ss:$8 sps:$4 sm:$0xff]  }
 0x6cf   : > { %v1867_v38 = vpop.f32.mrf.mxu1  ;;  %2122 = vmatpush1.bf16.msra.mxu1 %v2938_v3 }
 0x6d0   : > { %v1882_v47 = vadd.f32 %v1867_v38, %v1802_v43  ;;  %v2941_v38 = vld [vmem:[%s4007_s10 + $0x20] ss:$8 sps:$4 sm:$0xff]   ;;  %2123 = vmatprep.subr.bf16.mxu1 %v2943_v18 }
 0x6d1   : > { %v2824_v10 = vpop.f32.mrf.mxu1  ;;  %v2947_v43 = vld [vmem:[%s4007_s10] ss:$8 sps:$4 sm:$0xff]  }
 0x6d2   : > { %v1885_v49 = vadd.f32 %v2824_v10, %v1813_v44  ;;  %v2949_v10 = vld [vmem:[%s4007_s10 + $0x4] ss:$8 sps:$4 sm:$0xff]  }
 0x6d3   : > { %v1870_v13 = vpop.f32.mrf.mxu1  ;;  %2124 = vmatpush1.bf16.msra.mxu1 %v2941_v38 }
 0x6d4   : > { %v1883_v20 = vadd.f32 %v1870_v13, %v1805_v39  ;;  %2125 = vmatprep.subr.bf16.mxu1 %v2946_v40 }
 0x6d7   : > { %2126 = vmatpush1.bf16.msra.mxu1 %v2944_v52 }
 0x6d8   : > { %2127 = vmatprep.subr.bf16.mxu1 %v2949_v10 }
 0x6db   : > { %2128 = vmatpush1.bf16.msra.mxu1 %v2947_v43 }
 0x70a   : > { %v2829_v16 = vpop.f32.mrf.mxu0 }
 0x70b   : > { %v1954_v48 = vadd.f32 %v2829_v16, %v1884_v12 }
 0x70c   : > { %v1937_v21 = vpop.f32.mrf.mxu0 }
 0x70d   : > { %v1952_v50 = vadd.f32 %v1937_v21, %v1882_v47  ;;  %v1958_v24 = vadd.f32 %v3078_v19, %v1954_v48 }
 0x70e   : > { %v2830_v51 = vpop.f32.mrf.mxu0 }
 0x70f   : > { %v1956_v55 = vadd.f32 %v3079_v41, %v1952_v50  ;;  %v1955_v53 = vadd.f32 %v2830_v51, %v1885_v49  ;;  %v3809_v25 = vadd.f32 %v2592_v57, %v1958_v24  ;;  %v2593_v41 = vld [vmem:[%s4005_s8] ss:$0 sm:$0xff] }
 0x710   : > { %v1940_v59 = vpop.f32.mrf.mxu0 }
 0x711   : > { %v3807_v11 = vadd.f32 %v2592_v57, %v1956_v55  ;;  %v1953_v15 = vadd.f32 %v1940_v59, %v1883_v20  ;;  %v1959_v27 = vadd.f32 %v3080_v29, %v1955_v53  ;;  %v1979_v1 = vsel %vm521_vm0, %v3809_v25, 0.0 }
 0x713   : > { %v1957_v62 = vadd.f32 %v3081_v28, %v1953_v15  ;;  %v1973_v0 = vsel %vm521_vm0, %v3807_v11, 0.0  ;;  %v3817_v36 = vadd.f32 %v2592_v57, %v1959_v27  ;;  %v2594_v15 = vld [vmem:[%s4006_s9] ss:$0 sm:$0xff] }
 0x714   : > { %1974 = vadd.xlane.f32.xlu0 %v1973_v0 }
 0x715   : > { %v3815_v37 = vadd.f32 %v2592_v57, %v1957_v62  ;;  %v1982_v46 = vsel %vm521_vm0, %v3817_v36, 0.0 }
 0x717   : > { %v1976_v45 = vsel %vm521_vm0, %v3815_v37, 0.0 }
 0x718   : > { %1980 = vadd.xlane.f32.xlu0 %v1979_v1  ;;  %1977 = vadd.xlane.f32.xlu1 %v1976_v45 }
 0x71c   : > { %1983 = vadd.xlane.f32.xlu0 %v1982_v46 }
 0x79d   : > { %v1975_v4 = vpop.xlane.xlu0 %1974 }
 0x79e   : > { %v1985_v54 = vmul.f32 0.015625, %v1975_v4 }
 0x7a0   : > { %v1989_v14 = vsub.f32 %v3807_v11, %v1985_v54 }
 0x7a1   : > { %v1981_v17 = vpop.xlane.xlu0 %1980  ;;  %v1978_v60 = vpop.xlane.xlu1 %1977 }
 0x7a2   : > { %v1987_v22 = vmul.f32 0.015625, %v1981_v17  ;;  %v1986_v23 = vmul.f32 0.015625, %v1978_v60  ;;  %v1993_v26 = vmul.f32 %v1989_v14, %v1989_v14  ;;  %v2950_v60 = vld [vmem:[%s4009_s12 + $0x78] sm:$0xff]  }
 0x7a3   : > { %2683 = vmatprep.subr.bf16.mxu0 %v2950_v60 }
 0x7a4   : > { %v1991_v61 = vsub.f32 %v3809_v25, %v1987_v22  ;;  %v1990_v56 = vsub.f32 %v3815_v37, %v1986_v23  ;;  %v1997_v30 = vsel %vm521_vm0, %v1993_v26, 0.0  ;;  %v2951_v22 = vld [vmem:[%s4009_s12 + $0x38] sm:$0xff]   ;;  %v2952_v23 = vld [vmem:[%s4009_s12 + $0x70] sm:$0xff]   ;;  %v2954_v26 = vld [vmem:[%s4009_s12 + $0x68] sm:$0xff]  }
 0x7a5   : > { %1998 = vadd.xlane.f32.xlu0 %v1997_v30  ;;  %v1984_v2 = vpop.xlane.xlu0 %1983  ;;  %2684 = vmatpush3.bf16.msra.mxu0 %v2951_v22  ;;  %v2957_v30 = vld [vmem:[%s4009_s12 + $0x20] sm:$0xff]  }
 0x7a6   : > { %v1988_v5 = vmul.f32 0.015625, %v1984_v2  ;;  %v1995_v63 = vmul.f32 %v1991_v61, %v1991_v61  ;;  %v1994_v31 = vmul.f32 %v1990_v56, %v1990_v56  ;;  %2685 = vmatprep.subr.bf16.mxu0 %v2952_v23  ;;  %v2958_v2 = vld [vmem:[%s4009_s12 + $0x58] sm:$0xff]  }
 0x7a8   : > { %v1992_v32 = vsub.f32 %v3817_v36, %v1988_v5  ;;  %v2003_v9 = vsel %vm521_vm0, %v1995_v63, 0.0  ;;  %v2000_v8 = vsel %vm521_vm0, %v1994_v31, 0.0  ;;  %v2959_v5 = vld [vmem:[%s4009_s12 + $0x18] sm:$0xff]   ;;  %v2960_v63 = vld [vmem:[%s4009_s12 + $0x50] sm:$0xff]  }
 0x7a9   : > { %2004 = vadd.xlane.f32.xlu0 %v2003_v9  ;;  %2001 = vadd.xlane.f32.xlu1 %v2000_v8  ;;  %v2961_v31 = vld [vmem:[%s4009_s12 + $0x10] sm:$0xff]   ;;  %v2963_v9 = vld [vmem:[%s4009_s12 + $0x8] sm:$0xff]   ;;  %v2964_v8 = vld [vmem:[%s4009_s12 + $0x40] sm:$0xff]  }
 0x7aa   : > { %v1996_v58 = vmul.f32 %v1992_v32, %v1992_v32 }
 0x7ac   : > { %v2006_v34 = vsel %vm521_vm0, %v1996_v58, 0.0  ;;  %v2965_v58 = vld [vmem:[%s4009_s12] sm:$0xff]  }
 0x7ad   : > { %2007 = vadd.xlane.f32.xlu1 %v2006_v34  ;;  %v2055_v34 = vld [vmem:[%s4008_s11] sm:$0x3] }
 0x7ae   : > { %v2060_v35 = vrot.slane %v2055_v34, %v609_v7  ;;  %v2064_v3 = vrot.slane %v2055_v34, %v613_v42 }
 0x82e   : > { %v1999_v12 = vpop.xlane.xlu0 %1998 }
 0x82f   : > { %v2009_v16 = vmul.f32 0.015625, %v1999_v12 }
 0x831   : > { %v2013_v44 = vadd.f32 1e-05, %v2009_v16 }
 0x832   : > { %v2005_v47 = vpop.xlane.xlu0 %2004  ;;  %v2002_v48 = vpop.xlane.xlu1 %2001 }
 0x833   : > { %3038 = vrsqrt.f32 %v2013_v44  ;;  %v2011_v13 = vmul.f32 0.015625, %v2005_v47  ;;  %v2010_v21 = vmul.f32 0.015625, %v2002_v48 }
 0x835   : > { %v2014_v39 = vadd.f32 1e-05, %v2010_v21  ;;  %v2015_v49 = vadd.f32 1e-05, %v2011_v13 }
 0x836   : > { %v2008_v50 = vpop.xlane.xlu1 %2007 }
 0x837   : > { %v2012_v51 = vmul.f32 0.015625, %v2008_v50  ;;  %3040 = vrsqrt.f32 %v2014_v39 }
 0x838   : > { %3042 = vrsqrt.f32 %v2015_v49 }
 0x839   : > { %v2016_v20 = vadd.f32 1e-05, %v2012_v51 }
 0x83b   : > { %3044 = vrsqrt.f32 %v2016_v20 }
 0x840   : > { %v3039_v19 = vpop.eup %3038 }
 0x841   : > { %v2021_v24 = vmul.f32 %v3039_v19, %v1989_v14 }
 0x843   : > { %v2031_v57 = vmul.f32 %v2593_v41, %v2021_v24 }
 0x844   : > { %v3041_v55 = vpop.eup %3040 }
 0x845   : > { %v2022_v53 = vmul.f32 %v3041_v55, %v1990_v56  ;;  %v3043_v59 = vpop.eup %3042  ;;  %v2041_v62 = vadd.f32 %v2594_v15, %v2031_v57  ;;  %v2956_v56 = vld [vmem:[%s4009_s12 + $0x60] sm:$0xff]  }
 0x846   : > { %v2023_v1 = vmul.f32 %v3043_v59, %v1991_v61  ;;  %v2955_v61 = vld [vmem:[%s4009_s12 + $0x28] sm:$0xff]  }
 0x847   : > { %v2032_v27 = vmul.f32 %v2593_v41, %v2022_v53 }
 0x848   : > { %v3045_v29 = vpop.eup %3044  ;;  %v2033_v4 = vmul.f32 %v2593_v41, %v2023_v1 }
 0x849   : > { %v2024_v28 = vmul.f32 %v3045_v29, %v1992_v32  ;;  %v2042_v0 = vadd.f32 %v2594_v15, %v2032_v27  ;;  %v2962_v32 = vld [vmem:[%s4009_s12 + $0x48] sm:$0xff]  }
 0x84a   : > { %v2043_v14 = vadd.f32 %v2594_v15, %v2033_v4 }
 0x84b   : > { %v2045_v45 = vpack.c.bf16 %v2042_v0, %v2041_v62  ;;  %v2034_v46 = vmul.f32 %v2593_v41, %v2024_v28 }
 0x84d   : > { %2603 = vmatmul.mubr.msk.bf16.vlgmr.msra.gmra.mxu1 %vm521_vm0, %v2045_v45  ;;  %v2044_v54 = vadd.f32 %v2594_v15, %v2034_v46 }
 0x84e   : > { %2155 = vmatprep.mubr.bf16.mxu1 %v3237_v33  ;;  %v2953_v33 = vld [vmem:[%s4009_s12 + $0x30] sm:$0xff]  }
 0x84f   : > { %v2046_v17 = vpack.c.bf16 %v2044_v54, %v2043_v14  ;;  %2686 = vmatpush3.bf16.msra.mxu0 %v2953_v33 }
 0x850   : > { %2687 = vmatprep.subr.bf16.mxu0 %v2954_v26 }
 0x853   : > { %2688 = vmatpush3.bf16.msra.mxu0 %v2955_v61 }
 0x854   : > { %2689 = vmatprep.subr.bf16.mxu0 %v2956_v56 }
 0x855   : > { %2604 = vmatmul.mubr.msk.bf16.gmra.mxu1 %vm521_vm0, %v2046_v17 }
 0x857   : > { %2690 = vmatpush3.bf16.msra.mxu0 %v2957_v30 }
 0x858   : > { %2691 = vmatprep.subr.bf16.mxu0 %v2958_v2 }
 0x85b   : > { %2692 = vmatpush3.bf16.msra.mxu0 %v2959_v5 }
 0x85c   : > { %2693 = vmatprep.subr.bf16.mxu0 %v2960_v63 }
 0x85f   : > { %2694 = vmatpush3.bf16.msra.mxu0 %v2961_v31 }
 0x860   : > { %2695 = vmatprep.subr.bf16.mxu0 %v2962_v32 }
 0x863   : > { %2696 = vmatpush3.bf16.msra.mxu0 %v2963_v9 }
 0x864   : > { %2697 = vmatprep.subr.bf16.mxu0 %v2964_v8 }
 0x867   : > { %2698 = vmatpush3.bf16.msra.mxu0 %v2965_v58 }
 0x90d   : > { %v2147_v18 = vpop.f32.mrf.mxu1 }
 0x90e   : > { %v3921_v38 = vadd.f32 %v2147_v18, %v2060_v35 }
 0x90f   : > { %v2149_v40 = vpop.f32.mrf.mxu1 }
 0x910   : > { %v2605_v52 = vmul.f32 -1.702, %v3921_v38  ;;  %v3924_v10 = vadd.f32 %v2149_v40, %v2064_v3 }
 0x911   : > { %v2151_v43 = vpop.f32.mrf.mxu1 }
 0x912   : > { %v2182_v12 = vmul.f32 1.442695, %v2605_v52  ;;  %v2606_v16 = vmul.f32 -1.702, %v3924_v10  ;;  %v2152_v44 = vadd.f32 %v2151_v43, %v2060_v35 }
 0x913   : > { %v2153_v47 = vpop.f32.mrf.mxu1 }
 0x914   : > { %v2184_v48 = vmul.f32 1.442695, %v2606_v16  ;;  %v2607_v13 = vmul.f32 -1.702, %v2152_v44  ;;  %v2154_v7 = vadd.f32 %v2153_v47, %v2064_v3  ;;  %3046 = vpow2.f32 %v2182_v12 }
 0x915   : > { %v2157_v6 = vpop.f32.mrf.mxu1 }
 0x916   : > { %3048 = vpow2.f32 %v2184_v48  ;;  %v2186_v42 = vmul.f32 1.442695, %v2607_v13  ;;  %v2608_v21 = vmul.f32 -1.702, %v2154_v7  ;;  %v3927_v39 = vadd.f32 %v2157_v6, %v2060_v35  ;;  %v2629_v13 = vld [vmem:[%s4010_s13] ss:$0 sm:$0xff] }
 0x917   : > { %v2159_v49 = vpop.f32.mrf.mxu1 }
 0x918   : > { %3050 = vpow2.f32 %v2186_v42  ;;  %v2188_v50 = vmul.f32 1.442695, %v2608_v21  ;;  %v2609_v51 = vmul.f32 -1.702, %v3927_v39  ;;  %v2160_v20 = vadd.f32 %v2159_v49, %v2064_v3 }
 0x919   : > { %v2161_v19 = vpop.f32.mrf.mxu1 }
 0x91a   : > { %3052 = vpow2.f32 %v2188_v50  ;;  %v2190_v24 = vmul.f32 1.442695, %v2609_v51  ;;  %v2610_v41 = vmul.f32 -1.702, %v2160_v20  ;;  %v2162_v55 = vadd.f32 %v2161_v19, %v2060_v35 }
 0x91b   : > { %v2163_v53 = vpop.f32.mrf.mxu1 }
 0x91c   : > { %v2192_v57 = vmul.f32 1.442695, %v2610_v41  ;;  %v2611_v59 = vmul.f32 -1.702, %v2162_v55  ;;  %v2164_v15 = vadd.f32 %v2163_v53, %v2064_v3  ;;  %3054 = vpow2.f32 %v2190_v24 }
 0x91e   : > { %3056 = vpow2.f32 %v2192_v57  ;;  %v2194_v29 = vmul.f32 1.442695, %v2611_v59  ;;  %v2612_v27 = vmul.f32 -1.702, %v2164_v15 }
 0x920   : > { %3058 = vpow2.f32 %v2194_v29  ;;  %v2196_v28 = vmul.f32 1.442695, %v2612_v27 }
 0x921   : > { %v3047_v62 = vpop.eup %3046 }
 0x922   : > { %3060 = vpow2.f32 %v2196_v28  ;;  %v2198_v46 = vadd.f32 1.0, %v3047_v62 }
 0x923   : > { %v3049_v0 = vpop.eup %3048 }
 0x924   : > { %v2199_v1 = vadd.f32 1.0, %v3049_v0 }
 0x925   : > { %v3051_v45 = vpop.eup %3050 }
 0x926   : > { %v2200_v4 = vadd.f32 1.0, %v3051_v45  ;;  %3062 = vrcp.f32 %v2199_v1 }
 0x927   : > { %v3053_v54 = vpop.eup %3052 }
 0x928   : > { %3064 = vrcp.f32 %v2200_v4  ;;  %v2201_v14 = vadd.f32 1.0, %v3053_v54 }
 0x929   : > { %3066 = vrcp.f32 %v2198_v46  ;;  %v3055_v17 = vpop.eup %3054 }
 0x92a   : > { %3068 = vrcp.f32 %v2201_v14  ;;  %v2202_v33 = vadd.f32 1.0, %v3055_v17 }
 0x92b   : > { %v3057_v60 = vpop.eup %3056 }
 0x92c   : > { %v2203_v22 = vadd.f32 1.0, %v3057_v60 }
 0x92d   : > { %v3059_v23 = vpop.eup %3058 }
 0x92e   : > { %v2204_v26 = vadd.f32 1.0, %v3059_v23  ;;  %3070 = vrcp.f32 %v2203_v22 }
 0x92f   : > { %v3061_v61 = vpop.eup %3060 }
 0x930   : > { %3072 = vrcp.f32 %v2204_v26  ;;  %v2205_v56 = vadd.f32 1.0, %v3061_v61 }
 0x931   : > { %3074 = vrcp.f32 %v2202_v33 }
 0x932   : > { %3076 = vrcp.f32 %v2205_v56 }
 0x933   : > { %v3063_v30 = vpop.eup %3062 }
 0x934   : > { %v2223_v32 = vmul.f32 %v3063_v30, %v3924_v10 }
 0x935   : > { %v3065_v2 = vpop.eup %3064 }
 0x936   : > { %v3067_v5 = vpop.eup %3066  ;;  %v2224_v31 = vmul.f32 %v3065_v2, %v2152_v44 }
 0x937   : > { %v3069_v63 = vpop.eup %3068  ;;  %v2222_v8 = vmul.f32 %v3067_v5, %v3921_v38 }
 0x938   : > { %v2225_v9 = vmul.f32 %v3069_v63, %v2154_v7 }
 0x939   : > { %v2230_v34 = vpack.c.bf16 %v2224_v31, %v2222_v8 }
 0x93a   : > { %v2231_v58 = vpack.c.bf16 %v2225_v9, %v2223_v32 }
 0x93b   : > { %v3071_v35 = vpop.eup %3070 }
 0x93c   : > { %2394 = vmatprep.mubr.bf16.mxu0 %v2231_v58  ;;  %v2227_v43 = vmul.f32 %v3071_v35, %v2160_v20 }
 0x93d   : > { %v3073_v3 = vpop.eup %3072  ;;  %2395 = vmatmul.mubr.bf16.vlgmr.msra.gmra.mxu0 %v2230_v34 }
 0x93e   : > { %v3075_v18 = vpop.eup %3074  ;;  %v2228_v52 = vmul.f32 %v3073_v3, %v2162_v55 }
 0x93f   : > { %v3077_v40 = vpop.eup %3076  ;;  %v2226_v16 = vmul.f32 %v3075_v18, %v3927_v39 }
 0x940   : > { %v2229_v12 = vmul.f32 %v3077_v40, %v2164_v15 }
 0x941   : > { %v2232_v10 = vpack.c.bf16 %v2228_v52, %v2226_v16 }
 0x942   : > { %v2233_v44 = vpack.c.bf16 %v2229_v12, %v2227_v43 }
 0x944   : > { %2402 = vmatprep.mubr.bf16.mxu0 %v2233_v44 }
 0x945   : > { %2403 = vmatmul.mubr.bf16.gmra.mxu0 %v2232_v10 }
 0x9fd   : > { %v2699_v38 = vpop.f32.mrf.mxu0 }
 0x9ff   : > { %v2700_v47 = vpop.f32.mrf.mxu0 }
 0xa00   : > { %v2701_v48 = vadd.f32 %v2700_v47, %v2699_v38 }
 0xa01   : > { %v2702_v7 = vpop.f32.mrf.mxu0 }
 0xa02   : > { %v2411_v6 = vadd.f32 %v2701_v48, %v3807_v11 }
 0xa03   : > { %v2703_v42 = vpop.f32.mrf.mxu0 }
 0xa04   : > { %v2422_v21 = vadd.f32 %v2629_v13, %v2411_v6  ;;  %v2704_v39 = vadd.f32 %v2703_v42, %v2702_v7 }
 0xa05   : > { %v2705_v49 = vpop.f32.mrf.mxu0 }
 0xa06   : > { %2426 = vst.msk [vmem:[%s505_s21] sm:$0xff] %vm521_vm0, %v2422_v21  ;;  %v2412_v50 = vadd.f32 %v2704_v39, %v3815_v37 }
 0xa07   : > { %v2706_v51 = vpop.f32.mrf.mxu0 }
 0xa08   : > { %v2423_v20 = vadd.f32 %v2629_v13, %v2412_v50  ;;  %v2707_v19 = vadd.f32 %v2706_v51, %v2705_v49 }
 0xa09   : > { %v2708_v24 = vpop.f32.mrf.mxu0 }
 0xa0a   : > { %2427 = vst.msk [vmem:[%s505_s21 + $0x8] sm:$0xff] %vm521_vm0, %v2423_v20  ;;  %v2413_v11 = vadd.f32 %v2707_v19, %v3809_v25 }
 0xa0b   : > { %v2709_v41 = vpop.f32.mrf.mxu0 }
 0xa0c   : > { %v2424_v55 = vadd.f32 %v2629_v13, %v2413_v11  ;;  %v2710_v53 = vadd.f32 %v2709_v41, %v2708_v24 }
 0xa0e   : > { %2428 = vst.msk [vmem:[%s505_s21 + $0x10] sm:$0xff] %vm521_vm0, %v2424_v55  ;;  %v2414_v57 = vadd.f32 %v2710_v53, %v3817_v36 }
 0xa10   : > { %v2425_v25 = vadd.f32 %v2629_v13, %v2414_v57 }
 0xa12   : > { %2429 = vst.msk [vmem:[%s505_s21 + $0x18] sm:$0xff] %vm521_vm0, %v2425_v25 }
 0xa13   : > { %3173 = shalt.err (!%p3170_p0)
}
 0xa14   : > { %s3174_s19 = scalar_lea.hbm %s3950_s25, 512  ;;  %s3178_s21 = scalar_lea.hbm %s4011_s14, 1024 }
 0xa15   : > { %p3175_p3 = scmp.ne.s32.totalorder %s3950_s25, %s3174_s19  ;;  %p3179_p4 = scmp.lt.s32.totalorder %s3950_s25, %s4011_s14 }
 0xa16   : > { %p3180_p13 = scmp.lt.s32.totalorder %s3178_s21, %s3174_s19 }
 0xa17   : > { %p3176_p1 = pnand %p3175_p3, %p3360_p5 }
 0xa18   : > { %p3181_p9 = por %p3180_p13, %p3179_p4 }
 0xa19   : > { %p3177_p2 = pneg %p3176_p1 }
 0xa1b   : > { %p3182_p10 = pnand %p3181_p9, %p3177_p2 }
 0xa1d   : > { %3185 = shalt.err (!%p3182_p10)
}
 0xa1e   : > { %s3245_s22 = smov 128   ;;  %s3246_s20 = smov 8  }
 0xa1f   : > { %2851 = dma.vmem_to_hbm [thread:$0]  (%p3360_p5), %s3952_s3, 512, %s3950_s25, %s3957_s17, %s3245_s22, %s3245_s22, %s3246_s20  }
 0xa20 PF: > { %s4028_s24 = sld [smem:[#allocation12_spill]]  ;;  %p2873_p12 = scmp.ge.s32.totalorder %s3228_s16, 2 }
 0xa22   : > { %p2864_p7 = pnand %p2873_p12, %p3364_p6 }
 0xa24   : > { %p2865_p8 = pneg %p2864_p7 }
 0xa26   : > { %s2460_s26 = sand.u32 1, %s4028_s24  }
 0xa27   : > { %s2461_s19 = scalar_lea.sflag [#allocation4], %s2460_s26 }
 0xa28   : > { %3211 = dma.done.wait (%p2865_p8), %s2461_s19, 512  }
 0xa29   : > { %3213 = vsyncadd (%p2865_p8), %s2461_s19, 4294966784  ;;  %s4030_s16 = sld [smem:[#allocation14_spill]]  ;;  %s4033_s29 = smov %s3220_s30 }
 0xa2a   : > { %s4031_s27 = sld [smem:[#allocation13_spill]] }
 0xa2b   : > { %s4032_s15 = sld [smem:[#allocation15_spill]] }
 0xa2f   : > { %p26_p11 = scmp.ge.s32.totalorder %s4030_s16, 4  }
 0xa30   : > { %s4034_s30 = smov %s4031_s27 }
 0xa31   :  { %28 = sbr.rel (!%p26_p11) target bundleno = 7 (0x7), region = 127 }
 0xa36   :  { %2466 = vsyncpa [#allocation3], 1 }
 0xa37   :  { %2468 = vsyncpa [#allocation3 + $0x1], 1 }
 0xa38   :  { %2469 = vsyncpa [#allocation6], 1 }
 0xa39   :  { %2470 = vsyncpa [#allocation4], 1 }
 0xa3a   :  { %2472 = vsyncpa [#allocation4 + $0x1], 1 }

// kernel: tpu_custom_call.1
= control target key start
LH: loop header
LB: loop body
LE: loop exit
PB: predicated region body
PF: predicated region fallthrough
CT: control target
= control target key end

     0   :  { %s3997_s0 = inlined_call_operand.vmem [shape: f32[4,16,64], index: 0, kind: input, shape index: {}]   ;;  %s3998_s1 = inlined_call_operand.hbm [shape: f32[16,16], index: 1, kind: input, shape index: {}]   ;;  %s3999_s2 = inlined_call_operand.vmem [shape: f32[1,64], index: 2, kind: input, shape index: {}]   ;;  %s4000_s3 = inlined_call_operand.hbm [shape: f32[1,64], index: 3, kind: input, shape index: {}]   ;;  %s4001_s4 = inlined_call_operand.vmem [shape: bf16[64,192], index: 4, kind: input, shape index: {}]   ;;  %s4002_s5 = inlined_call_operand.vmem [shape: f32[1,192], index: 5, kind: input, shape index: {}]   ;;  %s4003_s6 = inlined_call_operand.hbm [shape: bf16[4,16,64], index: 6, kind: input, shape index: {}]   ;;  %s4004_s7 = inlined_call_operand.vmem [shape: f32[1,64], index: 7, kind: input, shape index: {}]   ;;  %s4005_s8 = inlined_call_operand.vmem [shape: f32[1,64], index: 8, kind: input, shape index: {}]   ;;  %s4006_s9 = inlined_call_operand.vmem [shape: f32[1,64], index: 9, kind: input, shape index: {}]   ;;  %s4007_s10 = inlined_call_operand.vmem [shape: bf16[64,256], index: 10, kind: input, shape index: {}]   ;;  %s4008_s11 = inlined_call_operand.vmem [shape: f32[1,256], index: 11, kind: input, shape index: {}]   ;;  %s4009_s12 = inlined_call_operand.vmem [shape: bf16[256,64], index: 12, kind: input, shape index: {}]   ;;  %s4010_s13 = inlined_call_operand.vmem [shape: f32[1,64], index: 13, kind: input, shape index: {}]   ;;  %s4011_s14 = inlined_call_operand.hbm [shape: f32[4,16,64], index: 14, kind: output, shape index: {}]  }
   0x1   :  { %4017 = sst [smem:[#allocation17_spill]] %s4000_s3 }
   0x2   :  { %19 = vsyncpa [#allocation3], 0 }
   0x3   :  { %20 = vsyncpa [#allocation6], 0 }
   0x4   :  { %21 = vsyncpa [#allocation4], 0 }
   0x5   :  { %23 = vsyncpa [#allocation4 + $0x1], 0  ;;  %s3322_s29 = smov 0   ;;  %s3324_s30 = smov 0  }
   0x6   :  { %s3326_s15 = smov 0   ;;  %s3328_s16 = smov 0  }
   0x7 LB: > { %4018 = sst [smem:[#allocation12_spill]] %s3216_s29  ;;  %s3343_s17 = sadd.s32 4294967295, %s3228_s16   ;;  %s3228_s16 = sphi %s3328_s16, %s4030_s16   ;;  %s3224_s15 = sphi %s3326_s15, %s4032_s15   ;;  %s3220_s30 = sphi %s3324_s30, %s4034_s30   ;;  %s3216_s29 = sphi %s3322_s29, %s4033_s29  }
   0x8   : > { %4019 = sst [smem:[#allocation13_spill]] %s3224_s15  ;;  %s2538_s18 = sadd.s32 4294967294, %s3228_s16  }
   0x9   : > { %s3347_s19 = sadd.s32 1, %s3228_s16   ;;  %s335_s20 = sadd.s32 1, %s3224_s15 }
   0xa   : > { %4020 = sst [smem:[#allocation14_spill]] %s3347_s19  ;;  %s332_s21 = ssub.s32 %s3228_s16, %s3347_s19 }
   0xb   : > { %p345_p0 = scmp.ne.s32.totalorder %s3224_s15, %s3220_s30  ;;  %p333_p1 = scmp.eq.s32.totalorder %s332_s21, 0 }
   0xc   : > { %p346_p2 = scmp.eq.s32.totalorder %s3343_s17, 1  ;;  %p351_p3 = scmp.ne.s32.totalorder %s3220_s30, %s3216_s29 }
   0xd   : > { %p352_p4 = scmp.eq.s32.totalorder %s2538_s18, 1  ;;  %p2539_p7 = scmp.ge.s32.totalorder %s3228_s16, 1 }
   0xe   : > { %s3358_s22 = scalar_select %p333_p1, %s3224_s15, %s335_s20  }
   0xf   : > { %p3360_p5 = por %p346_p2, %p345_p0  ;;  %p3364_p6 = por %p352_p4, %p351_p3 }
  0x10   : > { %4021 = sst [smem:[#allocation15_spill]] %s3358_s22  ;;  %p359_p8 = scmp.lt.s32.totalorder %s3228_s16, 3 }
  0x11   : > { %s4023_s24 = scalar_select %p3364_p6, 1, 0 }
  0x12   : > { %p2867_p9 = scmp.eq.s32.totalorder %s3343_s17, 0  ;;  %p3371_p10 = pnand %p2539_p7, %p359_p8 }
  0x13   : > { %4024 = sst [smem:[#allocation16_spill]] %s4023_s24  ;;  %s3230_s26 = smov [#allocation5]  }
  0x14   : > { %s388_s27 = sshll.u32 %s3230_s26, 4  ;;  %p2853_p11 = pneg %p3371_p10  ;;  %s389_s27 = int_to_ptr.vmem [resolvable:$true] %s388_s27 }
  0x15   : > { %s3231_s28 = smov [#allocation2]   ;;  %s3232_s21 = smov [#allocation7]  }
  0x16   : > { %s371_s18 = sshll.u32 %s3231_s28, 4  ;;  %p3379_p12 = pnand %p2867_p9, %p2853_p11  ;;  %s3383_s18 = int_to_ptr.vmem [resolvable:$true] %s371_s18 }
  0x17   : > { %s404_s22 = sshll.u32 %s3232_s21, 4  ;;  %s3093_s15 = scalar_lea.vmem %s389_s27, 16  ;;  %s405_s22 = int_to_ptr.vmem [resolvable:$true] %s404_s22 }
  0x18   : > { %p3084_p13 = pneg %p3379_p12  ;;  %p3094_p0 = scmp.ne.s32.totalorder %s389_s27, %s3093_s15 }
  0x19   : > { %s3100_s26 = scalar_lea.vmem %s389_s27, 32  ;;  %p3101_p3 = scmp.lt.s32.totalorder %s389_s27, %s389_s27 }
  0x1a   : > { %p3096_p1 = pnand %p3094_p0, %p3084_p13  ;;  %p3102_p4 = scmp.lt.s32.totalorder %s3100_s26, %s3093_s15 }
  0x1c   : > { %p3097_p2 = pneg %p3096_p1  ;;  %p3103_p7 = por %p3102_p4, %p3101_p3 }
  0x1e   : > { %p3104_p8 = pnand %p3103_p7, %p3097_p2 }
  0x20   : > { %3107 = shalt.err (!%p3104_p8)
}
  0x21   : > { %s4027_s3 = sld [smem:[#allocation17_spill]]  ;;  %s3119_s21 = scalar_lea.vmem %s3383_s18, 256 }
  0x22   : > { %p3120_p11 = scmp.ne.s32.totalorder %s3383_s18, %s3119_s21  ;;  %p3127_p3 = scmp.lt.s32.totalorder %s3383_s18, %s3383_s18 }
  0x23   : > { %p3128_p2 = scmp.lt.s32.totalorder %s3119_s21, %s3119_s21 }
  0x24   : > { %p3122_p0 = pnand %p3120_p11, %p3084_p13 }
  0x25   : > { %p3129_p4 = por %p3128_p2, %p3127_p3 }
  0x26   : > { %p3123_p1 = pneg %p3122_p0 }
  0x27   : > { %2859 = dma.hbm_to_vmem [thread:$0]  (!%p3379_p12), %s4027_s3, 16, %s389_s27, [#allocation6]  }
  0x28   : > { %p3130_p7 = pnand %p3129_p4, %p3123_p1 }
  0x2a   : > { %3133 = shalt.err (!%p3130_p7)
}
  0x2b   : > { %s3233_s15 = smov 128   ;;  %s3234_s19 = smov 8  }
  0x2c   : > { %2856 = dma.hbm_to_vmem [thread:$0]  (!%p3379_p12), %s3998_s1, 256, %s3383_s18, [#allocation3], %s3233_s15, %s3233_s15, %s3234_s19  }
  0x2d   : > { %s3145_s28 = scalar_lea.vmem %s405_s22, 512  ;;  %p3153_p3 = scmp.lt.s32.totalorder %s405_s22, %s405_s22 }
  0x2e   : > { %p3146_p8 = scmp.ne.s32.totalorder %s405_s22, %s3145_s28  ;;  %p3154_p1 = scmp.lt.s32.totalorder %s3145_s28, %s3145_s28 }
  0x30   : > { %p3148_p11 = pnand %p3146_p8, %p3084_p13  ;;  %p3155_p2 = por %p3154_p1, %p3153_p3 }
  0x32   : > { %p3149_p0 = pneg %p3148_p11 }
  0x34   : > { %p3156_p4 = pnand %p3155_p2, %p3149_p0 }
  0x36   : > { %3159 = shalt.err (!%p3156_p4)
}
  0x37   : > { %s3235_s21 = smov 64   ;;  %s3236_s3 = smov 4  }
  0x38   : > { %2862 = dma.hbm_to_vmem [thread:$0]  (!%p3379_p12), %s4003_s6, 512, %s405_s22, [#allocation6], %s3235_s21, %s3235_s21, %s3236_s3  }
  0x39   : > { %451 = sbr.rel (%p3371_p10) target bundleno = 2592 (0xa20), region = 76 }
  0x3e   : > { %3203 = dma.done.wait (%p2867_p9), [#allocation3], 256  }
  0x3f   : > { %3205 = vsyncadd (%p2867_p9), [#allocation3], 4294967040 }
  0x40   : > { %3207 = dma.done.wait (%p2867_p9), [#allocation6], 528  }
  0x41   : > { %3209 = vsyncadd (%p2867_p9), [#allocation6], 4294966768  ;;  %s2549_s18 = sshll.u32 %s3343_s17, 1  ;;  %vm521_vm0 = vcmask 523264   ;;  %v2922_v28 = vld [vmem:[%s4001_s4 + $0x34] ss:$8 sps:$4 sm:$0xff]  }
  0x42   : > { %p507_p13 = scmp.lt.s32.totalorder %s2549_s18, 3  ;;  %v2924_v29 = vld [vmem:[%s4001_s4 + $0x30] ss:$8 sps:$4 sm:$0xff]   ;;  %v2925_v30 = vld [vmem:[%s4001_s4 + $0x24] ss:$8 sps:$4 sm:$0xff]   ;;  %671 = vmatprep.subr.bf16.mxu0 %v2922_v28  ;;  %2831 = vmatprep.subr.bf16.mxu1 %v2922_v28  ;;  %v3237_v33 = vmov 0  }
  0x43   : > { %672 = vmatpush1.bf16.msra.mxu0 %v2924_v29  ;;  %2835 = vmatpush1.bf16.msra.mxu1 %v2924_v29  ;;  %v2927_v31 = vld [vmem:[%s4001_s4 + $0x20] ss:$8 sps:$4 sm:$0xff]   ;;  %v2928_v32 = vld [vmem:[%s4001_s4 + $0x14] ss:$8 sps:$4 sm:$0xff]   ;;  %v2930_v34 = vld [vmem:[%s4001_s4 + $0x10] ss:$8 sps:$4 sm:$0xff]  }
  0x44   : > { %s4036_s18 = smov (!%p507_p13, %s2549_s18), 3  ;;  %673 = vmatprep.subr.bf16.mxu0 %v2925_v30  ;;  %2832 = vmatprep.subr.bf16.mxu1 %v2925_v30  ;;  %v2931_v35 = vld [vmem:[%s4001_s4 + $0x4] ss:$8 sps:$4 sm:$0xff]   ;;  %v2933_v36 = vld [vmem:[%s4001_s4] ss:$8 sps:$4 sm:$0xff]   ;;  %vm3240_vm1 = vmmov 0  }
  0x45   : > { %s2636_s3 = sshll.u32 %s4036_s18, 4  ;;  %695 = vmatprep.mubr.bf16.mxu0 %v3237_v33  ;;  %705 = vmatprep.mubr.bf16.mxu1 %v3237_v33  ;;  %v2552_v51 = vld [vmem:[%s3999_s2] ss:$0 sm:$0xff]  ;;  %v2553_v56 = vld [vmem:[#allocation5] ss:$0 sm:$0xff]  ;;  %s3239_s18 = smov 112  }
  0x46   : > { %s3430_s24 = scalar_lea.vmem %s3997_s0, %s2636_s3  ;;  %s3241_s3 = smov 80   ;;  %vm758_vm2 = vcmask 130048  }
  0x47   : > { %v515_v0 = vld [vmem:[%s3430_s24] sm:$0xff]  ;;  %v517_v1 = vld [vmem:[%s3430_s24 + $0x10] sm:$0xff]  ;;  %v516_v2 = vld [vmem:[%s3430_s24 + $0x8] sm:$0xff]  ;;  %674 = vmatpush1.bf16.msra.mxu0 %v2927_v31  ;;  %2836 = vmatpush1.bf16.msra.mxu1 %v2927_v31  ;;  %s3242_s29 = smov 64   ;;  %s3243_s22 = smov 96  }
  0x48   : > { %v522_v3 = vsel %vm521_vm0, %v515_v0, 0.0  ;;  %v528_v4 = vsel %vm521_vm0, %v517_v1, 0.0  ;;  %v518_v5 = vld [vmem:[%s3430_s24 + $0x18] sm:$0xff]  ;;  %v525_v6 = vsel %vm521_vm0, %v516_v2, 0.0  ;;  %675 = vmatprep.subr.bf16.mxu0 %v2928_v32  ;;  %2833 = vmatprep.subr.bf16.mxu1 %v2928_v32  ;;  %s503_s19 = sand.u32 1, %s3220_s30  }
  0x49   : > { %523 = vadd.xlane.f32.xlu0 %v522_v3  ;;  %529 = vadd.xlane.f32.xlu1 %v528_v4  ;;  %v531_v7 = vsel %vm521_vm0, %v518_v5, 0.0  ;;  %s2548_s26 = sshll.u32 %s503_s19, 5 }
  0x4a   : > { %s505_s21 = scalar_lea.vmem [#allocation8], %s2548_s26 }
  0x4b   : > { %676 = vmatpush1.bf16.msra.mxu0 %v2930_v34  ;;  %2837 = vmatpush1.bf16.msra.mxu1 %v2930_v34 }
  0x4c   : > { %677 = vmatprep.subr.bf16.mxu0 %v2931_v35  ;;  %2834 = vmatprep.subr.bf16.mxu1 %v2931_v35 }
  0x4d   : > { %526 = vadd.xlane.f32.xlu0 %v525_v6  ;;  %532 = vadd.xlane.f32.xlu1 %v531_v7 }
  0x4f   : > { %678 = vmatpush1.bf16.msra.mxu0 %v2933_v36  ;;  %2838 = vmatpush1.bf16.msra.mxu1 %v2933_v36 }
  0xd2   : > { %v524_v8 = vpop.xlane.xlu0 %523  ;;  %v530_v9 = vpop.xlane.xlu1 %529 }
  0xd3   : > { %v535_v10 = vmul.f32 0.015625, %v524_v8  ;;  %v537_v11 = vmul.f32 0.015625, %v530_v9  ;;  %v3496_v8 = vld [vmem:[%s4002_s5] sm:$0x3] }
  0xd5   : > { %v3440_v12 = vsub.f32 %v515_v0, %v535_v10  ;;  %v3442_v13 = vsub.f32 %v517_v1, %v537_v11 }
  0xd6   : > { %v527_v14 = vpop.xlane.xlu0 %526  ;;  %v533_v15 = vpop.xlane.xlu1 %532 }
  0xd7   : > { %v536_v16 = vmul.f32 0.015625, %v527_v14  ;;  %v538_v17 = vmul.f32 0.015625, %v533_v15  ;;  %v543_v18 = vmul.f32 %v3440_v12, %v3440_v12  ;;  %v545_v19 = vmul.f32 %v3442_v13, %v3442_v13 }
  0xd9   : > { %v540_v20 = vsub.f32 %v516_v2, %v536_v16  ;;  %v3448_v21 = vsub.f32 %v518_v5, %v538_v17  ;;  %v547_v22 = vsel %vm521_vm0, %v543_v18, 0.0  ;;  %v553_v23 = vsel %vm521_vm0, %v545_v19, 0.0 }
  0xda   : > { %548 = vadd.xlane.f32.xlu0 %v547_v22  ;;  %v607_v5 = vlaneseq  ;;  %v3238_v16 = vmov 0.0  }
  0xdb   : > { %v544_v24 = vmul.f32 %v540_v20, %v540_v20  ;;  %v546_v25 = vmul.f32 %v3448_v21, %v3448_v21  ;;  %2711 = vmatprep.subr.bf16.mxu1 %v3238_v16  ;;  %2729 = vmatprep.subr.bf16.mxu0 %v3238_v16 }
  0xdc   : > { %v3490_v6 = vshrl.u32 %v607_v5, 7 }
  0xdd   : > { %v550_v26 = vsel %vm521_vm0, %v544_v24, 0.0  ;;  %v556_v27 = vsel %vm521_vm0, %v546_v25, 0.0 }
  0xde   : > { %554 = vadd.xlane.f32.xlu0 %v553_v23  ;;  %551 = vadd.xlane.f32.xlu1 %v550_v26  ;;  %v609_v7 = vsub.s32 0, %v3490_v6 }
  0xe0   : > { %v610_v10 = vrot.slane %v3496_v8, %v609_v7 }
  0xe2   : > { %557 = vadd.xlane.f32.xlu1 %v556_v27 }
 0x163   : > { %v549_v37 = vpop.xlane.xlu0 %548 }
 0x164   : > { %v559_v38 = vmul.f32 0.015625, %v549_v37 }
 0x166   : > { %v563_v39 = vadd.f32 1e-05, %v559_v38 }
 0x167   : > { %v552_v40 = vpop.xlane.xlu1 %551  ;;  %v555_v41 = vpop.xlane.xlu0 %554 }
 0x168   : > { %2966 = vrsqrt.f32 %v563_v39  ;;  %v560_v42 = vmul.f32 0.015625, %v552_v40  ;;  %v561_v43 = vmul.f32 0.015625, %v555_v41 }
 0x16a   : > { %v564_v44 = vadd.f32 1e-05, %v560_v42  ;;  %v565_v45 = vadd.f32 1e-05, %v561_v43  ;;  %v613_v42 = vsub.s32 1, %v3490_v6 }
 0x16b   : > { %v558_v46 = vpop.xlane.xlu1 %557 }
 0x16c   : > { %2968 = vrsqrt.f32 %v564_v44  ;;  %v562_v47 = vmul.f32 0.015625, %v558_v46  ;;  %v614_v46 = vrot.slane %v3496_v8, %v613_v42 }
 0x16d   : > { %2970 = vrsqrt.f32 %v565_v45 }
 0x16e   : > { %v566_v48 = vadd.f32 1e-05, %v562_v47 }
 0x170   : > { %2972 = vrsqrt.f32 %v566_v48 }
 0x175   : > { %v2967_v49 = vpop.eup %2966 }
 0x176   : > { %v571_v50 = vmul.f32 %v2967_v49, %v3440_v12 }
 0x178   : > { %v581_v55 = vmul.f32 %v2552_v51, %v571_v50 }
 0x179   : > { %v2969_v52 = vpop.eup %2968 }
 0x17a   : > { %v2971_v53 = vpop.eup %2970  ;;  %v572_v54 = vmul.f32 %v2969_v52, %v540_v20  ;;  %v591_v60 = vadd.f32 %v2553_v56, %v581_v55 }
 0x17b   : > { %v573_v57 = vmul.f32 %v2971_v53, %v3442_v13 }
 0x17c   : > { %v582_v58 = vmul.f32 %v2552_v51, %v572_v54 }
 0x17d   : > { %v2973_v59 = vpop.eup %2972  ;;  %v583_v63 = vmul.f32 %v2552_v51, %v573_v57 }
 0x17e   : > { %v592_v61 = vadd.f32 %v2553_v56, %v582_v58  ;;  %v574_v62 = vmul.f32 %v2973_v59, %v3448_v21 }
 0x17f   : > { %v593_v2 = vadd.f32 %v2553_v56, %v583_v63 }
 0x180   : > { %v595_v0 = vpack.c.bf16 %v592_v61, %v591_v60  ;;  %v584_v1 = vmul.f32 %v2552_v51, %v574_v62  ;;  %v3576_v60 = vld [vmem:[#allocation2 + $0x8] sm:$0xff] }
 0x182   : > { %2562 = vmatmul.mubr.msk.bf16.vlgmr.msra.gmra.mxu0 %vm521_vm0, %v595_v0  ;;  %v594_v3 = vadd.f32 %v2553_v56, %v584_v1  ;;  %v3571_v56 = vld [vmem:[#allocation2] sm:$0xff] }
 0x183   : > { %2731 = vmatprep.mubr.msk.bf16.mxu0 %vm3240_vm1, %v3238_v16 }
 0x184   : > { %v596_v4 = vpack.c.bf16 %v594_v3, %v593_v2 }
 0x186   : > { %2563 = vmatmul.mubr.msk.bf16.vlgmr.msra.gmra.mxu1 %vm521_vm0, %v596_v4 }
 0x187   : > { %2713 = vmatprep.mubr.msk.bf16.mxu1 %vm3240_vm1, %v3238_v16 }
 0x242   : > { %v697_v9 = vpop.f32.mrf.mxu0 }
 0x243   : > { %v698_v14 = vadd.f32 %v697_v9, %v610_v10 }
 0x244   : > { %v3501_v11 = vpop.f32.mrf.mxu0 }
 0x245   : > { %v700_v51 = vadd.f32 %v3501_v11, %v614_v46 }
 0x246   : > { %v701_v12 = vpop.f32.mrf.mxu0  ;;  %v707_v13 = vpop.f32.mrf.mxu1 }
 0x247   : > { %v702_v15 = vadd.f32 %v701_v12, %v610_v10  ;;  %v708_v20 = vadd.f32 %v707_v13, %v610_v10 }
 0x248   : > { %v3505_v17 = vpop.f32.mrf.mxu1  ;;  %v703_v44 = vpop.f32.mrf.mxu0 }
 0x249   : > { %v716_v18 = vpack.c.bf16 %v702_v15, %v698_v14  ;;  %v704_v48 = vadd.f32 %v703_v44, %v614_v46  ;;  %v710_v54 = vadd.f32 %v3505_v17, %v614_v46 }
 0x24a   : > { %v711_v19 = vpop.f32.mrf.mxu1 }
 0x24b   : > { %v712_v21 = vadd.f32 %v711_v19, %v610_v10  ;;  %720 = vrot.lane.b32.xlu0 %v716_v18, %s3239_s18  ;;  %v3556_v52 = vpack.c.bf16 %v704_v48, %v700_v51 }
 0x24c   : > { %v713_v49 = vpop.f32.mrf.mxu1 }
 0x24d   : > { %v717_v22 = vpack.c.bf16 %v712_v21, %v708_v20  ;;  %v714_v53 = vadd.f32 %v713_v49, %v614_v46 }
 0x24f   : > { %728 = vrot.lane.b32.xlu0 %v716_v18, %s3241_s3  ;;  %722 = vrot.lane.b32.xlu1 %v717_v22, %s3239_s18  ;;  %v3564_v55 = vpack.c.bf16 %v714_v53, %v710_v54 }
 0x253   : > { %756 = vrot.lane.b32.xlu0 %v716_v18, %s3242_s29  ;;  %724 = vrot.lane.b32.xlu1 %v716_v18, %s3243_s22 }
 0x257   : > { %726 = vrot.lane.b32.xlu1 %v717_v22, %s3243_s22 }
 0x25b   : > { %730 = vrot.lane.b32.xlu1 %v717_v22, %s3241_s3 }
 0x25f   : > { %806 = vrot.lane.b32.xlu1 %v717_v22, %s3242_s29 }
 0x2bd   : > { %v721_v23 = vpop.permute.xlu0 %720 }
 0x2be   : > { %855 = vrot.lane.b32.xlu0 %v721_v23, %s3242_s29 }
 0x2c1   : > { %v723_v24 = vpop.permute.xlu1 %722  ;;  %v729_v25 = vpop.permute.xlu0 %728 }
 0x2c2   : > { %904 = vrot.lane.b32.xlu1 %v723_v24, %s3242_s29 }
 0x2c5   : > { %v725_v26 = vpop.permute.xlu1 %724  ;;  %v757_v27 = vpop.permute.xlu0 %756 }
 0x2c6   : > { %v763_v28 = vsel %vm758_vm2, %v757_v27, 0  ;;  %953 = vrot.lane.b32.xlu0 %v725_v26, %s3242_s29 }
 0x2c7   : > { %2712 = vmatpush3.bf16.xpose.msra.mxu1 %v763_v28 }
 0x2c8   : > { %2717 = vmatprep.subr.bf16.mxu1 %v3238_v16 }
 0x2c9   : > { %v727_v29 = vpop.permute.xlu1 %726 }
 0x2ca   : > { %1002 = vrot.lane.b32.xlu1 %v727_v29, %s3242_s29  ;;  %1051 = vrot.lane.b32.xlu0 %v729_v25, %s3242_s29 }
 0x2cd   : > { %v731_v30 = vpop.permute.xlu1 %730 }
 0x2ce   : > { %1100 = vrot.lane.b32.xlu1 %v731_v30, %s3242_s29  ;;  %2714 = vmatmul.mubr.msk.bf16.vlgmr.msra.gmra.mxu1 %vm758_vm2, %v716_v18 }
 0x2cf   : > { %2719 = vmatprep.mubr.msk.bf16.mxu1 %vm3240_vm1, %v3238_v16 }
 0x2d1   : > { %v807_v31 = vpop.permute.xlu1 %806 }
 0x2d2   : > { %v812_v32 = vsel %vm758_vm2, %v807_v31, 0 }
 0x2d3   : > { %2718 = vmatpush3.bf16.xpose.msra.mxu1 %v812_v32 }
 0x2d4   : > { %2723 = vmatprep.subr.bf16.mxu1 %v3238_v16 }
 0x2da   : > { %2720 = vmatmul.mubr.msk.bf16.vlgmr.msra.gmra.mxu1 %vm758_vm2, %v717_v22 }
 0x2db   : > { %2725 = vmatprep.mubr.msk.bf16.mxu1 %vm3240_vm1, %v3238_v16 }
 0x330   : > { %v856_v34 = vpop.permute.xlu0 %855 }
 0x331   : > { %v861_v35 = vsel %vm758_vm2, %v856_v34, 0 }
 0x332   : > { %2724 = vmatpush3.bf16.xpose.msra.mxu1 %v861_v35 }
 0x333   : > { %2735 = vmatprep.subr.bf16.mxu1 %v3238_v16 }
 0x334   : > { %v905_v36 = vpop.permute.xlu1 %904 }
 0x335   : > { %v910_v37 = vsel %vm758_vm2, %v905_v36, 0 }
 0x336   : > { %2730 = vmatpush3.bf16.xpose.msra.mxu0 %v910_v37 }
 0x337   : > { %2741 = vmatprep.subr.bf16.mxu0 %v3238_v16 }
 0x338   : > { %v954_v38 = vpop.permute.xlu0 %953 }
 0x339   : > { %v959_v39 = vsel %vm758_vm2, %v954_v38, 0  ;;  %2726 = vmatmul.mubr.msk.bf16.vlgmr.msra.gmra.mxu1 %vm758_vm2, %v721_v23 }
 0x33a   : > { %2736 = vmatpush3.bf16.xpose.msra.mxu1 %v959_v39  ;;  %2737 = vmatprep.mubr.msk.bf16.mxu1 %vm3240_vm1, %v3238_v16 }
 0x33b   : > { %2747 = vmatprep.subr.bf16.mxu1 %v3238_v16 }
 0x33c   : > { %v1003_v40 = vpop.permute.xlu1 %1002  ;;  %v1052_v43 = vpop.permute.xlu0 %1051 }
 0x33d   : > { %v1008_v41 = vsel %vm758_vm2, %v1003_v40, 0  ;;  %2732 = vmatmul.mubr.msk.bf16.vlgmr.msra.gmra.mxu0 %vm758_vm2, %v723_v24  ;;  %v1057_v45 = vsel %vm758_vm2, %v1052_v43, 0 }
 0x33e   : > { %2742 = vmatpush3.bf16.xpose.msra.mxu0 %v1008_v41  ;;  %2743 = vmatprep.mubr.msk.bf16.mxu0 %vm3240_vm1, %v3238_v16 }
 0x33f   : > { %2753 = vmatprep.subr.bf16.mxu0 %v3238_v16 }
 0x340   : > { %v1101_v47 = vpop.permute.xlu1 %1100 }
 0x341   : > { %2738 = vmatmul.mubr.msk.bf16.vlgmr.msra.gmra.mxu1 %vm758_vm2, %v725_v26  ;;  %v1106_v50 = vsel %vm758_vm2, %v1101_v47, 0 }
 0x342   : > { %2748 = vmatpush3.bf16.xpose.msra.mxu1 %v1057_v45  ;;  %2749 = vmatprep.mubr.msk.bf16.mxu1 %vm3240_vm1, %v3238_v16 }
 0x343   : > { %2759 = vmatprep.subr.bf16.mxu1 %v3238_v16 }
 0x345   : > { %2744 = vmatmul.mubr.msk.bf16.vlgmr.msra.gmra.mxu0 %vm758_vm2, %v727_v29 }
 0x346   : > { %2754 = vmatpush3.bf16.xpose.msra.mxu0 %v1106_v50  ;;  %2755 = vmatprep.mubr.msk.bf16.mxu0 %vm3240_vm1, %v3238_v16 }
 0x347   : > { %2765 = vmatprep.subr.bf16.mxu0 %v3238_v16 }
 0x349   : > { %2750 = vmatmul.mubr.msk.bf16.vlgmr.msra.gmra.mxu1 %vm758_vm2, %v729_v25 }
 0x34a   : > { %2760 = vmatpush3.bf16.msra.mxu1 %v3556_v52  ;;  %2761 = vmatprep.mubr.msk.bf16.mxu1 %vm3240_vm1, %v3238_v16 }
 0x34b   : > { %2771 = vmatprep.subr.bf16.mxu1 %v3238_v16 }
 0x34d   : > { %2756 = vmatmul.mubr.msk.bf16.vlgmr.msra.gmra.mxu0 %vm758_vm2, %v731_v30 }
 0x34e   : > { %2766 = vmatpush3.bf16.msra.mxu0 %v3564_v55  ;;  %2767 = vmatprep.mubr.msk.bf16.mxu0 %vm3240_vm1, %v3238_v16 }
 0x34f   : > { %2777 = vmatprep.subr.bf16.mxu0 %v3238_v16 }
 0x38e   : > { %v799_v57 = vpop.f32.mrf.mxu1 }
 0x38f   : > { %v3574_v58 = vadd.f32 %v799_v57, %v3571_v56 }
 0x390   : > { %v2715_v59 = vpop.f32.mrf.mxu1 }
 0x391   : > { %v1149_v61 = vsel %vm758_vm2, %v3574_v58, -inf }
 0x392   : > { %1150 = vmax.xlane.f32.xlu0 %v1149_v61  ;;  %v802_v62 = vpop.f32.mrf.mxu1 }
 0x393   : > { %v3581_v63 = vadd.f32 %v802_v62, %v3576_v60 }
 0x394   : > { %v2716_v0 = vpop.f32.mrf.mxu1 }
 0x395   : > { %v1152_v1 = vsel %vm758_vm2, %v3581_v63, -inf }
 0x396   : > { %1153 = vmax.xlane.f32.xlu1 %v1152_v1 }
 0x39a   : > { %v848_v2 = vpop.f32.mrf.mxu1 }
 0x39b   : > { %v3586_v3 = vadd.f32 %v848_v2, %v3571_v56 }
 0x39c   : > { %v2721_v4 = vpop.f32.mrf.mxu1 }
 0x39d   : > { %v1155_v5 = vsel %vm758_vm2, %v3586_v3, -inf }
 0x39e   : > { %1156 = vmax.xlane.f32.xlu0 %v1155_v5  ;;  %v851_v8 = vpop.f32.mrf.mxu1 }
 0x39f   : > { %v3591_v9 = vadd.f32 %v851_v8, %v3576_v60 }
 0x3a0   : > { %v2722_v10 = vpop.f32.mrf.mxu1 }
 0x3a1   : > { %v1158_v11 = vsel %vm758_vm2, %v3591_v9, -inf }
 0x3a2   : > { %1159 = vmax.xlane.f32.xlu0 %v1158_v11 }
 0x3f9   : > { %v897_v12 = vpop.f32.mrf.mxu1 }
 0x3fa   : > { %v3596_v13 = vadd.f32 %v897_v12, %v3571_v56 }
 0x3fb   : > { %v2727_v14 = vpop.f32.mrf.mxu1 }
 0x3fc   : > { %v1161_v15 = vsel %vm758_vm2, %v3596_v13, -inf }
 0x3fd   : > { %v946_v17 = vpop.f32.mrf.mxu0  ;;  %1162 = vmax.xlane.f32.xlu0 %v1161_v15  ;;  %v900_v18 = vpop.f32.mrf.mxu1 }
 0x3fe   : > { %v3601_v19 = vadd.f32 %v946_v17, %v3571_v56  ;;  %v3604_v20 = vadd.f32 %v900_v18, %v3576_v60 }
 0x3ff   : > { %v2728_v21 = vpop.f32.mrf.mxu1  ;;  %v2733_v22 = vpop.f32.mrf.mxu0 }
 0x400   : > { %v1167_v23 = vsel %vm758_vm2, %v3601_v19, -inf  ;;  %v1164_v24 = vsel %vm758_vm2, %v3604_v20, -inf }
 0x401   : > { %v949_v25 = vpop.f32.mrf.mxu0  ;;  %1168 = vmax.xlane.f32.xlu0 %v1167_v23  ;;  %1165 = vmax.xlane.f32.xlu1 %v1164_v24  ;;  %v995_v26 = vpop.f32.mrf.mxu1 }
 0x402   : > { %v3611_v27 = vadd.f32 %v949_v25, %v3576_v60  ;;  %v3614_v28 = vadd.f32 %v995_v26, %v3571_v56 }
 0x403   : > { %v2734_v29 = vpop.f32.mrf.mxu0  ;;  %v2739_v30 = vpop.f32.mrf.mxu1 }
 0x404   : > { %v1170_v31 = vsel %vm758_vm2, %v3611_v27, -inf  ;;  %v1173_v32 = vsel %vm758_vm2, %v3614_v28, -inf }
 0x405   : > { %v1044_v34 = vpop.f32.mrf.mxu0  ;;  %1171 = vmax.xlane.f32.xlu1 %v1170_v31  ;;  %1174 = vmax.xlane.f32.xlu0 %v1173_v32  ;;  %v998_v35 = vpop.f32.mrf.mxu1 }
 0x406   : > { %v3621_v36 = vadd.f32 %v1044_v34, %v3571_v56  ;;  %v3624_v37 = vadd.f32 %v998_v35, %v3576_v60 }
 0x407   : > { %v2740_v38 = vpop.f32.mrf.mxu1  ;;  %v2745_v39 = vpop.f32.mrf.mxu0 }
 0x408   : > { %v1179_v40 = vsel %vm758_vm2, %v3621_v36, -inf  ;;  %v1176_v41 = vsel %vm758_vm2, %v3624_v37, -inf }
 0x409   : > { %v1047_v43 = vpop.f32.mrf.mxu0  ;;  %1180 = vmax.xlane.f32.xlu0 %v1179_v40  ;;  %1177 = vmax.xlane.f32.xlu1 %v1176_v41  ;;  %v1093_v44 = vpop.f32.mrf.mxu1 }
 0x40a   : > { %v3631_v45 = vadd.f32 %v1047_v43, %v3576_v60  ;;  %v3634_v46 = vadd.f32 %v1093_v44, %v3571_v56 }
 0x40b   : > { %v2746_v47 = vpop.f32.mrf.mxu0  ;;  %v2751_v48 = vpop.f32.mrf.mxu1 }
 0x40c   : > { %v1182_v49 = vsel %vm758_vm2, %v3631_v45, -inf  ;;  %v1185_v50 = vsel %vm758_vm2, %v3634_v46, -inf }
 0x40d   : > { %v1142_v51 = vpop.f32.mrf.mxu0  ;;  %1183 = vmax.xlane.f32.xlu1 %v1182_v49  ;;  %1186 = vmax.xlane.f32.xlu0 %v1185_v50  ;;  %v1096_v53 = vpop.f32.mrf.mxu1 }
 0x40e   : > { %v3641_v54 = vadd.f32 %v1142_v51, %v3571_v56  ;;  %v3654_v10 = vadd.f32 %v1096_v53, %v3576_v60 }
 0x40f   : > { %v2752_v57 = vpop.f32.mrf.mxu1  ;;  %v2757_v59 = vpop.f32.mrf.mxu0 }
 0x410   : > { %v1191_v61 = vsel %vm758_vm2, %v3641_v54, -inf  ;;  %v1188_v14 = vsel %vm758_vm2, %v3654_v10, -inf }
 0x411   : > { %v1145_v62 = vpop.f32.mrf.mxu0  ;;  %1192 = vmax.xlane.f32.xlu0 %v1191_v61 }
 0x412   : > { %v3659_v12 = vadd.f32 %v1145_v62, %v3576_v60 }
 0x413   : > { %v2758_v0 = vpop.f32.mrf.mxu0 }
 0x41b   : > { %v1151_v1 = vpop.xlane.xlu0 %1150 }
 0x41c   : > { %v1197_v56 = vsub.f32 %v3574_v58, %v1151_v1 }
 0x41e   : > { %738 = vrot.lane.b32.xlu1 %v3564_v55, %s3239_s18  ;;  %v1213_v4 = vmul.f32 1.442695, %v1197_v56 }
 0x41f   : > { %v1154_v60 = vpop.xlane.xlu1 %1153 }
 0x420   : > { %2974 = vpow2.f32 %v1213_v4  ;;  %v1198_v18 = vsub.f32 %v3581_v63, %v1154_v60 }
 0x422   : > { %742 = vrot.lane.b32.xlu1 %v3556_v52, %s3243_s22  ;;  %v1215_v22 = vmul.f32 1.442695, %v1198_v18 }
 0x427   : > { %736 = vrot.lane.b32.xlu0 %v3556_v52, %s3239_s18  ;;  %v1157_v2 = vpop.xlane.xlu0 %1156  ;;  %s2638_s18 = sshll.u32 %s3343_s17, 9  ;;  %s3957_s17 = scalar_lea.sflag [#allocation4], %s503_s19 }
 0x428   : > { %v1199_v5 = vsub.f32 %v3586_v3, %v1157_v2  ;;  %v1194_v3 = vsel %vm758_vm2, %v3659_v12, -inf  ;;  %s3950_s25 = scalar_lea.hbm %s4011_s14, %s2638_s18 }
 0x42a   : > { %v1217_v8 = vmul.f32 1.442695, %v1199_v5 }
 0x42b   : > { %v1160_v21 = vpop.xlane.xlu0 %1159 }
 0x42c   : > { %2976 = vpow2.f32 %v1217_v8  ;;  %v1200_v23 = vsub.f32 %v3591_v9, %v1160_v21 }
 0x42d   : > { %v3656_v11 = vpop.eup %2974  ;;  %2978 = vpow2.f32 %v1215_v22 }
 0x42e   : > { %v1245_v58 = vsel %vm758_vm2, %v3656_v11, 0.0  ;;  %v1219_v24 = vmul.f32 1.442695, %v1200_v23 }
 0x430   : > { %2980 = vpow2.f32 %v1219_v24 }
 0x439   : > { %v3665_v15 = vpop.eup %2976 }
 0x43a   : > { %v1251_v17 = vsel %vm758_vm2, %v3665_v15, 0.0  ;;  %v3675_v25 = vpop.eup %2978 }
 0x43b   : > { %v1248_v26 = vsel %vm758_vm2, %v3675_v25, 0.0 }
 0x43d   : > { %v3679_v29 = vpop.eup %2980 }
 0x43e   : > { %v1254_v30 = vsel %vm758_vm2, %v3679_v29, 0.0 }
 0x446   : > { %1189 = vmax.xlane.f32.xlu1 %v1188_v14  ;;  %1246 = vadd.xlane.f32.xlu0 %v1245_v58 }
 0x44a   : > { %1195 = vmax.xlane.f32.xlu1 %v1194_v3  ;;  %1252 = vadd.xlane.f32.xlu0 %v1251_v17 }
 0x45b   : > { %744 = vrot.lane.b32.xlu1 %v3564_v55, %s3243_s22 }
 0x47f   : > { %1249 = vadd.xlane.f32.xlu1 %v1248_v26 }
 0x483   : > { %1255 = vadd.xlane.f32.xlu1 %v1254_v30 }
 0x486   : > { %v1163_v63 = vpop.xlane.xlu0 %1162 }
 0x487   : > { %v1201_v31 = vsub.f32 %v3596_v13, %v1163_v63 }
 0x489   : > { %v1221_v32 = vmul.f32 1.442695, %v1201_v31 }
 0x48a   : > { %v1166_v9 = vpop.xlane.xlu1 %1165  ;;  %v1169_v34 = vpop.xlane.xlu0 %1168 }
 0x48b   : > { %2982 = vpow2.f32 %v1221_v32  ;;  %v1202_v35 = vsub.f32 %v3604_v20, %v1166_v9  ;;  %v1203_v38 = vsub.f32 %v3601_v19, %v1169_v34 }
 0x48d   : > { %v1223_v39 = vmul.f32 1.442695, %v1202_v35  ;;  %v1225_v40 = vmul.f32 1.442695, %v1203_v38 }
 0x48e   : > { %v1172_v41 = vpop.xlane.xlu1 %1171  ;;  %v1175_v43 = vpop.xlane.xlu0 %1174 }
 0x48f   : > { %2984 = vpow2.f32 %v1223_v39  ;;  %v1204_v44 = vsub.f32 %v3611_v27, %v1172_v41  ;;  %v1205_v47 = vsub.f32 %v3614_v28, %v1175_v43 }
 0x490   : > { %2986 = vpow2.f32 %v1225_v40 }
 0x491   : > { %v1227_v48 = vmul.f32 1.442695, %v1204_v44  ;;  %v1229_v13 = vmul.f32 1.442695, %v1205_v47 }
 0x492   : > { %v1178_v49 = vpop.xlane.xlu1 %1177  ;;  %v1181_v50 = vpop.xlane.xlu0 %1180 }
 0x493   : > { %2988 = vpow2.f32 %v1227_v48  ;;  %v1206_v51 = vsub.f32 %v3624_v37, %v1178_v49  ;;  %v1207_v20 = vsub.f32 %v3621_v36, %v1181_v50 }
 0x494   : > { %2990 = vpow2.f32 %v1229_v13 }
 0x495   : > { %v1231_v19 = vmul.f32 1.442695, %v1206_v51  ;;  %v1233_v53 = vmul.f32 1.442695, %v1207_v20 }
 0x496   : > { %v1184_v57 = vpop.xlane.xlu1 %1183  ;;  %v1187_v59 = vpop.xlane.xlu0 %1186 }
 0x497   : > { %2992 = vpow2.f32 %v1231_v19  ;;  %v1208_v27 = vsub.f32 %v3631_v45, %v1184_v57  ;;  %v1209_v28 = vsub.f32 %v3634_v46, %v1187_v59 }
 0x498   : > { %v3692_v61 = vpop.eup %2982  ;;  %2994 = vpow2.f32 %v1233_v53 }
 0x499   : > { %v1235_v62 = vmul.f32 1.442695, %v1208_v27  ;;  %v1237_v0 = vmul.f32 1.442695, %v1209_v28  ;;  %v1257_v37 = vsel %vm758_vm2, %v3692_v61, 0.0 }
 0x49a   : > { %1258 = vadd.xlane.f32.xlu0 %v1257_v37  ;;  %v1193_v36 = vpop.xlane.xlu0 %1192  ;;  %v739_v30 = vpop.permute.xlu1 %738 }
 0x49b   : > { %2996 = vpow2.f32 %v1235_v62  ;;  %v1211_v1 = vsub.f32 %v3641_v54, %v1193_v36 }
 0x49c   : > { %v3697_v56 = vpop.eup %2984  ;;  %2998 = vpow2.f32 %v1237_v0 }
 0x49d   : > { %v3699_v2 = vpop.eup %2986  ;;  %v1241_v45 = vmul.f32 1.442695, %v1211_v1  ;;  %v1260_v46 = vsel %vm758_vm2, %v3697_v56, 0.0 }
 0x49e   : > { %1261 = vadd.xlane.f32.xlu1 %v1260_v46  ;;  %v1263_v4 = vsel %vm758_vm2, %v3699_v2, 0.0  ;;  %v3735_v63 = vpop.permute.xlu1 %742 }
 0x49f   : > { %3000 = vpow2.f32 %v1241_v45  ;;  %1264 = vadd.xlane.f32.xlu0 %v1263_v4 }
 0x4a0   : > { %v3705_v5 = vpop.eup %2988 }
 0x4a1   : > { %v3707_v8 = vpop.eup %2990  ;;  %v1266_v54 = vsel %vm758_vm2, %v3705_v5, 0.0 }
 0x4a2   : > { %1267 = vadd.xlane.f32.xlu1 %v1266_v54  ;;  %v1269_v14 = vsel %vm758_vm2, %v3707_v8, 0.0 }
 0x4a3   : > { %1270 = vadd.xlane.f32.xlu0 %v1269_v14 }
 0x4a4   : > { %v3713_v58 = vpop.eup %2992 }
 0x4a5   : > { %v3715_v3 = vpop.eup %2994  ;;  %v1272_v17 = vsel %vm758_vm2, %v3713_v58, 0.0 }
 0x4a6   : > { %1273 = vadd.xlane.f32.xlu1 %v1272_v17  ;;  %v1275_v60 = vsel %vm758_vm2, %v3715_v3, 0.0 }
 0x4a7   : > { %1276 = vadd.xlane.f32.xlu0 %v1275_v60 }
 0x4a8   : > { %v3721_v18 = vpop.eup %2996 }
 0x4a9   : > { %v3723_v21 = vpop.eup %2998  ;;  %v1278_v22 = vsel %vm758_vm2, %v3721_v18, 0.0 }
 0x4aa   : > { %1279 = vadd.xlane.f32.xlu1 %v1278_v22  ;;  %v1281_v23 = vsel %vm758_vm2, %v3723_v21, 0.0 }
 0x4ab   : > { %1282 = vadd.xlane.f32.xlu0 %v1281_v23 }
 0x4ac   : > { %v3729_v24 = vpop.eup %3000 }
 0x4ad   : > { %v1287_v26 = vsel %vm758_vm2, %v3729_v24, 0.0 }
 0x4af   : > { %1288 = vadd.xlane.f32.xlu0 %v1287_v26 }
 0x4c5   : > { %748 = vrot.lane.b32.xlu0 %v3556_v52, %s3241_s3 }
 0x4cf   : > { %v1190_v31 = vpop.xlane.xlu1 %1189 }
 0x4d0   : > { %v1210_v32 = vsub.f32 %v3654_v10, %v1190_v31  ;;  %v737_v10 = vpop.permute.xlu0 %736 }
 0x4d2   : > { %v1239_v9 = vmul.f32 1.442695, %v1210_v32 }
 0x4d3   : > { %v1196_v34 = vpop.xlane.xlu1 %1195 }
 0x4d4   : > { %3002 = vpow2.f32 %v1239_v9  ;;  %v1212_v35 = vsub.f32 %v3659_v12, %v1196_v34  ;;  %v1247_v43 = vpop.xlane.xlu0 %1246 }
 0x4d6   : > { %v1243_v38 = vmul.f32 1.442695, %v1212_v35  ;;  %v2934_v35 = vld [vmem:[#allocation7] sm:$0xff]  }
 0x4d7   : > { %v3749_v12 = vpop.permute.xlu1 %744 }
 0x4d8   : > { %3004 = vpow2.f32 %v1243_v38  ;;  %v1253_v44 = vpop.xlane.xlu0 %1252 }
 0x4d9   : > { %3006 = vrcp.f32 %v1247_v43 }
 0x4e1   : > { %v3739_v39 = vpop.eup %3002 }
 0x4e2   : > { %v1284_v40 = vsel %vm758_vm2, %v3739_v39, 0.0 }
 0x4e3   : > { %1285 = vadd.xlane.f32.xlu1 %v1284_v40 }
 0x4e5   : > { %v3743_v41 = vpop.eup %3004 }
 0x4e6   : > { %v1290_v52 = vsel %vm758_vm2, %v3743_v41, 0.0  ;;  %v3007_v13 = vpop.eup %3006 }
 0x4e7   : > { %1291 = vadd.xlane.f32.xlu1 %v1290_v52  ;;  %v1309_v50 = vmul.f32 %v3007_v13, %v3656_v11  ;;  %v2936_v13 = vld [vmem:[#allocation7 + $0x10] sm:$0xff]  }
 0x4f8   : > { %750 = vrot.lane.b32.xlu1 %v3564_v55, %s3241_s3  ;;  %s2445_s3 = sshll.u32 %s505_s21, 4  ;;  %s3952_s3 = int_to_ptr.vmem [resolvable:$true] %s2445_s3 }
 0x4f9   : > { %s3160_s20 = scalar_lea.vmem %s3952_s3, 512 }
 0x4fa   : > { %p3161_p9 = scmp.ne.s32.totalorder %s3952_s3, %s3160_s20 }
 0x4fc   : > { %p3162_p10 = pnand %p3161_p9, %p3360_p5 }
 0x4fe   : > { %p3163_p12 = pneg %p3162_p10 }
 0x508   : > { %v1250_v47 = vpop.xlane.xlu1 %1249 }
 0x509   : > { %3008 = vrcp.f32 %v1250_v47  ;;  %v2935_v47 = vld [vmem:[#allocation7 + $0x8] sm:$0xff]  }
 0x50a   : > { %3010 = vrcp.f32 %v1253_v44 }
 0x50c   : > { %v1256_v48 = vpop.xlane.xlu1 %1255 }
 0x50d   : > { %3012 = vrcp.f32 %v1256_v48 }
 0x516   : > { %v3009_v49 = vpop.eup %3008 }
 0x517   : > { %v1310_v51 = vmul.f32 %v3009_v49, %v3675_v25  ;;  %v3011_v20 = vpop.eup %3010 }
 0x518   : > { %v1311_v53 = vmul.f32 %v3011_v20, %v3665_v15 }
 0x519   : > { %v1325_v19 = vpack.c.bf16 %v1310_v51, %v1309_v50 }
 0x51a   : > { %v3013_v55 = vpop.eup %3012 }
 0x51b   : > { %2762 = vmatmul.mubr.msk.bf16.vlgmr.msra.gmra.mxu1 %vm758_vm2, %v1325_v19  ;;  %v1312_v57 = vmul.f32 %v3013_v55, %v3679_v29 }
 0x51c   : > { %2772 = vmatpush3.bf16.msra.mxu1 %v737_v10  ;;  %2773 = vmatprep.mubr.msk.bf16.mxu1 %vm3240_vm1, %v3238_v16 }
 0x51d   : > { %v1326_v59 = vpack.c.bf16 %v1312_v57, %v1311_v53  ;;  %2783 = vmatprep.subr.bf16.mxu1 %v3238_v16 }
 0x51f   : > { %2768 = vmatmul.mubr.msk.bf16.vlgmr.msra.gmra.mxu0 %vm758_vm2, %v1326_v59 }
 0x520   : > { %2778 = vmatpush3.bf16.msra.mxu0 %v739_v30  ;;  %2779 = vmatprep.mubr.msk.bf16.mxu0 %vm3240_vm1, %v3238_v16 }
 0x521   : > { %2789 = vmatprep.subr.bf16.mxu0 %v3238_v16 }
 0x523   : > { %v1259_v11 = vpop.xlane.xlu0 %1258 }
 0x524   : > { %3014 = vrcp.f32 %v1259_v11 }
 0x527   : > { %v1262_v15 = vpop.xlane.xlu1 %1261 }
 0x528   : > { %3016 = vrcp.f32 %v1262_v15  ;;  %v1265_v25 = vpop.xlane.xlu0 %1264 }
 0x529   : > { %3018 = vrcp.f32 %v1265_v25 }
 0x52b   : > { %v1268_v29 = vpop.xlane.xlu1 %1267 }
 0x52c   : > { %3020 = vrcp.f32 %v1268_v29  ;;  %v1271_v27 = vpop.xlane.xlu0 %1270 }
 0x52d   : > { %3022 = vrcp.f32 %v1271_v27 }
 0x52f   : > { %v1274_v28 = vpop.xlane.xlu1 %1273 }
 0x530   : > { %3024 = vrcp.f32 %v1274_v28  ;;  %v1277_v62 = vpop.xlane.xlu0 %1276 }
 0x531   : > { %3026 = vrcp.f32 %v1277_v62  ;;  %v3015_v0 = vpop.eup %3014 }
 0x532   : > { %v1313_v45 = vmul.f32 %v3015_v0, %v3692_v61 }
 0x533   : > { %v1280_v37 = vpop.xlane.xlu1 %1279 }
 0x534   : > { %3028 = vrcp.f32 %v1280_v37  ;;  %v1283_v1 = vpop.xlane.xlu0 %1282 }
 0x535   : > { %v3017_v36 = vpop.eup %3016  ;;  %3030 = vrcp.f32 %v1283_v1 }
 0x536   : > { %v1314_v46 = vmul.f32 %v3017_v36, %v3697_v56  ;;  %v3019_v4 = vpop.eup %3018 }
 0x537   : > { %v1315_v17 = vmul.f32 %v3019_v4, %v3699_v2 }
 0x538   : > { %v1327_v54 = vpack.c.bf16 %v1314_v46, %v1313_v45  ;;  %v1289_v23 = vpop.xlane.xlu0 %1288 }
 0x539   : > { %v3021_v14 = vpop.eup %3020 }
 0x53a   : > { %2774 = vmatmul.mubr.msk.bf16.vlgmr.msra.gmra.mxu1 %vm758_vm2, %v1327_v54  ;;  %v1316_v60 = vmul.f32 %v3021_v14, %v3705_v5  ;;  %v3023_v22 = vpop.eup %3022 }
 0x53b   : > { %2784 = vmatpush3.bf16.msra.mxu1 %v3735_v63  ;;  %2785 = vmatprep.mubr.msk.bf16.mxu1 %vm3240_vm1, %v3238_v16  ;;  %v1317_v56 = vmul.f32 %v3023_v22, %v3707_v8 }
 0x53c   : > { %v1328_v26 = vpack.c.bf16 %v1316_v60, %v1315_v17  ;;  %2795 = vmatprep.subr.bf16.mxu1 %v3238_v16  ;;  %v749_v31 = vpop.permute.xlu0 %748 }
 0x53d   : > { %v3025_v61 = vpop.eup %3024 }
 0x53e   : > { %2780 = vmatmul.mubr.msk.bf16.vlgmr.msra.gmra.mxu0 %vm758_vm2, %v1328_v26  ;;  %v1318_v30 = vmul.f32 %v3025_v61, %v3713_v58  ;;  %v3027_v2 = vpop.eup %3026 }
 0x53f   : > { %2790 = vmatpush3.bf16.msra.mxu0 %v3749_v12  ;;  %2791 = vmatprep.mubr.msk.bf16.mxu0 %vm3240_vm1, %v3238_v16  ;;  %v1319_v32 = vmul.f32 %v3027_v2, %v3715_v3 }
 0x540   : > { %v1329_v5 = vpack.c.bf16 %v1318_v30, %v1317_v56  ;;  %2801 = vmatprep.subr.bf16.mxu0 %v3238_v16 }
 0x541   : > { %v3029_v63 = vpop.eup %3028 }
 0x542   : > { %2786 = vmatmul.mubr.msk.bf16.vlgmr.msra.gmra.mxu1 %vm758_vm2, %v1329_v5  ;;  %v1320_v9 = vmul.f32 %v3029_v63, %v3721_v18  ;;  %v3031_v18 = vpop.eup %3030 }
 0x543   : > { %2796 = vmatpush3.bf16.msra.mxu1 %v749_v31  ;;  %2797 = vmatprep.mubr.msk.bf16.mxu1 %vm3240_vm1, %v3238_v16  ;;  %v1321_v40 = vmul.f32 %v3031_v18, %v3723_v21  ;;  %v2937_v21 = vld [vmem:[#allocation7 + $0x18] sm:$0xff]  }
 0x544   : > { %v1330_v8 = vpack.c.bf16 %v1320_v9, %v1319_v32  ;;  %2807 = vmatprep.subr.bf16.mxu1 %v2935_v47 }
 0x546   : > { %2792 = vmatmul.mubr.msk.bf16.vlgmr.msra.gmra.mxu0 %vm758_vm2, %v1330_v8 }
 0x547   : > { %2803 = vmatprep.mubr.msk.bf16.mxu0 %vm3240_vm1, %v3238_v16 }
 0x56c   : > { %v1286_v58 = vpop.xlane.xlu1 %1285 }
 0x56d   : > { %3032 = vrcp.f32 %v1286_v58 }
 0x56e   : > { %3034 = vrcp.f32 %v1289_v23 }
 0x570   : > { %v1292_v34 = vpop.xlane.xlu1 %1291 }
 0x571   : > { %3036 = vrcp.f32 %v1292_v34 }
 0x574   : > { %v751_v3 = vpop.permute.xlu1 %750 }
 0x575   : > { %2802 = vmatpush3.bf16.msra.mxu0 %v751_v3 }
 0x576   : > { %2813 = vmatprep.subr.bf16.mxu0 %v2934_v35 }
 0x57a   : > { %v3033_v38 = vpop.eup %3032 }
 0x57b   : > { %v1322_v52 = vmul.f32 %v3033_v38, %v3739_v39  ;;  %v3035_v10 = vpop.eup %3034 }
 0x57c   : > { %v1323_v16 = vmul.f32 %v3035_v10, %v3729_v24 }
 0x57d   : > { %v1331_v43 = vpack.c.bf16 %v1322_v52, %v1321_v40 }
 0x57e   : > { %v3037_v12 = vpop.eup %3036 }
 0x57f   : > { %2798 = vmatmul.mubr.msk.bf16.vlgmr.msra.gmra.mxu1 %vm758_vm2, %v1331_v43  ;;  %v1324_v44 = vmul.f32 %v3037_v12, %v3743_v41 }
 0x580   : > { %2808 = vmatpush3.bf16.msra.mxu1 %v2935_v47 }
 0x581   : > { %v1332_v48 = vpack.c.bf16 %v1324_v44, %v1323_v16  ;;  %2819 = vmatprep.subr.bf16.mxu1 %v2936_v13 }
 0x583   : > { %2804 = vmatmul.mubr.msk.bf16.vlgmr.msra.gmra.mxu0 %vm758_vm2, %v1332_v48 }
 0x584   : > { %2814 = vmatpush3.bf16.msra.mxu0 %v2934_v35 }
 0x585   : > { %2825 = vmatprep.subr.bf16.mxu0 %v2937_v21 }
 0x5db   : > { %v1370_v39 = vpop.f32.mrf.mxu1 }
 0x5dd   : > { %v2763_v49 = vpop.f32.mrf.mxu1 }
 0x5df   : > { %v1373_v50 = vpop.f32.mrf.mxu1  ;;  %v1414_v51 = vpop.f32.mrf.mxu0 }
 0x5e0   : > { %v1685_v20 = vpack.c.bf16 %v1373_v50, %v1370_v39 }
 0x5e1   : > { %v2764_v19 = vpop.f32.mrf.mxu1  ;;  %v2769_v24 = vpop.f32.mrf.mxu0 }
 0x5e2   : > { %2815 = vmatprep.mubr.msk.bf16.mxu0 %vm758_vm2, %v1685_v20  ;;  %v3078_v19 = vld [vmem:[%s3430_s24 + $0x10] sm:$0xff] }
 0x5e3   : > { %v1417_v41 = vpop.f32.mrf.mxu0 }
 0x5e4   : > { %v1686_v55 = vpack.c.bf16 %v1417_v41, %v1414_v51  ;;  %v3079_v41 = vld [vmem:[%s3430_s24] sm:$0xff] }
 0x5e5   : > { %v2770_v53 = vpop.f32.mrf.mxu0 }
 0x5e6   : > { %2816 = vmatmul.mubr.msk.bf16.vlgmr.msra.gmra.mxu0 %vm758_vm2, %v1686_v55 }
 0x5e7   : > { %2826 = vmatpush3.bf16.msra.mxu0 %v2937_v21 }
 0x5fa   : > { %v1458_v57 = vpop.f32.mrf.mxu1 }
 0x5fc   : > { %v2775_v59 = vpop.f32.mrf.mxu1 }
 0x5fe   : > { %v1461_v11 = vpop.f32.mrf.mxu1  ;;  %v1502_v15 = vpop.f32.mrf.mxu0 }
 0x5ff   : > { %v1689_v25 = vpack.c.bf16 %v1461_v11, %v1458_v57  ;;  %v2592_v57 = vld [vmem:[%s4004_s7] ss:$0 sm:$0xff] }
 0x600   : > { %v2776_v29 = vpop.f32.mrf.mxu1  ;;  %v2781_v27 = vpop.f32.mrf.mxu0 }
 0x601   : > { %2809 = vmatprep.mubr.msk.bf16.mxu1 %vm758_vm2, %v1689_v25  ;;  %v3080_v29 = vld [vmem:[%s3430_s24 + $0x18] sm:$0xff] }
 0x602   : > { %v1505_v28 = vpop.f32.mrf.mxu0  ;;  %v1546_v62 = vpop.f32.mrf.mxu1 }
 0x603   : > { %v1690_v0 = vpack.c.bf16 %v1505_v28, %v1502_v15  ;;  %v3081_v28 = vld [vmem:[%s3430_s24 + $0x8] sm:$0xff]  ;;  %s3244_s24 = smov [#allocation8]  }
 0x604   : > { %v2782_v37 = vpop.f32.mrf.mxu0  ;;  %v2787_v36 = vpop.f32.mrf.mxu1  ;;  %s3164_s15 = sshll.u32 %s3244_s24, 4  ;;  %s3165_s15 = int_to_ptr.vmem [resolvable:$false] %s3164_s15 }
 0x605   : > { %2810 = vmatmul.mubr.msk.bf16.vlgmr.msra.gmra.mxu1 %vm758_vm2, %v1690_v0  ;;  %s3166_s26 = scalar_lea.vmem %s3165_s15, 1024  ;;  %p3167_p7 = scmp.lt.s32.totalorder %s3952_s3, %s3165_s15 }
 0x606   : > { %v1549_v1 = vpop.f32.mrf.mxu1  ;;  %v1590_v45 = vpop.f32.mrf.mxu0  ;;  %2820 = vmatpush3.bf16.msra.mxu1 %v2936_v13  ;;  %p3168_p8 = scmp.lt.s32.totalorder %s3166_s26, %s3160_s20 }
 0x607   : > { %v1816_v46 = vpack.c.bf16 %v1549_v1, %v1546_v62 }
 0x608   : > { %v2788_v4 = vpop.f32.mrf.mxu1  ;;  %v2793_v54 = vpop.f32.mrf.mxu0  ;;  %p3169_p11 = por %p3168_p8, %p3167_p7 }
 0x609   : > { %2821 = vmatprep.mubr.msk.bf16.mxu1 %vm758_vm2, %v1816_v46 }
 0x60a   : > { %v1593_v14 = vpop.f32.mrf.mxu0  ;;  %p3170_p0 = pnand %p3169_p11, %p3163_p12 }
 0x60b   : > { %v1817_v17 = vpack.c.bf16 %v1593_v14, %v1590_v45 }
 0x60c   : > { %v2794_v60 = vpop.f32.mrf.mxu0 }
 0x60d   : > { %2822 = vmatmul.mubr.msk.bf16.vlgmr.msra.gmra.mxu1 %vm758_vm2, %v1817_v17 }
 0x60e   : > { %2145 = vmatprep.mubr.bf16.mxu1 %v3237_v33 }
 0x63f   : > { %v1634_v22 = vpop.f32.mrf.mxu1 }
 0x641   : > { %v2799_v23 = vpop.f32.mrf.mxu1 }
 0x643   : > { %v1637_v26 = vpop.f32.mrf.mxu1  ;;  %v1678_v61 = vpop.f32.mrf.mxu0 }
 0x644   : > { %v1886_v56 = vpack.c.bf16 %v1637_v26, %v1634_v22 }
 0x645   : > { %v2800_v30 = vpop.f32.mrf.mxu1  ;;  %v2805_v2 = vpop.f32.mrf.mxu0 }
 0x646   : > { %2827 = vmatprep.mubr.msk.bf16.mxu0 %vm758_vm2, %v1886_v56 }
 0x647   : > { %v1681_v5 = vpop.f32.mrf.mxu0 }
 0x648   : > { %v1887_v63 = vpack.c.bf16 %v1681_v5, %v1678_v61 }
 0x649   : > { %v2806_v31 = vpop.f32.mrf.mxu0 }
 0x64a   : > { %2828 = vmatmul.mubr.msk.bf16.vlgmr.msra.gmra.mxu0 %vm758_vm2, %v1887_v63 }
 0x6a6   : > { %v2817_v58 = vpop.f32.mrf.mxu0 }
 0x6a8   : > { %v1801_v35 = vpop.f32.mrf.mxu0 }
 0x6aa   : > { %v2818_v18 = vpop.f32.mrf.mxu0 }
 0x6ac   : > { %v1804_v52 = vpop.f32.mrf.mxu0 }
 0x6c5   : > { %v2811_v32 = vpop.f32.mrf.mxu1 }
 0x6c6   : > { %v1810_v40 = vadd.f32 %v2817_v58, %v2811_v32 }
 0x6c7   : > { %v1740_v9 = vpop.f32.mrf.mxu1 }
 0x6c8   : > { %v1802_v43 = vadd.f32 %v1801_v35, %v1740_v9  ;;  %v2940_v35 = vld [vmem:[%s4007_s10 + $0x34] ss:$8 sps:$4 sm:$0xff]  }
 0x6c9   : > { %v2812_v8 = vpop.f32.mrf.mxu1  ;;  %2121 = vmatprep.subr.bf16.mxu1 %v2940_v35 }
 0x6ca   : > { %v1813_v44 = vadd.f32 %v2818_v18, %v2812_v8  ;;  %v2943_v18 = vld [vmem:[%s4007_s10 + $0x24] ss:$8 sps:$4 sm:$0xff]  }
 0x6cb   : > { %v1743_v34 = vpop.f32.mrf.mxu1 }
 0x6cc   : > { %v1805_v39 = vadd.f32 %v1804_v52, %v1743_v34  ;;  %v2944_v52 = vld [vmem:[%s4007_s10 + $0x10] ss:$8 sps:$4 sm:$0xff]  }
 0x6cd   : > { %v2823_v3 = vpop.f32.mrf.mxu1 }
 0x6ce   : > { %v1884_v12 = vadd.f32 %v2823_v3, %v1810_v40  ;;  %v2938_v3 = vld [vmem:[%s4007_s10 + $0x30] ss:$8 sps:$4 sm:$0xff]   ;;  %v2946_v40 = vld [vmem:[%s4007_s10 + $0x14] ss:$8 sps:$4 sm:$0xff]  }
 0x6cf   : > { %v1867_v38 = vpop.f32.mrf.mxu1  ;;  %2122 = vmatpush1.bf16.msra.mxu1 %v2938_v3 }
 0x6d0   : > { %v1882_v47 = vadd.f32 %v1867_v38, %v1802_v43  ;;  %v2941_v38 = vld [vmem:[%s4007_s10 + $0x20] ss:$8 sps:$4 sm:$0xff]   ;;  %2123 = vmatprep.subr.bf16.mxu1 %v2943_v18 }
 0x6d1   : > { %v2824_v10 = vpop.f32.mrf.mxu1  ;;  %v2947_v43 = vld [vmem:[%s4007_s10] ss:$8 sps:$4 sm:$0xff]  }
 0x6d2   : > { %v1885_v49 = vadd.f32 %v2824_v10, %v1813_v44  ;;  %v2949_v10 = vld [vmem:[%s4007_s10 + $0x4] ss:$8 sps:$4 sm:$0xff]  }
 0x6d3   : > { %v1870_v13 = vpop.f32.mrf.mxu1  ;;  %2124 = vmatpush1.bf16.msra.mxu1 %v2941_v38 }
 0x6d4   : > { %v1883_v20 = vadd.f32 %v1870_v13, %v1805_v39  ;;  %2125 = vmatprep.subr.bf16.mxu1 %v2946_v40 }
 0x6d7   : > { %2126 = vmatpush1.bf16.msra.mxu1 %v2944_v52 }
 0x6d8   : > { %2127 = vmatprep.subr.bf16.mxu1 %v2949_v10 }
 0x6db   : > { %2128 = vmatpush1.bf16.msra.mxu1 %v2947_v43 }
 0x70a   : > { %v2829_v16 = vpop.f32.mrf.mxu0 }
 0x70b   : > { %v1954_v48 = vadd.f32 %v2829_v16, %v1884_v12 }
 0x70c   : > { %v1937_v21 = vpop.f32.mrf.mxu0 }
 0x70d   : > { %v1952_v50 = vadd.f32 %v1937_v21, %v1882_v47  ;;  %v1958_v24 = vadd.f32 %v3078_v19, %v1954_v48 }
 0x70e   : > { %v2830_v51 = vpop.f32.mrf.mxu0 }
 0x70f   : > { %v1956_v55 = vadd.f32 %v3079_v41, %v1952_v50  ;;  %v1955_v53 = vadd.f32 %v2830_v51, %v1885_v49  ;;  %v3809_v25 = vadd.f32 %v2592_v57, %v1958_v24  ;;  %v2593_v41 = vld [vmem:[%s4005_s8] ss:$0 sm:$0xff] }
 0x710   : > { %v1940_v59 = vpop.f32.mrf.mxu0 }
 0x711   : > { %v3807_v11 = vadd.f32 %v2592_v57, %v1956_v55  ;;  %v1953_v15 = vadd.f32 %v1940_v59, %v1883_v20  ;;  %v1959_v27 = vadd.f32 %v3080_v29, %v1955_v53  ;;  %v1979_v1 = vsel %vm521_vm0, %v3809_v25, 0.0 }
 0x713   : > { %v1957_v62 = vadd.f32 %v3081_v28, %v1953_v15  ;;  %v1973_v0 = vsel %vm521_vm0, %v3807_v11, 0.0  ;;  %v3817_v36 = vadd.f32 %v2592_v57, %v1959_v27  ;;  %v2594_v15 = vld [vmem:[%s4006_s9] ss:$0 sm:$0xff] }
 0x714   : > { %1974 = vadd.xlane.f32.xlu0 %v1973_v0 }
 0x715   : > { %v3815_v37 = vadd.f32 %v2592_v57, %v1957_v62  ;;  %v1982_v46 = vsel %vm521_vm0, %v3817_v36, 0.0 }
 0x717   : > { %v1976_v45 = vsel %vm521_vm0, %v3815_v37, 0.0 }
 0x718   : > { %1980 = vadd.xlane.f32.xlu0 %v1979_v1  ;;  %1977 = vadd.xlane.f32.xlu1 %v1976_v45 }
 0x71c   : > { %1983 = vadd.xlane.f32.xlu0 %v1982_v46 }
 0x79d   : > { %v1975_v4 = vpop.xlane.xlu0 %1974 }
 0x79e   : > { %v1985_v54 = vmul.f32 0.015625, %v1975_v4 }
 0x7a0   : > { %v1989_v14 = vsub.f32 %v3807_v11, %v1985_v54 }
 0x7a1   : > { %v1981_v17 = vpop.xlane.xlu0 %1980  ;;  %v1978_v60 = vpop.xlane.xlu1 %1977 }
 0x7a2   : > { %v1987_v22 = vmul.f32 0.015625, %v1981_v17  ;;  %v1986_v23 = vmul.f32 0.015625, %v1978_v60  ;;  %v1993_v26 = vmul.f32 %v1989_v14, %v1989_v14  ;;  %v2950_v60 = vld [vmem:[%s4009_s12 + $0x78] sm:$0xff]  }
 0x7a3   : > { %2683 = vmatprep.subr.bf16.mxu0 %v2950_v60 }
 0x7a4   : > { %v1991_v61 = vsub.f32 %v3809_v25, %v1987_v22  ;;  %v1990_v56 = vsub.f32 %v3815_v37, %v1986_v23  ;;  %v1997_v30 = vsel %vm521_vm0, %v1993_v26, 0.0  ;;  %v2951_v22 = vld [vmem:[%s4009_s12 + $0x38] sm:$0xff]   ;;  %v2952_v23 = vld [vmem:[%s4009_s12 + $0x70] sm:$0xff]   ;;  %v2954_v26 = vld [vmem:[%s4009_s12 + $0x68] sm:$0xff]  }
 0x7a5   : > { %1998 = vadd.xlane.f32.xlu0 %v1997_v30  ;;  %v1984_v2 = vpop.xlane.xlu0 %1983  ;;  %2684 = vmatpush3.bf16.msra.mxu0 %v2951_v22  ;;  %v2957_v30 = vld [vmem:[%s4009_s12 + $0x20] sm:$0xff]  }
 0x7a6   : > { %v1988_v5 = vmul.f32 0.015625, %v1984_v2  ;;  %v1995_v63 = vmul.f32 %v1991_v61, %v1991_v61  ;;  %v1994_v31 = vmul.f32 %v1990_v56, %v1990_v56  ;;  %2685 = vmatprep.subr.bf16.mxu0 %v2952_v23  ;;  %v2958_v2 = vld [vmem:[%s4009_s12 + $0x58] sm:$0xff]  }
 0x7a8   : > { %v1992_v32 = vsub.f32 %v3817_v36, %v1988_v5  ;;  %v2003_v9 = vsel %vm521_vm0, %v1995_v63, 0.0  ;;  %v2000_v8 = vsel %vm521_vm0, %v1994_v31, 0.0  ;;  %v2959_v5 = vld [vmem:[%s4009_s12 + $0x18] sm:$0xff]   ;;  %v2960_v63 = vld [vmem:[%s4009_s12 + $0x50] sm:$0xff]  }
 0x7a9   : > { %2004 = vadd.xlane.f32.xlu0 %v2003_v9  ;;  %2001 = vadd.xlane.f32.xlu1 %v2000_v8  ;;  %v2961_v31 = vld [vmem:[%s4009_s12 + $0x10] sm:$0xff]   ;;  %v2963_v9 = vld [vmem:[%s4009_s12 + $0x8] sm:$0xff]   ;;  %v2964_v8 = vld [vmem:[%s4009_s12 + $0x40] sm:$0xff]  }
 0x7aa   : > { %v1996_v58 = vmul.f32 %v1992_v32, %v1992_v32 }
 0x7ac   : > { %v2006_v34 = vsel %vm521_vm0, %v1996_v58, 0.0  ;;  %v2965_v58 = vld [vmem:[%s4009_s12] sm:$0xff]  }
 0x7ad   : > { %2007 = vadd.xlane.f32.xlu1 %v2006_v34  ;;  %v2055_v34 = vld [vmem:[%s4008_s11] sm:$0x3] }
 0x7ae   : > { %v2060_v35 = vrot.slane %v2055_v34, %v609_v7  ;;  %v2064_v3 = vrot.slane %v2055_v34, %v613_v42 }
 0x82e   : > { %v1999_v12 = vpop.xlane.xlu0 %1998 }
 0x82f   : > { %v2009_v16 = vmul.f32 0.015625, %v1999_v12 }
 0x831   : > { %v2013_v44 = vadd.f32 1e-05, %v2009_v16 }
 0x832   : > { %v2005_v47 = vpop.xlane.xlu0 %2004  ;;  %v2002_v48 = vpop.xlane.xlu1 %2001 }
 0x833   : > { %3038 = vrsqrt.f32 %v2013_v44  ;;  %v2011_v13 = vmul.f32 0.015625, %v2005_v47  ;;  %v2010_v21 = vmul.f32 0.015625, %v2002_v48 }
 0x835   : > { %v2014_v39 = vadd.f32 1e-05, %v2010_v21  ;;  %v2015_v49 = vadd.f32 1e-05, %v2011_v13 }
 0x836   : > { %v2008_v50 = vpop.xlane.xlu1 %2007 }
 0x837   : > { %v2012_v51 = vmul.f32 0.015625, %v2008_v50  ;;  %3040 = vrsqrt.f32 %v2014_v39 }
 0x838   : > { %3042 = vrsqrt.f32 %v2015_v49 }
 0x839   : > { %v2016_v20 = vadd.f32 1e-05, %v2012_v51 }
 0x83b   : > { %3044 = vrsqrt.f32 %v2016_v20 }
 0x840   : > { %v3039_v19 = vpop.eup %3038 }
 0x841   : > { %v2021_v24 = vmul.f32 %v3039_v19, %v1989_v14 }
 0x843   : > { %v2031_v57 = vmul.f32 %v2593_v41, %v2021_v24 }
 0x844   : > { %v3041_v55 = vpop.eup %3040 }
 0x845   : > { %v2022_v53 = vmul.f32 %v3041_v55, %v1990_v56  ;;  %v3043_v59 = vpop.eup %3042  ;;  %v2041_v62 = vadd.f32 %v2594_v15, %v2031_v57  ;;  %v2956_v56 = vld [vmem:[%s4009_s12 + $0x60] sm:$0xff]  }
 0x846   : > { %v2023_v1 = vmul.f32 %v3043_v59, %v1991_v61  ;;  %v2955_v61 = vld [vmem:[%s4009_s12 + $0x28] sm:$0xff]  }
 0x847   : > { %v2032_v27 = vmul.f32 %v2593_v41, %v2022_v53 }
 0x848   : > { %v3045_v29 = vpop.eup %3044  ;;  %v2033_v4 = vmul.f32 %v2593_v41, %v2023_v1 }
 0x849   : > { %v2024_v28 = vmul.f32 %v3045_v29, %v1992_v32  ;;  %v2042_v0 = vadd.f32 %v2594_v15, %v2032_v27  ;;  %v2962_v32 = vld [vmem:[%s4009_s12 + $0x48] sm:$0xff]  }
 0x84a   : > { %v2043_v14 = vadd.f32 %v2594_v15, %v2033_v4 }
 0x84b   : > { %v2045_v45 = vpack.c.bf16 %v2042_v0, %v2041_v62  ;;  %v2034_v46 = vmul.f32 %v2593_v41, %v2024_v28 }
 0x84d   : > { %2603 = vmatmul.mubr.msk.bf16.vlgmr.msra.gmra.mxu1 %vm521_vm0, %v2045_v45  ;;  %v2044_v54 = vadd.f32 %v2594_v15, %v2034_v46 }
 0x84e   : > { %2155 = vmatprep.mubr.bf16.mxu1 %v3237_v33  ;;  %v2953_v33 = vld [vmem:[%s4009_s12 + $0x30] sm:$0xff]  }
 0x84f   : > { %v2046_v17 = vpack.c.bf16 %v2044_v54, %v2043_v14  ;;  %2686 = vmatpush3.bf16.msra.mxu0 %v2953_v33 }
 0x850   : > { %2687 = vmatprep.subr.bf16.mxu0 %v2954_v26 }
 0x853   : > { %2688 = vmatpush3.bf16.msra.mxu0 %v2955_v61 }
 0x854   : > { %2689 = vmatprep.subr.bf16.mxu0 %v2956_v56 }
 0x855   : > { %2604 = vmatmul.mubr.msk.bf16.gmra.mxu1 %vm521_vm0, %v2046_v17 }
 0x857   : > { %2690 = vmatpush3.bf16.msra.mxu0 %v2957_v30 }
 0x858   : > { %2691 = vmatprep.subr.bf16.mxu0 %v2958_v2 }
 0x85b   : > { %2692 = vmatpush3.bf16.msra.mxu0 %v2959_v5 }
 0x85c   : > { %2693 = vmatprep.subr.bf16.mxu0 %v2960_v63 }
 0x85f   : > { %2694 = vmatpush3.bf16.msra.mxu0 %v2961_v31 }
 0x860   : > { %2695 = vmatprep.subr.bf16.mxu0 %v2962_v32 }
 0x863   : > { %2696 = vmatpush3.bf16.msra.mxu0 %v2963_v9 }
 0x864   : > { %2697 = vmatprep.subr.bf16.mxu0 %v2964_v8 }
 0x867   : > { %2698 = vmatpush3.bf16.msra.mxu0 %v2965_v58 }
 0x90d   : > { %v2147_v18 = vpop.f32.mrf.mxu1 }
 0x90e   : > { %v3921_v38 = vadd.f32 %v2147_v18, %v2060_v35 }
 0x90f   : > { %v2149_v40 = vpop.f32.mrf.mxu1 }
 0x910   : > { %v2605_v52 = vmul.f32 -1.702, %v3921_v38  ;;  %v3924_v10 = vadd.f32 %v2149_v40, %v2064_v3 }
 0x911   : > { %v2151_v43 = vpop.f32.mrf.mxu1 }
 0x912   : > { %v2182_v12 = vmul.f32 1.442695, %v2605_v52  ;;  %v2606_v16 = vmul.f32 -1.702, %v3924_v10  ;;  %v2152_v44 = vadd.f32 %v2151_v43, %v2060_v35 }
 0x913   : > { %v2153_v47 = vpop.f32.mrf.mxu1 }
 0x914   : > { %v2184_v48 = vmul.f32 1.442695, %v2606_v16  ;;  %v2607_v13 = vmul.f32 -1.702, %v2152_v44  ;;  %v2154_v7 = vadd.f32 %v2153_v47, %v2064_v3  ;;  %3046 = vpow2.f32 %v2182_v12 }
 0x915   : > { %v2157_v6 = vpop.f32.mrf.mxu1 }
 0x916   : > { %3048 = vpow2.f32 %v2184_v48  ;;  %v2186_v42 = vmul.f32 1.442695, %v2607_v13  ;;  %v2608_v21 = vmul.f32 -1.702, %v2154_v7  ;;  %v3927_v39 = vadd.f32 %v2157_v6, %v2060_v35  ;;  %v2629_v13 = vld [vmem:[%s4010_s13] ss:$0 sm:$0xff] }
 0x917   : > { %v2159_v49 = vpop.f32.mrf.mxu1 }
 0x918   : > { %3050 = vpow2.f32 %v2186_v42  ;;  %v2188_v50 = vmul.f32 1.442695, %v2608_v21  ;;  %v2609_v51 = vmul.f32 -1.702, %v3927_v39  ;;  %v2160_v20 = vadd.f32 %v2159_v49, %v2064_v3 }
 0x919   : > { %v2161_v19 = vpop.f32.mrf.mxu1 }
 0x91a   : > { %3052 = vpow2.f32 %v2188_v50  ;;  %v2190_v24 = vmul.f32 1.442695, %v2609_v51  ;;  %v2610_v41 = vmul.f32 -1.702, %v2160_v20  ;;  %v2162_v55 = vadd.f32 %v2161_v19, %v2060_v35 }
 0x91b   : > { %v2163_v53 = vpop.f32.mrf.mxu1 }
 0x91c   : > { %v2192_v57 = vmul.f32 1.442695, %v2610_v41  ;;  %v2611_v59 = vmul.f32 -1.702, %v2162_v55  ;;  %v2164_v15 = vadd.f32 %v2163_v53, %v2064_v3  ;;  %3054 = vpow2.f32 %v2190_v24 }
 0x91e   : > { %3056 = vpow2.f32 %v2192_v57  ;;  %v2194_v29 = vmul.f32 1.442695, %v2611_v59  ;;  %v2612_v27 = vmul.f32 -1.702, %v2164_v15 }
 0x920   : > { %3058 = vpow2.f32 %v2194_v29  ;;  %v2196_v28 = vmul.f32 1.442695, %v2612_v27 }
 0x921   : > { %v3047_v62 = vpop.eup %3046 }
 0x922   : > { %3060 = vpow2.f32 %v2196_v28  ;;  %v2198_v46 = vadd.f32 1.0, %v3047_v62 }
 0x923   : > { %v3049_v0 = vpop.eup %3048 }
 0x924   : > { %v2199_v1 = vadd.f32 1.0, %v3049_v0 }
 0x925   : > { %v3051_v45 = vpop.eup %3050 }
 0x926   : > { %v2200_v4 = vadd.f32 1.0, %v3051_v45  ;;  %3062 = vrcp.f32 %v2199_v1 }
 0x927   : > { %v3053_v54 = vpop.eup %3052 }
 0x928   : > { %3064 = vrcp.f32 %v2200_v4  ;;  %v2201_v14 = vadd.f32 1.0, %v3053_v54 }
 0x929   : > { %3066 = vrcp.f32 %v2198_v46  ;;  %v3055_v17 = vpop.eup %3054 }
 0x92a   : > { %3068 = vrcp.f32 %v2201_v14  ;;  %v2202_v33 = vadd.f32 1.0, %v3055_v17 }
 0x92b   : > { %v3057_v60 = vpop.eup %3056 }
 0x92c   : > { %v2203_v22 = vadd.f32 1.0, %v3057_v60 }
 0x92d   : > { %v3059_v23 = vpop.eup %3058 }
 0x92e   : > { %v2204_v26 = vadd.f32 1.0, %v3059_v23  ;;  %3070 = vrcp.f32 %v2203_v22 }
 0x92f   : > { %v3061_v61 = vpop.eup %3060 }
 0x930   : > { %3072 = vrcp.f32 %v2204_v26  ;;  %v2205_v56 = vadd.f32 1.0, %v3061_v61 }
 0x931   : > { %3074 = vrcp.f32 %v2202_v33 }
 0x932   : > { %3076 = vrcp.f32 %v2205_v56 }
 0x933   : > { %v3063_v30 = vpop.eup %3062 }
 0x934   : > { %v2223_v32 = vmul.f32 %v3063_v30, %v3924_v10 }
 0x935   : > { %v3065_v2 = vpop.eup %3064 }
 0x936   : > { %v3067_v5 = vpop.eup %3066  ;;  %v2224_v31 = vmul.f32 %v3065_v2, %v2152_v44 }
 0x937   : > { %v3069_v63 = vpop.eup %3068  ;;  %v2222_v8 = vmul.f32 %v3067_v5, %v3921_v38 }
 0x938   : > { %v2225_v9 = vmul.f32 %v3069_v63, %v2154_v7 }
 0x939   : > { %v2230_v34 = vpack.c.bf16 %v2224_v31, %v2222_v8 }
 0x93a   : > { %v2231_v58 = vpack.c.bf16 %v2225_v9, %v2223_v32 }
 0x93b   : > { %v3071_v35 = vpop.eup %3070 }
 0x93c   : > { %2394 = vmatprep.mubr.bf16.mxu0 %v2231_v58  ;;  %v2227_v43 = vmul.f32 %v3071_v35, %v2160_v20 }
 0x93d   : > { %v3073_v3 = vpop.eup %3072  ;;  %2395 = vmatmul.mubr.bf16.vlgmr.msra.gmra.mxu0 %v2230_v34 }
 0x93e   : > { %v3075_v18 = vpop.eup %3074  ;;  %v2228_v52 = vmul.f32 %v3073_v3, %v2162_v55 }
 0x93f   : > { %v3077_v40 = vpop.eup %3076  ;;  %v2226_v16 = vmul.f32 %v3075_v18, %v3927_v39 }
 0x940   : > { %v2229_v12 = vmul.f32 %v3077_v40, %v2164_v15 }
 0x941   : > { %v2232_v10 = vpack.c.bf16 %v2228_v52, %v2226_v16 }
 0x942   : > { %v2233_v44 = vpack.c.bf16 %v2229_v12, %v2227_v43 }
 0x944   : > { %2402 = vmatprep.mubr.bf16.mxu0 %v2233_v44 }
 0x945   : > { %2403 = vmatmul.mubr.bf16.gmra.mxu0 %v2232_v10 }
 0x9fd   : > { %v2699_v38 = vpop.f32.mrf.mxu0 }
 0x9ff   : > { %v2700_v47 = vpop.f32.mrf.mxu0 }
 0xa00   : > { %v2701_v48 = vadd.f32 %v2700_v47, %v2699_v38 }
 0xa01   : > { %v2702_v7 = vpop.f32.mrf.mxu0 }
 0xa02   : > { %v2411_v6 = vadd.f32 %v2701_v48, %v3807_v11 }
 0xa03   : > { %v2703_v42 = vpop.f32.mrf.mxu0 }
 0xa04   : > { %v2422_v21 = vadd.f32 %v2629_v13, %v2411_v6  ;;  %v2704_v39 = vadd.f32 %v2703_v42, %v2702_v7 }
 0xa05   : > { %v2705_v49 = vpop.f32.mrf.mxu0 }
 0xa06   : > { %2426 = vst.msk [vmem:[%s505_s21] sm:$0xff] %vm521_vm0, %v2422_v21  ;;  %v2412_v50 = vadd.f32 %v2704_v39, %v3815_v37 }
 0xa07   : > { %v2706_v51 = vpop.f32.mrf.mxu0 }
 0xa08   : > { %v2423_v20 = vadd.f32 %v2629_v13, %v2412_v50  ;;  %v2707_v19 = vadd.f32 %v2706_v51, %v2705_v49 }
 0xa09   : > { %v2708_v24 = vpop.f32.mrf.mxu0 }
 0xa0a   : > { %2427 = vst.msk [vmem:[%s505_s21 + $0x8] sm:$0xff] %vm521_vm0, %v2423_v20  ;;  %v2413_v11 = vadd.f32 %v2707_v19, %v3809_v25 }
 0xa0b   : > { %v2709_v41 = vpop.f32.mrf.mxu0 }
 0xa0c   : > { %v2424_v55 = vadd.f32 %v2629_v13, %v2413_v11  ;;  %v2710_v53 = vadd.f32 %v2709_v41, %v2708_v24 }
 0xa0e   : > { %2428 = vst.msk [vmem:[%s505_s21 + $0x10] sm:$0xff] %vm521_vm0, %v2424_v55  ;;  %v2414_v57 = vadd.f32 %v2710_v53, %v3817_v36 }
 0xa10   : > { %v2425_v25 = vadd.f32 %v2629_v13, %v2414_v57 }
 0xa12   : > { %2429 = vst.msk [vmem:[%s505_s21 + $0x18] sm:$0xff] %vm521_vm0, %v2425_v25 }
 0xa13   : > { %3173 = shalt.err (!%p3170_p0)
}
 0xa14   : > { %s3174_s19 = scalar_lea.hbm %s3950_s25, 512  ;;  %s3178_s21 = scalar_lea.hbm %s4011_s14, 1024 }
 0xa15   : > { %p3175_p3 = scmp.ne.s32.totalorder %s3950_s25, %s3174_s19  ;;  %p3179_p4 = scmp.lt.s32.totalorder %s3950_s25, %s4011_s14 }
 0xa16   : > { %p3180_p13 = scmp.lt.s32.totalorder %s3178_s21, %s3174_s19 }
 0xa17   : > { %p3176_p1 = pnand %p3175_p3, %p3360_p5 }
 0xa18   : > { %p3181_p9 = por %p3180_p13, %p3179_p4 }
 0xa19   : > { %p3177_p2 = pneg %p3176_p1 }
 0xa1b   : > { %p3182_p10 = pnand %p3181_p9, %p3177_p2 }
 0xa1d   : > { %3185 = shalt.err (!%p3182_p10)
}
 0xa1e   : > { %s3245_s22 = smov 128   ;;  %s3246_s20 = smov 8  }
 0xa1f   : > { %2851 = dma.vmem_to_hbm [thread:$0]  (%p3360_p5), %s3952_s3, 512, %s3950_s25, %s3957_s17, %s3245_s22, %s3245_s22, %s3246_s20  }
 0xa20 PF: > { %s4028_s24 = sld [smem:[#allocation12_spill]]  ;;  %p2873_p12 = scmp.ge.s32.totalorder %s3228_s16, 2 }
 0xa22   : > { %p2864_p7 = pnand %p2873_p12, %p3364_p6 }
 0xa24   : > { %p2865_p8 = pneg %p2864_p7 }
 0xa26   : > { %s2460_s26 = sand.u32 1, %s4028_s24  }
 0xa27   : > { %s2461_s19 = scalar_lea.sflag [#allocation4], %s2460_s26 }
 0xa28   : > { %3211 = dma.done.wait (%p2865_p8), %s2461_s19, 512  }
 0xa29   : > { %3213 = vsyncadd (%p2865_p8), %s2461_s19, 4294966784  ;;  %s4030_s16 = sld [smem:[#allocation14_spill]]  ;;  %s4033_s29 = smov %s3220_s30 }
 0xa2a   : > { %s4031_s27 = sld [smem:[#allocation13_spill]] }
 0xa2b   : > { %s4032_s15 = sld [smem:[#allocation15_spill]] }
 0xa2f   : > { %p26_p11 = scmp.ge.s32.totalorder %s4030_s16, 4  }
 0xa30   : > { %s4034_s30 = smov %s4031_s27 }
 0xa31   :  { %28 = sbr.rel (!%p26_p11) target bundleno = 7 (0x7), region = 127 }
 0xa36   :  { %2466 = vsyncpa [#allocation3], 1 }
 0xa37   :  { %2468 = vsyncpa [#allocation3 + $0x1], 1 }
 0xa38   :  { %2469 = vsyncpa [#allocation6], 1 }
 0xa39   :  { %2470 = vsyncpa [#allocation4], 1 }
 0xa3a   :  { %2472 = vsyncpa [#allocation4 + $0x1], 1 }

</bundles_post_ra>
